<compile_context>
chip_gen: v5e
topology: v5e:2x2
jax: 0.10.0
libtpu: 0.0.40
codegen_flags: <defaults>
</compile_context>

<pallas_src>
import jax
import jax.numpy as jnp
from jax.experimental import pallas as pl
from jax.experimental.pallas import tpu as pltpu


HP = 128          # gate-block lane stride (vreg-aligned gate extraction)


# ------------------------------ fused mega-kernel ------------------------------
def fused_lstm_kernel(x_ref, wih0_ref, b0_ref, wcomb_ref, b1_ref,
                      wfc_ref, bfc_ref, wfc1_ref, bfc1_ref,
                      out_ref, gx_scr):
    """x_ref: (T*BP, D) time-major, batch padded to BP sublanes.
    wcomb_ref: (2H, 8*HP) fused recurrent weight [[Whh0|Wih1],[0|Whh1]].
    out_ref: (BP, 2).  gx_scr: (T, BP, 4*HP) staged layer-0 input projection."""
    BP = out_ref.shape[0]          # padded batch (multiple of 8)
    T = gx_scr.shape[0]
    G = gx_scr.shape[2]            # 4 * HP
    H = wfc_ref.shape[0]           # true hidden size (32)

    # Hoisted layer-0 input projection: one big matmul off the serial critical
    # path, staged time-major in VMEM (never touches HBM).  Static stores at
    # sublane-group boundaries (layout-preserving, no relayout).
    gx = (jnp.dot(x_ref[...], wih0_ref[...], preferred_element_type=jnp.float32)
          + b0_ref[...])                                        # (T*BP, G)
    for t in range(T):
        gx_scr[t] = gx[t * BP:(t + 1) * BP, :]

    # Hoist the bias broadcast out of the recurrence (JAX does not CSE it).
    b1 = jnp.broadcast_to(b1_ref[...], (BP, G))

    def cell(gates, c):
        # Gate blocks start at multiples of 128 lanes -> each slice is pure
        # vreg selection (no XLU relayout); elementwise math stays f32 on
        # VPU/EUP (sigmoid/tanh issue in the EUP slot).
        i_g = jax.nn.sigmoid(gates[:, 0 * HP:0 * HP + H])
        f_g = jax.nn.sigmoid(gates[:, 1 * HP:1 * HP + H])
        g_g = jnp.tanh(gates[:, 2 * HP:2 * HP + H])
        o_g = jax.nn.sigmoid(gates[:, 3 * HP:3 * HP + H])
        c_new = f_g * c + i_g * g_g
        h_new = o_g * jnp.tanh(c_new)
        return h_new, c_new

    def fused_dot(h0, h1):
        # One MXU dot produces BOTH layers' h-dependent gate contributions.
        hh = jnp.concatenate([h0, h1], axis=1)                  # (BP, 2H)
        return jnp.dot(hh, wcomb_ref[...],                      # (BP, 2G)
                       preferred_element_type=jnp.float32)

    # ---- wavefront prologue: layer 0 @ t=0 (h0(-1)=c0(-1)=0 -> gates = gx[0]).
    z = jnp.zeros((BP, H), jnp.float32)
    h0, c0 = cell(gx_scr[0], z)
    h1, c1 = z, z                                               # layer-1 state @ t=-1

    # ---- wavefront steps s=1..T-1: layer 0 @ time s, layer 1 @ time s-1,
    # sharing a single fused MXU dot (both depend only on step s-1 state).
    def step(s, carry):
        h0, c0, h1, c1 = carry
        gg = fused_dot(h0, h1)
        gates0 = gx_scr[s] + gg[:, :G]                          # layer 0, time s
        gates1 = gg[:, G:] + b1                                 # layer 1, time s-1
        h0n, c0n = cell(gates0, c0)
        h1n, c1n = cell(gates1, c1)
        return h0n, c0n, h1n, c1n

    # Full unroll is right for small fixed T; for long sequences switch to a
    # partial unroll (4..8) so live state stays under the 64-vreg file.
    h0, c0, h1, c1 = jax.lax.fori_loop(1, T, step, (h0, c0, h1, c1),
                                       unroll=True)

    # ---- wavefront epilogue: layer 1 @ time T-1.
    gg = fused_dot(h0, h1)
    h1, _ = cell(gg[:, G:] + b1, c1)

    # ---- fc -> relu -> fc1 head (hn[1] == h1 with zero initial state).
    o1 = jnp.maximum(
        jnp.dot(h1, wfc_ref[...], preferred_element_type=jnp.float32)
        + bfc_ref[...], 0.0)
    out_ref[...] = (jnp.dot(o1, wfc1_ref[...], preferred_element_type=jnp.float32)
                    + bfc1_ref[...]).astype(out_ref.dtype)


# --------------------------- weight packing (wrapper) ---------------------------
def _pad_gate_cols(w, H):
    """(K, 4H) -> (K, 4*HP): each [i,f,g,o] gate block placed at a 128-lane stride."""
    K = w.shape[0]
    out = jnp.zeros((K, 4 * HP), w.dtype)
    for g in range(4):
        out = out.at[:, g * HP:g * HP + H].set(w[:, g * H:(g + 1) * H])
    return out


def pack_params(params):
    """Build gate-padded / fused kernel operands (done once, layout plumbing)."""
    H = params["whh0_t"].shape[0]
    wcomb = jnp.zeros((2 * H, 8 * HP), jnp.float32)
    wcomb = wcomb.at[:H, :4 * HP].set(_pad_gate_cols(params["whh0_t"], H))
    wcomb = wcomb.at[:H, 4 * HP:].set(_pad_gate_cols(params["wih1_t"], H))
    wcomb = wcomb.at[H:, 4 * HP:].set(_pad_gate_cols(params["whh1_t"], H))
    return {
        "wih0": _pad_gate_cols(params["wih0_t"], H),
        "b0": _pad_gate_cols(params["b0"], H),
        "wcomb": wcomb,
        "b1": _pad_gate_cols(params["b1"], H),
        "wfc": params["wfc_t"], "bfc": params["bfc"],
        "wfc1": params["wfc1_t"], "bfc1": params["bfc1"],
    }


# ------------------------------- full forward ----------------------------------
def lstm_model_forward(x_btd, params):
    """x_btd: (B, T, input_dim) -> (B, 2), matching the PyTorch module."""
    B, T, D = x_btd.shape
    p = pack_params(params)
    BP = ((B + 7) // 8) * 8                      # pad batch to full sublane groups
    # Layout plumbing in the wrapper: time-major, batch-padded, flattened.
    x_tbd = jnp.transpose(x_btd, (1, 0, 2))
    x_tbd = jnp.pad(x_tbd, ((0, 0), (0, BP - B), (0, 0)))
    x_flat = x_tbd.reshape(T * BP, D)

    out_padded = pl.pallas_call(
        fused_lstm_kernel,
        out_shape=jax.ShapeDtypeStruct((BP, 2), jnp.float32),
        scratch_shapes=[pltpu.VMEM((T, BP, 4 * HP), jnp.float32)],
        # Whole-array inputs (weights ~0.3 MiB) + (T,BP,4*HP) scratch are far
        # under this; explicit so the VMEM budget is visible on all gens.
        compiler_params=pltpu.CompilerParams(vmem_limit_bytes=16 * 1024 * 1024),
    )(x_flat, p["wih0"], p["b0"], p["wcomb"], p["b1"],
      p["wfc"], p["bfc"], p["wfc1"], p["bfc1"])
    # TODO(synk): for large T*B, chunk the gx projection over time with a
    # 2-slot double buffer (v7x 64 MiB VMEM) and add a batch-parallel grid axis
    # (dimension_semantics=('parallel',)) to use v7x's two TensorCores; switch
    # MXU operands to bf16 on v6e/v7x once the f32-reference tolerance allows.
    return out_padded[:B]


# ------------------------------ pure-JAX reference ------------------------------
def reference_forward(x_btd, params):
    B = x_btd.shape[0]
    H = params["whh0_t"].shape[0]

    def run_layer(xs, wih_t, whh_t, b):     # xs: (T, B, D)
        def step(carry, x_t):
            h, c = carry
            gates = x_t @ wih_t + h @ whh_t + b[0]
            i = jax.nn.sigmoid(gates[:, 0 * H:1 * H])
            f = jax.nn.sigmoid(gates[:, 1 * H:2 * H])
            g = jnp.tanh(gates[:, 2 * H:3 * H])
            o = jax.nn.sigmoid(gates[:, 3 * H:4 * H])
            c_new = f * c + i * g
            h_new = o * jnp.tanh(c_new)
            return (h_new, c_new), h_new
        init = (jnp.zeros((B, H), jnp.float32), jnp.zeros((B, H), jnp.float32))
        _, ys = jax.lax.scan(step, init, xs)
        return ys

    xs = jnp.transpose(x_btd, (1, 0, 2))
    y0 = run_layer(xs, params["wih0_t"], params["whh0_t"], params["b0"])
    y1 = run_layer(y0, params["wih1_t"], params["whh1_t"], params["b1"])
    h_last = y1[-1]
    o1 = jnp.maximum(h_last @ params["wfc_t"] + params["bfc"][0], 0.0)
    return o1 @ params["wfc1_t"] + params["bfc1"][0]


# ------------------------------------- main -------------------------------------
if __name__ == "__main__":
    B, T = 2, 8
    input_dim, hidden_dim, num_layers, output_dim = 8, 32, 2, 4  # hn[1] => 2 layers

    key = jax.random.PRNGKey(0)
    ks = jax.random.split(key, 12)
    scale = 1.0 / jnp.sqrt(hidden_dim)

    def u(k, shape):
        return jax.random.uniform(k, shape, jnp.float32, -scale, scale)

    params = {
        # layer 0: W_ih^T (D, 4H), W_hh^T (H, 4H), combined bias (1, 4H)
        "wih0_t": u(ks[0], (input_dim, 4 * hidden_dim)),
        "whh0_t": u(ks[1], (hidden_dim, 4 * hidden_dim)),
        "b0":     u(ks[2], (1, 4 * hidden_dim)) + u(ks[3], (1, 4 * hidden_dim)),
        # layer 1: input is hidden of layer 0
        "wih1_t": u(ks[4], (hidden_dim, 4 * hidden_dim)),
        "whh1_t": u(ks[5], (hidden_dim, 4 * hidden_dim)),
        "b1":     u(ks[6], (1, 4 * hidden_dim)) + u(ks[7], (1, 4 * hidden_dim)),
        # fc: (H -> output_dim), fc1: (output_dim -> 2), transposed weights
        "wfc_t":  u(ks[8], (hidden_dim, output_dim)),
        "bfc":    u(ks[9], (1, output_dim)),
        "wfc1_t": u(ks[10], (output_dim, 2)),
        "bfc1":   u(ks[11], (1, 2)),
    }

    x = jax.random.normal(jax.random.PRNGKey(42), (B, T, input_dim), jnp.float32)

    out = lstm_model_forward(x, params)
    out = jax.block_until_ready(out)

    ref = reference_forward(x, params)
    assert out.shape == (B, 2), out.shape
    assert jnp.allclose(out, ref, atol=1e-4, rtol=1e-4), (out, ref)

    print("KERNEL_OK")
</pallas_src>

<mosaic_0001>
module attributes {stable_mosaic.version = 11 : i64} {
  func.func @fused_lstm_kernel(%arg0: memref<64x8xf32, #tpu.memory_space<vmem>>, %arg1: memref<8x512xf32, #tpu.memory_space<vmem>>, %arg2: memref<1x512xf32, #tpu.memory_space<vmem>>, %arg3: memref<64x1024xf32, #tpu.memory_space<vmem>>, %arg4: memref<1x512xf32, #tpu.memory_space<vmem>>, %arg5: memref<32x4xf32, #tpu.memory_space<vmem>>, %arg6: memref<1x4xf32, #tpu.memory_space<vmem>>, %arg7: memref<4x2xf32, #tpu.memory_space<vmem>>, %arg8: memref<1x2xf32, #tpu.memory_space<vmem>>, %arg9: memref<8x2xf32, #tpu.memory_space<vmem>>, %arg10: memref<8x8x512xf32, #tpu.memory_space<vmem>>) attributes {dimension_semantics = [], scalar_prefetch = 0 : i64, scratch_operands = 1 : i64, tpu.core_type = #tpu.core_type<tc>} {
    %c0 = arith.constant 0 : index
    %c0_0 = arith.constant 0 : index
    %0 = vector.load %arg0[%c0, %c0_0] : memref<64x8xf32, #tpu.memory_space<vmem>>, vector<64x8xf32>
    %c0_1 = arith.constant 0 : index
    %c0_2 = arith.constant 0 : index
    %1 = vector.load %arg1[%c0_1, %c0_2] : memref<8x512xf32, #tpu.memory_space<vmem>>, vector<8x512xf32>
    %cst = arith.constant dense<0.000000e+00> : vector<64x512xf32>
    %2 = tpu.matmul %0, %1, %cst {dimension_numbers = #tpu.dot_dimension_numbers<[1], [0], [0], [1], [0, 0, 1, 1], [], []>} : vector<64x8xf32>, vector<8x512xf32>, vector<64x512xf32> -> vector<64x512xf32>
    %c0_3 = arith.constant 0 : index
    %c0_4 = arith.constant 0 : index
    %3 = vector.load %arg2[%c0_3, %c0_4] : memref<1x512xf32, #tpu.memory_space<vmem>>, vector<1x512xf32>
    %4 = vector.broadcast %3 : vector<1x512xf32> to vector<64x512xf32>
    %5 = arith.addf %2, %4 : vector<64x512xf32>
    %6 = vector.extract_strided_slice %5 {offsets = [0, 0], sizes = [8, 512], strides = [1, 1]} : vector<64x512xf32> to vector<8x512xf32>
    %c0_5 = arith.constant 0 : index
    %c0_6 = arith.constant 0 : index
    %c0_7 = arith.constant 0 : index
    %7 = vector.load %arg10[%c0_5, %c0_6, %c0_7] : memref<8x8x512xf32, #tpu.memory_space<vmem>>, vector<1x8x512xf32>
    %8 = vector.shape_cast %7 : vector<1x8x512xf32> to vector<8x512xf32>
    %9 = vector.shape_cast %6 : vector<8x512xf32> to vector<1x8x512xf32>
    tpu.vector_store %arg10[%c0_5, %c0_6, %c0_7], %9 {strides = array<i32>} : memref<8x8x512xf32, #tpu.memory_space<vmem>>, vector<1x8x512xf32>,
    %10 = vector.extract_strided_slice %5 {offsets = [8, 0], sizes = [8, 512], strides = [1, 1]} : vector<64x512xf32> to vector<8x512xf32>
    %c1 = arith.constant 1 : index
    %c0_8 = arith.constant 0 : index
    %c0_9 = arith.constant 0 : index
    %11 = vector.load %arg10[%c1, %c0_8, %c0_9] : memref<8x8x512xf32, #tpu.memory_space<vmem>>, vector<1x8x512xf32>
    %12 = vector.shape_cast %11 : vector<1x8x512xf32> to vector<8x512xf32>
    %13 = vector.shape_cast %10 : vector<8x512xf32> to vector<1x8x512xf32>
    tpu.vector_store %arg10[%c1, %c0_8, %c0_9], %13 {strides = array<i32>} : memref<8x8x512xf32, #tpu.memory_space<vmem>>, vector<1x8x512xf32>,
    %14 = vector.extract_strided_slice %5 {offsets = [16, 0], sizes = [8, 512], strides = [1, 1]} : vector<64x512xf32> to vector<8x512xf32>
    %c2 = arith.constant 2 : index
    %c0_10 = arith.constant 0 : index
    %c0_11 = arith.constant 0 : index
    %15 = vector.load %arg10[%c2, %c0_10, %c0_11] : memref<8x8x512xf32, #tpu.memory_space<vmem>>, vector<1x8x512xf32>
    %16 = vector.shape_cast %15 : vector<1x8x512xf32> to vector<8x512xf32>
    %17 = vector.shape_cast %14 : vector<8x512xf32> to vector<1x8x512xf32>
    tpu.vector_store %arg10[%c2, %c0_10, %c0_11], %17 {strides = array<i32>} : memref<8x8x512xf32, #tpu.memory_space<vmem>>, vector<1x8x512xf32>,
    %18 = vector.extract_strided_slice %5 {offsets = [24, 0], sizes = [8, 512], strides = [1, 1]} : vector<64x512xf32> to vector<8x512xf32>
    %c3 = arith.constant 3 : index
    %c0_12 = arith.constant 0 : index
    %c0_13 = arith.constant 0 : index
    %19 = vector.load %arg10[%c3, %c0_12, %c0_13] : memref<8x8x512xf32, #tpu.memory_space<vmem>>, vector<1x8x512xf32>
    %20 = vector.shape_cast %19 : vector<1x8x512xf32> to vector<8x512xf32>
    %21 = vector.shape_cast %18 : vector<8x512xf32> to vector<1x8x512xf32>
    tpu.vector_store %arg10[%c3, %c0_12, %c0_13], %21 {strides = array<i32>} : memref<8x8x512xf32, #tpu.memory_space<vmem>>, vector<1x8x512xf32>,
    %22 = vector.extract_strided_slice %5 {offsets = [32, 0], sizes = [8, 512], strides = [1, 1]} : vector<64x512xf32> to vector<8x512xf32>
    %c4 = arith.constant 4 : index
    %c0_14 = arith.constant 0 : index
    %c0_15 = arith.constant 0 : index
    %23 = vector.load %arg10[%c4, %c0_14, %c0_15] : memref<8x8x512xf32, #tpu.memory_space<vmem>>, vector<1x8x512xf32>
    %24 = vector.shape_cast %23 : vector<1x8x512xf32> to vector<8x512xf32>
    %25 = vector.shape_cast %22 : vector<8x512xf32> to vector<1x8x512xf32>
    tpu.vector_store %arg10[%c4, %c0_14, %c0_15], %25 {strides = array<i32>} : memref<8x8x512xf32, #tpu.memory_space<vmem>>, vector<1x8x512xf32>,
    %26 = vector.extract_strided_slice %5 {offsets = [40, 0], sizes = [8, 512], strides = [1, 1]} : vector<64x512xf32> to vector<8x512xf32>
    %c5 = arith.constant 5 : index
    %c0_16 = arith.constant 0 : index
    %c0_17 = arith.constant 0 : index
    %27 = vector.load %arg10[%c5, %c0_16, %c0_17] : memref<8x8x512xf32, #tpu.memory_space<vmem>>, vector<1x8x512xf32>
    %28 = vector.shape_cast %27 : vector<1x8x512xf32> to vector<8x512xf32>
    %29 = vector.shape_cast %26 : vector<8x512xf32> to vector<1x8x512xf32>
    tpu.vector_store %arg10[%c5, %c0_16, %c0_17], %29 {strides = array<i32>} : memref<8x8x512xf32, #tpu.memory_space<vmem>>, vector<1x8x512xf32>,
    %30 = vector.extract_strided_slice %5 {offsets = [48, 0], sizes = [8, 512], strides = [1, 1]} : vector<64x512xf32> to vector<8x512xf32>
    %c6 = arith.constant 6 : index
    %c0_18 = arith.constant 0 : index
    %c0_19 = arith.constant 0 : index
    %31 = vector.load %arg10[%c6, %c0_18, %c0_19] : memref<8x8x512xf32, #tpu.memory_space<vmem>>, vector<1x8x512xf32>
    %32 = vector.shape_cast %31 : vector<1x8x512xf32> to vector<8x512xf32>
    %33 = vector.shape_cast %30 : vector<8x512xf32> to vector<1x8x512xf32>
    tpu.vector_store %arg10[%c6, %c0_18, %c0_19], %33 {strides = array<i32>} : memref<8x8x512xf32, #tpu.memory_space<vmem>>, vector<1x8x512xf32>,
    %34 = vector.extract_strided_slice %5 {offsets = [56, 0], sizes = [8, 512], strides = [1, 1]} : vector<64x512xf32> to vector<8x512xf32>
    %c7 = arith.constant 7 : index
    %c0_20 = arith.constant 0 : index
    %c0_21 = arith.constant 0 : index
    %35 = vector.load %arg10[%c7, %c0_20, %c0_21] : memref<8x8x512xf32, #tpu.memory_space<vmem>>, vector<1x8x512xf32>
    %36 = vector.shape_cast %35 : vector<1x8x512xf32> to vector<8x512xf32>
    %37 = vector.shape_cast %34 : vector<8x512xf32> to vector<1x8x512xf32>
    tpu.vector_store %arg10[%c7, %c0_20, %c0_21], %37 {strides = array<i32>} : memref<8x8x512xf32, #tpu.memory_space<vmem>>, vector<1x8x512xf32>,
    %c0_22 = arith.constant 0 : index
    %c0_23 = arith.constant 0 : index
    %38 = vector.load %arg4[%c0_22, %c0_23] : memref<1x512xf32, #tpu.memory_space<vmem>>, vector<1x512xf32>
    %39 = vector.shape_cast %38 : vector<1x512xf32> to vector<1x512xf32>
    %40 = vector.broadcast %39 : vector<1x512xf32> to vector<8x512xf32>
    %cst_24 = arith.constant 0.000000e+00 : f32
    %41 = vector.broadcast %cst_24 : f32 to vector<8x32xf32>
    %c0_25 = arith.constant 0 : index
    %c0_26 = arith.constant 0 : index
    %c0_27 = arith.constant 0 : index
    %42 = vector.load %arg10[%c0_25, %c0_26, %c0_27] : memref<8x8x512xf32, #tpu.memory_space<vmem>>, vector<1x8x512xf32>
    %43 = vector.shape_cast %42 : vector<1x8x512xf32> to vector<8x512xf32>
    %44 = vector.extract_strided_slice %43 {offsets = [0, 0], sizes = [8, 32], strides = [1, 1]} : vector<8x512xf32> to vector<8x32xf32>
    %45 = arith.negf %44 : vector<8x32xf32>
    %46 = math.exp %45 : vector<8x32xf32>
    %cst_28 = arith.constant 1.000000e+00 : f32
    %47 = vector.broadcast %cst_28 : f32 to vector<8x32xf32>
    %48 = arith.addf %47, %46 : vector<8x32xf32>
    %49 = arith.divf %47, %48 : vector<8x32xf32>
    %50 = vector.extract_strided_slice %43 {offsets = [0, 128], sizes = [8, 32], strides = [1, 1]} : vector<8x512xf32> to vector<8x32xf32>
    %51 = arith.negf %50 : vector<8x32xf32>
    %52 = math.exp %51 : vector<8x32xf32>
    %cst_29 = arith.constant 1.000000e+00 : f32
    %53 = vector.broadcast %cst_29 : f32 to vector<8x32xf32>
    %54 = arith.addf %53, %52 : vector<8x32xf32>
    %55 = arith.divf %53, %54 : vector<8x32xf32>
    %56 = vector.extract_strided_slice %43 {offsets = [0, 256], sizes = [8, 32], strides = [1, 1]} : vector<8x512xf32> to vector<8x32xf32>
    %57 = math.tanh %56 : vector<8x32xf32>
    %58 = vector.extract_strided_slice %43 {offsets = [0, 384], sizes = [8, 32], strides = [1, 1]} : vector<8x512xf32> to vector<8x32xf32>
    %59 = arith.negf %58 : vector<8x32xf32>
    %60 = math.exp %59 : vector<8x32xf32>
    %cst_30 = arith.constant 1.000000e+00 : f32
    %61 = vector.broadcast %cst_30 : f32 to vector<8x32xf32>
    %62 = arith.addf %61, %60 : vector<8x32xf32>
    %63 = arith.divf %61, %62 : vector<8x32xf32>
    %64 = arith.mulf %55, %41 : vector<8x32xf32>
    %65 = arith.mulf %49, %57 : vector<8x32xf32>
    %66 = arith.addf %64, %65 : vector<8x32xf32>
    %67 = math.tanh %66 : vector<8x32xf32>
    %68 = arith.mulf %63, %67 : vector<8x32xf32>
    %c1_i32 = arith.constant 1 : i32
    %69 = tpu.concatenate %68, %41 in 1 : vector<8x32xf32>, vector<8x32xf32> -> vector<8x64xf32>
    %c0_31 = arith.constant 0 : index
    %c0_32 = arith.constant 0 : index
    %70 = vector.load %arg3[%c0_31, %c0_32] : memref<64x1024xf32, #tpu.memory_space<vmem>>, vector<64x1024xf32>
    %cst_33 = arith.constant dense<0.000000e+00> : vector<8x1024xf32>
    %71 = tpu.matmul %69, %70, %cst_33 {dimension_numbers = #tpu.dot_dimension_numbers<[1], [0], [0], [1], [0, 0, 1, 1], [], []>} : vector<8x64xf32>, vector<64x1024xf32>, vector<8x1024xf32> -> vector<8x1024xf32>
    %72 = arith.index_cast %c1_i32 : i32 to index
    %c0_34 = arith.constant 0 : index
    %c0_35 = arith.constant 0 : index
    %73 = vector.load %arg10[%72, %c0_34, %c0_35] : memref<8x8x512xf32, #tpu.memory_space<vmem>>, vector<1x8x512xf32>
    %74 = vector.shape_cast %73 : vector<1x8x512xf32> to vector<8x512xf32>
    %75 = vector.extract_strided_slice %71 {offsets = [0, 0], sizes = [8, 512], strides = [1, 1]} : vector<8x1024xf32> to vector<8x512xf32>
    %76 = arith.addf %74, %75 : vector<8x512xf32>
    %77 = vector.extract_strided_slice %71 {offsets = [0, 512], sizes = [8, 512], strides = [1, 1]} : vector<8x1024xf32> to vector<8x512xf32>
    %78 = arith.addf %77, %40 : vector<8x512xf32>
    %79 = vector.extract_strided_slice %76 {offsets = [0, 0], sizes = [8, 32], strides = [1, 1]} : vector<8x512xf32> to vector<8x32xf32>
    %80 = arith.negf %79 : vector<8x32xf32>
    %81 = math.exp %80 : vector<8x32xf32>
    %cst_36 = arith.constant 1.000000e+00 : f32
    %82 = vector.broadcast %cst_36 : f32 to vector<8x32xf32>
    %83 = arith.addf %82, %81 : vector<8x32xf32>
    %84 = arith.divf %82, %83 : vector<8x32xf32>
    %85 = vector.extract_strided_slice %76 {offsets = [0, 128], sizes = [8, 32], strides = [1, 1]} : vector<8x512xf32> to vector<8x32xf32>
    %86 = arith.negf %85 : vector<8x32xf32>
    %87 = math.exp %86 : vector<8x32xf32>
    %cst_37 = arith.constant 1.000000e+00 : f32
    %88 = vector.broadcast %cst_37 : f32 to vector<8x32xf32>
    %89 = arith.addf %88, %87 : vector<8x32xf32>
    %90 = arith.divf %88, %89 : vector<8x32xf32>
    %91 = vector.extract_strided_slice %76 {offsets = [0, 256], sizes = [8, 32], strides = [1, 1]} : vector<8x512xf32> to vector<8x32xf32>
    %92 = math.tanh %91 : vector<8x32xf32>
    %93 = vector.extract_strided_slice %76 {offsets = [0, 384], sizes = [8, 32], strides = [1, 1]} : vector<8x512xf32> to vector<8x32xf32>
    %94 = arith.negf %93 : vector<8x32xf32>
    %95 = math.exp %94 : vector<8x32xf32>
    %cst_38 = arith.constant 1.000000e+00 : f32
    %96 = vector.broadcast %cst_38 : f32 to vector<8x32xf32>
    %97 = arith.addf %96, %95 : vector<8x32xf32>
    %98 = arith.divf %96, %97 : vector<8x32xf32>
    %99 = arith.mulf %90, %66 : vector<8x32xf32>
    %100 = arith.mulf %84, %92 : vector<8x32xf32>
    %101 = arith.addf %99, %100 : vector<8x32xf32>
    %102 = math.tanh %101 : vector<8x32xf32>
    %103 = arith.mulf %98, %102 : vector<8x32xf32>
    %104 = vector.extract_strided_slice %78 {offsets = [0, 0], sizes = [8, 32], strides = [1, 1]} : vector<8x512xf32> to vector<8x32xf32>
    %105 = arith.negf %104 : vector<8x32xf32>
    %106 = math.exp %105 : vector<8x32xf32>
    %cst_39 = arith.constant 1.000000e+00 : f32
    %107 = vector.broadcast %cst_39 : f32 to vector<8x32xf32>
    %108 = arith.addf %107, %106 : vector<8x32xf32>
    %109 = arith.divf %107, %108 : vector<8x32xf32>
    %110 = vector.extract_strided_slice %78 {offsets = [0, 128], sizes = [8, 32], strides = [1, 1]} : vector<8x512xf32> to vector<8x32xf32>
    %111 = arith.negf %110 : vector<8x32xf32>
    %112 = math.exp %111 : vector<8x32xf32>
    %cst_40 = arith.constant 1.000000e+00 : f32
    %113 = vector.broadcast %cst_40 : f32 to vector<8x32xf32>
    %114 = arith.addf %113, %112 : vector<8x32xf32>
    %115 = arith.divf %113, %114 : vector<8x32xf32>
    %116 = vector.extract_strided_slice %78 {offsets = [0, 256], sizes = [8, 32], strides = [1, 1]} : vector<8x512xf32> to vector<8x32xf32>
    %117 = math.tanh %116 : vector<8x32xf32>
    %118 = vector.extract_strided_slice %78 {offsets = [0, 384], sizes = [8, 32], strides = [1, 1]} : vector<8x512xf32> to vector<8x32xf32>
    %119 = arith.negf %118 : vector<8x32xf32>
    %120 = math.exp %119 : vector<8x32xf32>
    %cst_41 = arith.constant 1.000000e+00 : f32
    %121 = vector.broadcast %cst_41 : f32 to vector<8x32xf32>
    %122 = arith.addf %121, %120 : vector<8x32xf32>
    %123 = arith.divf %121, %122 : vector<8x32xf32>
    %124 = arith.mulf %115, %41 : vector<8x32xf32>
    %125 = arith.mulf %109, %117 : vector<8x32xf32>
    %126 = arith.addf %124, %125 : vector<8x32xf32>
    %127 = math.tanh %126 : vector<8x32xf32>
    %128 = arith.mulf %123, %127 : vector<8x32xf32>
    %c2_i32 = arith.constant 2 : i32
    %129 = tpu.concatenate %103, %128 in 1 : vector<8x32xf32>, vector<8x32xf32> -> vector<8x64xf32>
    %c0_42 = arith.constant 0 : index
    %c0_43 = arith.constant 0 : index
    %130 = vector.load %arg3[%c0_42, %c0_43] : memref<64x1024xf32, #tpu.memory_space<vmem>>, vector<64x1024xf32>
    %cst_44 = arith.constant dense<0.000000e+00> : vector<8x1024xf32>
    %131 = tpu.matmul %129, %130, %cst_44 {dimension_numbers = #tpu.dot_dimension_numbers<[1], [0], [0], [1], [0, 0, 1, 1], [], []>} : vector<8x64xf32>, vector<64x1024xf32>, vector<8x1024xf32> -> vector<8x1024xf32>
    %132 = arith.index_cast %c2_i32 : i32 to index
    %c0_45 = arith.constant 0 : index
    %c0_46 = arith.constant 0 : index
    %133 = vector.load %arg10[%132, %c0_45, %c0_46] : memref<8x8x512xf32, #tpu.memory_space<vmem>>, vector<1x8x512xf32>
    %134 = vector.shape_cast %133 : vector<1x8x512xf32> to vector<8x512xf32>
    %135 = vector.extract_strided_slice %131 {offsets = [0, 0], sizes = [8, 512], strides = [1, 1]} : vector<8x1024xf32> to vector<8x512xf32>
    %136 = arith.addf %134, %135 : vector<8x512xf32>
    %137 = vector.extract_strided_slice %131 {offsets = [0, 512], sizes = [8, 512], strides = [1, 1]} : vector<8x1024xf32> to vector<8x512xf32>
    %138 = arith.addf %137, %40 : vector<8x512xf32>
    %139 = vector.extract_strided_slice %136 {offsets = [0, 0], sizes = [8, 32], strides = [1, 1]} : vector<8x512xf32> to vector<8x32xf32>
    %140 = arith.negf %139 : vector<8x32xf32>
    %141 = math.exp %140 : vector<8x32xf32>
    %cst_47 = arith.constant 1.000000e+00 : f32
    %142 = vector.broadcast %cst_47 : f32 to vector<8x32xf32>
    %143 = arith.addf %142, %141 : vector<8x32xf32>
    %144 = arith.divf %142, %143 : vector<8x32xf32>
    %145 = vector.extract_strided_slice %136 {offsets = [0, 128], sizes = [8, 32], strides = [1, 1]} : vector<8x512xf32> to vector<8x32xf32>
    %146 = arith.negf %145 : vector<8x32xf32>
    %147 = math.exp %146 : vector<8x32xf32>
    %cst_48 = arith.constant 1.000000e+00 : f32
    %148 = vector.broadcast %cst_48 : f32 to vector<8x32xf32>
    %149 = arith.addf %148, %147 : vector<8x32xf32>
    %150 = arith.divf %148, %149 : vector<8x32xf32>
    %151 = vector.extract_strided_slice %136 {offsets = [0, 256], sizes = [8, 32], strides = [1, 1]} : vector<8x512xf32> to vector<8x32xf32>
    %152 = math.tanh %151 : vector<8x32xf32>
    %153 = vector.extract_strided_slice %136 {offsets = [0, 384], sizes = [8, 32], strides = [1, 1]} : vector<8x512xf32> to vector<8x32xf32>
    %154 = arith.negf %153 : vector<8x32xf32>
    %155 = math.exp %154 : vector<8x32xf32>
    %cst_49 = arith.constant 1.000000e+00 : f32
    %156 = vector.broadcast %cst_49 : f32 to vector<8x32xf32>
    %157 = arith.addf %156, %155 : vector<8x32xf32>
    %158 = arith.divf %156, %157 : vector<8x32xf32>
    %159 = arith.mulf %150, %101 : vector<8x32xf32>
    %160 = arith.mulf %144, %152 : vector<8x32xf32>
    %161 = arith.addf %159, %160 : vector<8x32xf32>
    %162 = math.tanh %161 : vector<8x32xf32>
    %163 = arith.mulf %158, %162 : vector<8x32xf32>
    %164 = vector.extract_strided_slice %138 {offsets = [0, 0], sizes = [8, 32], strides = [1, 1]} : vector<8x512xf32> to vector<8x32xf32>
    %165 = arith.negf %164 : vector<8x32xf32>
    %166 = math.exp %165 : vector<8x32xf32>
    %cst_50 = arith.constant 1.000000e+00 : f32
    %167 = vector.broadcast %cst_50 : f32 to vector<8x32xf32>
    %168 = arith.addf %167, %166 : vector<8x32xf32>
    %169 = arith.divf %167, %168 : vector<8x32xf32>
    %170 = vector.extract_strided_slice %138 {offsets = [0, 128], sizes = [8, 32], strides = [1, 1]} : vector<8x512xf32> to vector<8x32xf32>
    %171 = arith.negf %170 : vector<8x32xf32>
    %172 = math.exp %171 : vector<8x32xf32>
    %cst_51 = arith.constant 1.000000e+00 : f32
    %173 = vector.broadcast %cst_51 : f32 to vector<8x32xf32>
    %174 = arith.addf %173, %172 : vector<8x32xf32>
    %175 = arith.divf %173, %174 : vector<8x32xf32>
    %176 = vector.extract_strided_slice %138 {offsets = [0, 256], sizes = [8, 32], strides = [1, 1]} : vector<8x512xf32> to vector<8x32xf32>
    %177 = math.tanh %176 : vector<8x32xf32>
    %178 = vector.extract_strided_slice %138 {offsets = [0, 384], sizes = [8, 32], strides = [1, 1]} : vector<8x512xf32> to vector<8x32xf32>
    %179 = arith.negf %178 : vector<8x32xf32>
    %180 = math.exp %179 : vector<8x32xf32>
    %cst_52 = arith.constant 1.000000e+00 : f32
    %181 = vector.broadcast %cst_52 : f32 to vector<8x32xf32>
    %182 = arith.addf %181, %180 : vector<8x32xf32>
    %183 = arith.divf %181, %182 : vector<8x32xf32>
    %184 = arith.mulf %175, %126 : vector<8x32xf32>
    %185 = arith.mulf %169, %177 : vector<8x32xf32>
    %186 = arith.addf %184, %185 : vector<8x32xf32>
    %187 = math.tanh %186 : vector<8x32xf32>
    %188 = arith.mulf %183, %187 : vector<8x32xf32>
    %c3_i32 = arith.constant 3 : i32
    %189 = tpu.concatenate %163, %188 in 1 : vector<8x32xf32>, vector<8x32xf32> -> vector<8x64xf32>
    %c0_53 = arith.constant 0 : index
    %c0_54 = arith.constant 0 : index
    %190 = vector.load %arg3[%c0_53, %c0_54] : memref<64x1024xf32, #tpu.memory_space<vmem>>, vector<64x1024xf32>
    %cst_55 = arith.constant dense<0.000000e+00> : vector<8x1024xf32>
    %191 = tpu.matmul %189, %190, %cst_55 {dimension_numbers = #tpu.dot_dimension_numbers<[1], [0], [0], [1], [0, 0, 1, 1], [], []>} : vector<8x64xf32>, vector<64x1024xf32>, vector<8x1024xf32> -> vector<8x1024xf32>
    %192 = arith.index_cast %c3_i32 : i32 to index
    %c0_56 = arith.constant 0 : index
    %c0_57 = arith.constant 0 : index
    %193 = vector.load %arg10[%192, %c0_56, %c0_57] : memref<8x8x512xf32, #tpu.memory_space<vmem>>, vector<1x8x512xf32>
    %194 = vector.shape_cast %193 : vector<1x8x512xf32> to vector<8x512xf32>
    %195 = vector.extract_strided_slice %191 {offsets = [0, 0], sizes = [8, 512], strides = [1, 1]} : vector<8x1024xf32> to vector<8x512xf32>
    %196 = arith.addf %194, %195 : vector<8x512xf32>
    %197 = vector.extract_strided_slice %191 {offsets = [0, 512], sizes = [8, 512], strides = [1, 1]} : vector<8x1024xf32> to vector<8x512xf32>
    %198 = arith.addf %197, %40 : vector<8x512xf32>
    %199 = vector.extract_strided_slice %196 {offsets = [0, 0], sizes = [8, 32], strides = [1, 1]} : vector<8x512xf32> to vector<8x32xf32>
    %200 = arith.negf %199 : vector<8x32xf32>
    %201 = math.exp %200 : vector<8x32xf32>
    %cst_58 = arith.constant 1.000000e+00 : f32
    %202 = vector.broadcast %cst_58 : f32 to vector<8x32xf32>
    %203 = arith.addf %202, %201 : vector<8x32xf32>
    %204 = arith.divf %202, %203 : vector<8x32xf32>
    %205 = vector.extract_strided_slice %196 {offsets = [0, 128], sizes = [8, 32], strides = [1, 1]} : vector<8x512xf32> to vector<8x32xf32>
    %206 = arith.negf %205 : vector<8x32xf32>
    %207 = math.exp %206 : vector<8x32xf32>
    %cst_59 = arith.constant 1.000000e+00 : f32
    %208 = vector.broadcast %cst_59 : f32 to vector<8x32xf32>
    %209 = arith.addf %208, %207 : vector<8x32xf32>
    %210 = arith.divf %208, %209 : vector<8x32xf32>
    %211 = vector.extract_strided_slice %196 {offsets = [0, 256], sizes = [8, 32], strides = [1, 1]} : vector<8x512xf32> to vector<8x32xf32>
    %212 = math.tanh %211 : vector<8x32xf32>
    %213 = vector.extract_strided_slice %196 {offsets = [0, 384], sizes = [8, 32], strides = [1, 1]} : vector<8x512xf32> to vector<8x32xf32>
    %214 = arith.negf %213 : vector<8x32xf32>
    %215 = math.exp %214 : vector<8x32xf32>
    %cst_60 = arith.constant 1.000000e+00 : f32
    %216 = vector.broadcast %cst_60 : f32 to vector<8x32xf32>
    %217 = arith.addf %216, %215 : vector<8x32xf32>
    %218 = arith.divf %216, %217 : vector<8x32xf32>
    %219 = arith.mulf %210, %161 : vector<8x32xf32>
    %220 = arith.mulf %204, %212 : vector<8x32xf32>
    %221 = arith.addf %219, %220 : vector<8x32xf32>
    %222 = math.tanh %221 : vector<8x32xf32>
    %223 = arith.mulf %218, %222 : vector<8x32xf32>
    %224 = vector.extract_strided_slice %198 {offsets = [0, 0], sizes = [8, 32], strides = [1, 1]} : vector<8x512xf32> to vector<8x32xf32>
    %225 = arith.negf %224 : vector<8x32xf32>
    %226 = math.exp %225 : vector<8x32xf32>
    %cst_61 = arith.constant 1.000000e+00 : f32
    %227 = vector.broadcast %cst_61 : f32 to vector<8x32xf32>
    %228 = arith.addf %227, %226 : vector<8x32xf32>
    %229 = arith.divf %227, %228 : vector<8x32xf32>
    %230 = vector.extract_strided_slice %198 {offsets = [0, 128], sizes = [8, 32], strides = [1, 1]} : vector<8x512xf32> to vector<8x32xf32>
    %231 = arith.negf %230 : vector<8x32xf32>
    %232 = math.exp %231 : vector<8x32xf32>
    %cst_62 = arith.constant 1.000000e+00 : f32
    %233 = vector.broadcast %cst_62 : f32 to vector<8x32xf32>
    %234 = arith.addf %233, %232 : vector<8x32xf32>
    %235 = arith.divf %233, %234 : vector<8x32xf32>
    %236 = vector.extract_strided_slice %198 {offsets = [0, 256], sizes = [8, 32], strides = [1, 1]} : vector<8x512xf32> to vector<8x32xf32>
    %237 = math.tanh %236 : vector<8x32xf32>
    %238 = vector.extract_strided_slice %198 {offsets = [0, 384], sizes = [8, 32], strides = [1, 1]} : vector<8x512xf32> to vector<8x32xf32>
    %239 = arith.negf %238 : vector<8x32xf32>
    %240 = math.exp %239 : vector<8x32xf32>
    %cst_63 = arith.constant 1.000000e+00 : f32
    %241 = vector.broadcast %cst_63 : f32 to vector<8x32xf32>
    %242 = arith.addf %241, %240 : vector<8x32xf32>
    %243 = arith.divf %241, %242 : vector<8x32xf32>
    %244 = arith.mulf %235, %186 : vector<8x32xf32>
    %245 = arith.mulf %229, %237 : vector<8x32xf32>
    %246 = arith.addf %244, %245 : vector<8x32xf32>
    %247 = math.tanh %246 : vector<8x32xf32>
    %248 = arith.mulf %243, %247 : vector<8x32xf32>
    %c4_i32 = arith.constant 4 : i32
    %249 = tpu.concatenate %223, %248 in 1 : vector<8x32xf32>, vector<8x32xf32> -> vector<8x64xf32>
    %c0_64 = arith.constant 0 : index
    %c0_65 = arith.constant 0 : index
    %250 = vector.load %arg3[%c0_64, %c0_65] : memref<64x1024xf32, #tpu.memory_space<vmem>>, vector<64x1024xf32>
    %cst_66 = arith.constant dense<0.000000e+00> : vector<8x1024xf32>
    %251 = tpu.matmul %249, %250, %cst_66 {dimension_numbers = #tpu.dot_dimension_numbers<[1], [0], [0], [1], [0, 0, 1, 1], [], []>} : vector<8x64xf32>, vector<64x1024xf32>, vector<8x1024xf32> -> vector<8x1024xf32>
    %252 = arith.index_cast %c4_i32 : i32 to index
    %c0_67 = arith.constant 0 : index
    %c0_68 = arith.constant 0 : index
    %253 = vector.load %arg10[%252, %c0_67, %c0_68] : memref<8x8x512xf32, #tpu.memory_space<vmem>>, vector<1x8x512xf32>
    %254 = vector.shape_cast %253 : vector<1x8x512xf32> to vector<8x512xf32>
    %255 = vector.extract_strided_slice %251 {offsets = [0, 0], sizes = [8, 512], strides = [1, 1]} : vector<8x1024xf32> to vector<8x512xf32>
    %256 = arith.addf %254, %255 : vector<8x512xf32>
    %257 = vector.extract_strided_slice %251 {offsets = [0, 512], sizes = [8, 512], strides = [1, 1]} : vector<8x1024xf32> to vector<8x512xf32>
    %258 = arith.addf %257, %40 : vector<8x512xf32>
    %259 = vector.extract_strided_slice %256 {offsets = [0, 0], sizes = [8, 32], strides = [1, 1]} : vector<8x512xf32> to vector<8x32xf32>
    %260 = arith.negf %259 : vector<8x32xf32>
    %261 = math.exp %260 : vector<8x32xf32>
    %cst_69 = arith.constant 1.000000e+00 : f32
    %262 = vector.broadcast %cst_69 : f32 to vector<8x32xf32>
    %263 = arith.addf %262, %261 : vector<8x32xf32>
    %264 = arith.divf %262, %263 : vector<8x32xf32>
    %265 = vector.extract_strided_slice %256 {offsets = [0, 128], sizes = [8, 32], strides = [1, 1]} : vector<8x512xf32> to vector<8x32xf32>
    %266 = arith.negf %265 : vector<8x32xf32>
    %267 = math.exp %266 : vector<8x32xf32>
    %cst_70 = arith.constant 1.000000e+00 : f32
    %268 = vector.broadcast %cst_70 : f32 to vector<8x32xf32>
    %269 = arith.addf %268, %267 : vector<8x32xf32>
    %270 = arith.divf %268, %269 : vector<8x32xf32>
    %271 = vector.extract_strided_slice %256 {offsets = [0, 256], sizes = [8, 32], strides = [1, 1]} : vector<8x512xf32> to vector<8x32xf32>
    %272 = math.tanh %271 : vector<8x32xf32>
    %273 = vector.extract_strided_slice %256 {offsets = [0, 384], sizes = [8, 32], strides = [1, 1]} : vector<8x512xf32> to vector<8x32xf32>
    %274 = arith.negf %273 : vector<8x32xf32>
    %275 = math.exp %274 : vector<8x32xf32>
    %cst_71 = arith.constant 1.000000e+00 : f32
    %276 = vector.broadcast %cst_71 : f32 to vector<8x32xf32>
    %277 = arith.addf %276, %275 : vector<8x32xf32>
    %278 = arith.divf %276, %277 : vector<8x32xf32>
    %279 = arith.mulf %270, %221 : vector<8x32xf32>
    %280 = arith.mulf %264, %272 : vector<8x32xf32>
    %281 = arith.addf %279, %280 : vector<8x32xf32>
    %282 = math.tanh %281 : vector<8x32xf32>
    %283 = arith.mulf %278, %282 : vector<8x32xf32>
    %284 = vector.extract_strided_slice %258 {offsets = [0, 0], sizes = [8, 32], strides = [1, 1]} : vector<8x512xf32> to vector<8x32xf32>
    %285 = arith.negf %284 : vector<8x32xf32>
    %286 = math.exp %285 : vector<8x32xf32>
    %cst_72 = arith.constant 1.000000e+00 : f32
    %287 = vector.broadcast %cst_72 : f32 to vector<8x32xf32>
    %288 = arith.addf %287, %286 : vector<8x32xf32>
    %289 = arith.divf %287, %288 : vector<8x32xf32>
    %290 = vector.extract_strided_slice %258 {offsets = [0, 128], sizes = [8, 32], strides = [1, 1]} : vector<8x512xf32> to vector<8x32xf32>
    %291 = arith.negf %290 : vector<8x32xf32>
    %292 = math.exp %291 : vector<8x32xf32>
    %cst_73 = arith.constant 1.000000e+00 : f32
    %293 = vector.broadcast %cst_73 : f32 to vector<8x32xf32>
    %294 = arith.addf %293, %292 : vector<8x32xf32>
    %295 = arith.divf %293, %294 : vector<8x32xf32>
    %296 = vector.extract_strided_slice %258 {offsets = [0, 256], sizes = [8, 32], strides = [1, 1]} : vector<8x512xf32> to vector<8x32xf32>
    %297 = math.tanh %296 : vector<8x32xf32>
    %298 = vector.extract_strided_slice %258 {offsets = [0, 384], sizes = [8, 32], strides = [1, 1]} : vector<8x512xf32> to vector<8x32xf32>
    %299 = arith.negf %298 : vector<8x32xf32>
    %300 = math.exp %299 : vector<8x32xf32>
    %cst_74 = arith.constant 1.000000e+00 : f32
    %301 = vector.broadcast %cst_74 : f32 to vector<8x32xf32>
    %302 = arith.addf %301, %300 : vector<8x32xf32>
    %303 = arith.divf %301, %302 : vector<8x32xf32>
    %304 = arith.mulf %295, %246 : vector<8x32xf32>
    %305 = arith.mulf %289, %297 : vector<8x32xf32>
    %306 = arith.addf %304, %305 : vector<8x32xf32>
    %307 = math.tanh %306 : vector<8x32xf32>
    %308 = arith.mulf %303, %307 : vector<8x32xf32>
    %c5_i32 = arith.constant 5 : i32
    %309 = tpu.concatenate %283, %308 in 1 : vector<8x32xf32>, vector<8x32xf32> -> vector<8x64xf32>
    %c0_75 = arith.constant 0 : index
    %c0_76 = arith.constant 0 : index
    %310 = vector.load %arg3[%c0_75, %c0_76] : memref<64x1024xf32, #tpu.memory_space<vmem>>, vector<64x1024xf32>
    %cst_77 = arith.constant dense<0.000000e+00> : vector<8x1024xf32>
    %311 = tpu.matmul %309, %310, %cst_77 {dimension_numbers = #tpu.dot_dimension_numbers<[1], [0], [0], [1], [0, 0, 1, 1], [], []>} : vector<8x64xf32>, vector<64x1024xf32>, vector<8x1024xf32> -> vector<8x1024xf32>
    %312 = arith.index_cast %c5_i32 : i32 to index
    %c0_78 = arith.constant 0 : index
    %c0_79 = arith.constant 0 : index
    %313 = vector.load %arg10[%312, %c0_78, %c0_79] : memref<8x8x512xf32, #tpu.memory_space<vmem>>, vector<1x8x512xf32>
    %314 = vector.shape_cast %313 : vector<1x8x512xf32> to vector<8x512xf32>
    %315 = vector.extract_strided_slice %311 {offsets = [0, 0], sizes = [8, 512], strides = [1, 1]} : vector<8x1024xf32> to vector<8x512xf32>
    %316 = arith.addf %314, %315 : vector<8x512xf32>
    %317 = vector.extract_strided_slice %311 {offsets = [0, 512], sizes = [8, 512], strides = [1, 1]} : vector<8x1024xf32> to vector<8x512xf32>
    %318 = arith.addf %317, %40 : vector<8x512xf32>
    %319 = vector.extract_strided_slice %316 {offsets = [0, 0], sizes = [8, 32], strides = [1, 1]} : vector<8x512xf32> to vector<8x32xf32>
    %320 = arith.negf %319 : vector<8x32xf32>
    %321 = math.exp %320 : vector<8x32xf32>
    %cst_80 = arith.constant 1.000000e+00 : f32
    %322 = vector.broadcast %cst_80 : f32 to vector<8x32xf32>
    %323 = arith.addf %322, %321 : vector<8x32xf32>
    %324 = arith.divf %322, %323 : vector<8x32xf32>
    %325 = vector.extract_strided_slice %316 {offsets = [0, 128], sizes = [8, 32], strides = [1, 1]} : vector<8x512xf32> to vector<8x32xf32>
    %326 = arith.negf %325 : vector<8x32xf32>
    %327 = math.exp %326 : vector<8x32xf32>
    %cst_81 = arith.constant 1.000000e+00 : f32
    %328 = vector.broadcast %cst_81 : f32 to vector<8x32xf32>
    %329 = arith.addf %328, %327 : vector<8x32xf32>
    %330 = arith.divf %328, %329 : vector<8x32xf32>
    %331 = vector.extract_strided_slice %316 {offsets = [0, 256], sizes = [8, 32], strides = [1, 1]} : vector<8x512xf32> to vector<8x32xf32>
    %332 = math.tanh %331 : vector<8x32xf32>
    %333 = vector.extract_strided_slice %316 {offsets = [0, 384], sizes = [8, 32], strides = [1, 1]} : vector<8x512xf32> to vector<8x32xf32>
    %334 = arith.negf %333 : vector<8x32xf32>
    %335 = math.exp %334 : vector<8x32xf32>
    %cst_82 = arith.constant 1.000000e+00 : f32
    %336 = vector.broadcast %cst_82 : f32 to vector<8x32xf32>
    %337 = arith.addf %336, %335 : vector<8x32xf32>
    %338 = arith.divf %336, %337 : vector<8x32xf32>
    %339 = arith.mulf %330, %281 : vector<8x32xf32>
    %340 = arith.mulf %324, %332 : vector<8x32xf32>
    %341 = arith.addf %339, %340 : vector<8x32xf32>
    %342 = math.tanh %341 : vector<8x32xf32>
    %343 = arith.mulf %338, %342 : vector<8x32xf32>
    %344 = vector.extract_strided_slice %318 {offsets = [0, 0], sizes = [8, 32], strides = [1, 1]} : vector<8x512xf32> to vector<8x32xf32>
    %345 = arith.negf %344 : vector<8x32xf32>
    %346 = math.exp %345 : vector<8x32xf32>
    %cst_83 = arith.constant 1.000000e+00 : f32
    %347 = vector.broadcast %cst_83 : f32 to vector<8x32xf32>
    %348 = arith.addf %347, %346 : vector<8x32xf32>
    %349 = arith.divf %347, %348 : vector<8x32xf32>
    %350 = vector.extract_strided_slice %318 {offsets = [0, 128], sizes = [8, 32], strides = [1, 1]} : vector<8x512xf32> to vector<8x32xf32>
    %351 = arith.negf %350 : vector<8x32xf32>
    %352 = math.exp %351 : vector<8x32xf32>
    %cst_84 = arith.constant 1.000000e+00 : f32
    %353 = vector.broadcast %cst_84 : f32 to vector<8x32xf32>
    %354 = arith.addf %353, %352 : vector<8x32xf32>
    %355 = arith.divf %353, %354 : vector<8x32xf32>
    %356 = vector.extract_strided_slice %318 {offsets = [0, 256], sizes = [8, 32], strides = [1, 1]} : vector<8x512xf32> to vector<8x32xf32>
    %357 = math.tanh %356 : vector<8x32xf32>
    %358 = vector.extract_strided_slice %318 {offsets = [0, 384], sizes = [8, 32], strides = [1, 1]} : vector<8x512xf32> to vector<8x32xf32>
    %359 = arith.negf %358 : vector<8x32xf32>
    %360 = math.exp %359 : vector<8x32xf32>
    %cst_85 = arith.constant 1.000000e+00 : f32
    %361 = vector.broadcast %cst_85 : f32 to vector<8x32xf32>
    %362 = arith.addf %361, %360 : vector<8x32xf32>
    %363 = arith.divf %361, %362 : vector<8x32xf32>
    %364 = arith.mulf %355, %306 : vector<8x32xf32>
    %365 = arith.mulf %349, %357 : vector<8x32xf32>
    %366 = arith.addf %364, %365 : vector<8x32xf32>
    %367 = math.tanh %366 : vector<8x32xf32>
    %368 = arith.mulf %363, %367 : vector<8x32xf32>
    %c6_i32 = arith.constant 6 : i32
    %369 = tpu.concatenate %343, %368 in 1 : vector<8x32xf32>, vector<8x32xf32> -> vector<8x64xf32>
    %c0_86 = arith.constant 0 : index
    %c0_87 = arith.constant 0 : index
    %370 = vector.load %arg3[%c0_86, %c0_87] : memref<64x1024xf32, #tpu.memory_space<vmem>>, vector<64x1024xf32>
    %cst_88 = arith.constant dense<0.000000e+00> : vector<8x1024xf32>
    %371 = tpu.matmul %369, %370, %cst_88 {dimension_numbers = #tpu.dot_dimension_numbers<[1], [0], [0], [1], [0, 0, 1, 1], [], []>} : vector<8x64xf32>, vector<64x1024xf32>, vector<8x1024xf32> -> vector<8x1024xf32>
    %372 = arith.index_cast %c6_i32 : i32 to index
    %c0_89 = arith.constant 0 : index
    %c0_90 = arith.constant 0 : index
    %373 = vector.load %arg10[%372, %c0_89, %c0_90] : memref<8x8x512xf32, #tpu.memory_space<vmem>>, vector<1x8x512xf32>
    %374 = vector.shape_cast %373 : vector<1x8x512xf32> to vector<8x512xf32>
    %375 = vector.extract_strided_slice %371 {offsets = [0, 0], sizes = [8, 512], strides = [1, 1]} : vector<8x1024xf32> to vector<8x512xf32>
    %376 = arith.addf %374, %375 : vector<8x512xf32>
    %377 = vector.extract_strided_slice %371 {offsets = [0, 512], sizes = [8, 512], strides = [1, 1]} : vector<8x1024xf32> to vector<8x512xf32>
    %378 = arith.addf %377, %40 : vector<8x512xf32>
    %379 = vector.extract_strided_slice %376 {offsets = [0, 0], sizes = [8, 32], strides = [1, 1]} : vector<8x512xf32> to vector<8x32xf32>
    %380 = arith.negf %379 : vector<8x32xf32>
    %381 = math.exp %380 : vector<8x32xf32>
    %cst_91 = arith.constant 1.000000e+00 : f32
    %382 = vector.broadcast %cst_91 : f32 to vector<8x32xf32>
    %383 = arith.addf %382, %381 : vector<8x32xf32>
    %384 = arith.divf %382, %383 : vector<8x32xf32>
    %385 = vector.extract_strided_slice %376 {offsets = [0, 128], sizes = [8, 32], strides = [1, 1]} : vector<8x512xf32> to vector<8x32xf32>
    %386 = arith.negf %385 : vector<8x32xf32>
    %387 = math.exp %386 : vector<8x32xf32>
    %cst_92 = arith.constant 1.000000e+00 : f32
    %388 = vector.broadcast %cst_92 : f32 to vector<8x32xf32>
    %389 = arith.addf %388, %387 : vector<8x32xf32>
    %390 = arith.divf %388, %389 : vector<8x32xf32>
    %391 = vector.extract_strided_slice %376 {offsets = [0, 256], sizes = [8, 32], strides = [1, 1]} : vector<8x512xf32> to vector<8x32xf32>
    %392 = math.tanh %391 : vector<8x32xf32>
    %393 = vector.extract_strided_slice %376 {offsets = [0, 384], sizes = [8, 32], strides = [1, 1]} : vector<8x512xf32> to vector<8x32xf32>
    %394 = arith.negf %393 : vector<8x32xf32>
    %395 = math.exp %394 : vector<8x32xf32>
    %cst_93 = arith.constant 1.000000e+00 : f32
    %396 = vector.broadcast %cst_93 : f32 to vector<8x32xf32>
    %397 = arith.addf %396, %395 : vector<8x32xf32>
    %398 = arith.divf %396, %397 : vector<8x32xf32>
    %399 = arith.mulf %390, %341 : vector<8x32xf32>
    %400 = arith.mulf %384, %392 : vector<8x32xf32>
    %401 = arith.addf %399, %400 : vector<8x32xf32>
    %402 = math.tanh %401 : vector<8x32xf32>
    %403 = arith.mulf %398, %402 : vector<8x32xf32>
    %404 = vector.extract_strided_slice %378 {offsets = [0, 0], sizes = [8, 32], strides = [1, 1]} : vector<8x512xf32> to vector<8x32xf32>
    %405 = arith.negf %404 : vector<8x32xf32>
    %406 = math.exp %405 : vector<8x32xf32>
    %cst_94 = arith.constant 1.000000e+00 : f32
    %407 = vector.broadcast %cst_94 : f32 to vector<8x32xf32>
    %408 = arith.addf %407, %406 : vector<8x32xf32>
    %409 = arith.divf %407, %408 : vector<8x32xf32>
    %410 = vector.extract_strided_slice %378 {offsets = [0, 128], sizes = [8, 32], strides = [1, 1]} : vector<8x512xf32> to vector<8x32xf32>
    %411 = arith.negf %410 : vector<8x32xf32>
    %412 = math.exp %411 : vector<8x32xf32>
    %cst_95 = arith.constant 1.000000e+00 : f32
    %413 = vector.broadcast %cst_95 : f32 to vector<8x32xf32>
    %414 = arith.addf %413, %412 : vector<8x32xf32>
    %415 = arith.divf %413, %414 : vector<8x32xf32>
    %416 = vector.extract_strided_slice %378 {offsets = [0, 256], sizes = [8, 32], strides = [1, 1]} : vector<8x512xf32> to vector<8x32xf32>
    %417 = math.tanh %416 : vector<8x32xf32>
    %418 = vector.extract_strided_slice %378 {offsets = [0, 384], sizes = [8, 32], strides = [1, 1]} : vector<8x512xf32> to vector<8x32xf32>
    %419 = arith.negf %418 : vector<8x32xf32>
    %420 = math.exp %419 : vector<8x32xf32>
    %cst_96 = arith.constant 1.000000e+00 : f32
    %421 = vector.broadcast %cst_96 : f32 to vector<8x32xf32>
    %422 = arith.addf %421, %420 : vector<8x32xf32>
    %423 = arith.divf %421, %422 : vector<8x32xf32>
    %424 = arith.mulf %415, %366 : vector<8x32xf32>
    %425 = arith.mulf %409, %417 : vector<8x32xf32>
    %426 = arith.addf %424, %425 : vector<8x32xf32>
    %427 = math.tanh %426 : vector<8x32xf32>
    %428 = arith.mulf %423, %427 : vector<8x32xf32>
    %c7_i32 = arith.constant 7 : i32
    %429 = tpu.concatenate %403, %428 in 1 : vector<8x32xf32>, vector<8x32xf32> -> vector<8x64xf32>
    %c0_97 = arith.constant 0 : index
    %c0_98 = arith.constant 0 : index
    %430 = vector.load %arg3[%c0_97, %c0_98] : memref<64x1024xf32, #tpu.memory_space<vmem>>, vector<64x1024xf32>
    %cst_99 = arith.constant dense<0.000000e+00> : vector<8x1024xf32>
    %431 = tpu.matmul %429, %430, %cst_99 {dimension_numbers = #tpu.dot_dimension_numbers<[1], [0], [0], [1], [0, 0, 1, 1], [], []>} : vector<8x64xf32>, vector<64x1024xf32>, vector<8x1024xf32> -> vector<8x1024xf32>
    %432 = arith.index_cast %c7_i32 : i32 to index
    %c0_100 = arith.constant 0 : index
    %c0_101 = arith.constant 0 : index
    %433 = vector.load %arg10[%432, %c0_100, %c0_101] : memref<8x8x512xf32, #tpu.memory_space<vmem>>, vector<1x8x512xf32>
    %434 = vector.shape_cast %433 : vector<1x8x512xf32> to vector<8x512xf32>
    %435 = vector.extract_strided_slice %431 {offsets = [0, 0], sizes = [8, 512], strides = [1, 1]} : vector<8x1024xf32> to vector<8x512xf32>
    %436 = arith.addf %434, %435 : vector<8x512xf32>
    %437 = vector.extract_strided_slice %431 {offsets = [0, 512], sizes = [8, 512], strides = [1, 1]} : vector<8x1024xf32> to vector<8x512xf32>
    %438 = arith.addf %437, %40 : vector<8x512xf32>
    %439 = vector.extract_strided_slice %436 {offsets = [0, 0], sizes = [8, 32], strides = [1, 1]} : vector<8x512xf32> to vector<8x32xf32>
    %440 = arith.negf %439 : vector<8x32xf32>
    %441 = math.exp %440 : vector<8x32xf32>
    %cst_102 = arith.constant 1.000000e+00 : f32
    %442 = vector.broadcast %cst_102 : f32 to vector<8x32xf32>
    %443 = arith.addf %442, %441 : vector<8x32xf32>
    %444 = arith.divf %442, %443 : vector<8x32xf32>
    %445 = vector.extract_strided_slice %436 {offsets = [0, 128], sizes = [8, 32], strides = [1, 1]} : vector<8x512xf32> to vector<8x32xf32>
    %446 = arith.negf %445 : vector<8x32xf32>
    %447 = math.exp %446 : vector<8x32xf32>
    %cst_103 = arith.constant 1.000000e+00 : f32
    %448 = vector.broadcast %cst_103 : f32 to vector<8x32xf32>
    %449 = arith.addf %448, %447 : vector<8x32xf32>
    %450 = arith.divf %448, %449 : vector<8x32xf32>
    %451 = vector.extract_strided_slice %436 {offsets = [0, 256], sizes = [8, 32], strides = [1, 1]} : vector<8x512xf32> to vector<8x32xf32>
    %452 = math.tanh %451 : vector<8x32xf32>
    %453 = vector.extract_strided_slice %436 {offsets = [0, 384], sizes = [8, 32], strides = [1, 1]} : vector<8x512xf32> to vector<8x32xf32>
    %454 = arith.negf %453 : vector<8x32xf32>
    %455 = math.exp %454 : vector<8x32xf32>
    %cst_104 = arith.constant 1.000000e+00 : f32
    %456 = vector.broadcast %cst_104 : f32 to vector<8x32xf32>
    %457 = arith.addf %456, %455 : vector<8x32xf32>
    %458 = arith.divf %456, %457 : vector<8x32xf32>
    %459 = arith.mulf %450, %401 : vector<8x32xf32>
    %460 = arith.mulf %444, %452 : vector<8x32xf32>
    %461 = arith.addf %459, %460 : vector<8x32xf32>
    %462 = math.tanh %461 : vector<8x32xf32>
    %463 = arith.mulf %458, %462 : vector<8x32xf32>
    %464 = vector.extract_strided_slice %438 {offsets = [0, 0], sizes = [8, 32], strides = [1, 1]} : vector<8x512xf32> to vector<8x32xf32>
    %465 = arith.negf %464 : vector<8x32xf32>
    %466 = math.exp %465 : vector<8x32xf32>
    %cst_105 = arith.constant 1.000000e+00 : f32
    %467 = vector.broadcast %cst_105 : f32 to vector<8x32xf32>
    %468 = arith.addf %467, %466 : vector<8x32xf32>
    %469 = arith.divf %467, %468 : vector<8x32xf32>
    %470 = vector.extract_strided_slice %438 {offsets = [0, 128], sizes = [8, 32], strides = [1, 1]} : vector<8x512xf32> to vector<8x32xf32>
    %471 = arith.negf %470 : vector<8x32xf32>
    %472 = math.exp %471 : vector<8x32xf32>
    %cst_106 = arith.constant 1.000000e+00 : f32
    %473 = vector.broadcast %cst_106 : f32 to vector<8x32xf32>
    %474 = arith.addf %473, %472 : vector<8x32xf32>
    %475 = arith.divf %473, %474 : vector<8x32xf32>
    %476 = vector.extract_strided_slice %438 {offsets = [0, 256], sizes = [8, 32], strides = [1, 1]} : vector<8x512xf32> to vector<8x32xf32>
    %477 = math.tanh %476 : vector<8x32xf32>
    %478 = vector.extract_strided_slice %438 {offsets = [0, 384], sizes = [8, 32], strides = [1, 1]} : vector<8x512xf32> to vector<8x32xf32>
    %479 = arith.negf %478 : vector<8x32xf32>
    %480 = math.exp %479 : vector<8x32xf32>
    %cst_107 = arith.constant 1.000000e+00 : f32
    %481 = vector.broadcast %cst_107 : f32 to vector<8x32xf32>
    %482 = arith.addf %481, %480 : vector<8x32xf32>
    %483 = arith.divf %481, %482 : vector<8x32xf32>
    %484 = arith.mulf %475, %426 : vector<8x32xf32>
    %485 = arith.mulf %469, %477 : vector<8x32xf32>
    %486 = arith.addf %484, %485 : vector<8x32xf32>
    %487 = math.tanh %486 : vector<8x32xf32>
    %488 = arith.mulf %483, %487 : vector<8x32xf32>
    %c7_i32_108 = arith.constant 7 : i32
    %489 = tpu.concatenate %463, %488 in 1 : vector<8x32xf32>, vector<8x32xf32> -> vector<8x64xf32>
    %c0_109 = arith.constant 0 : index
    %c0_110 = arith.constant 0 : index
    %490 = vector.load %arg3[%c0_109, %c0_110] : memref<64x1024xf32, #tpu.memory_space<vmem>>, vector<64x1024xf32>
    %cst_111 = arith.constant dense<0.000000e+00> : vector<8x1024xf32>
    %491 = tpu.matmul %489, %490, %cst_111 {dimension_numbers = #tpu.dot_dimension_numbers<[1], [0], [0], [1], [0, 0, 1, 1], [], []>} : vector<8x64xf32>, vector<64x1024xf32>, vector<8x1024xf32> -> vector<8x1024xf32>
    %492 = vector.extract_strided_slice %491 {offsets = [0, 512], sizes = [8, 512], strides = [1, 1]} : vector<8x1024xf32> to vector<8x512xf32>
    %493 = arith.addf %492, %40 : vector<8x512xf32>
    %494 = vector.extract_strided_slice %493 {offsets = [0, 0], sizes = [8, 32], strides = [1, 1]} : vector<8x512xf32> to vector<8x32xf32>
    %495 = arith.negf %494 : vector<8x32xf32>
    %496 = math.exp %495 : vector<8x32xf32>
    %cst_112 = arith.constant 1.000000e+00 : f32
    %497 = vector.broadcast %cst_112 : f32 to vector<8x32xf32>
    %498 = arith.addf %497, %496 : vector<8x32xf32>
    %499 = arith.divf %497, %498 : vector<8x32xf32>
    %500 = vector.extract_strided_slice %493 {offsets = [0, 128], sizes = [8, 32], strides = [1, 1]} : vector<8x512xf32> to vector<8x32xf32>
    %501 = arith.negf %500 : vector<8x32xf32>
    %502 = math.exp %501 : vector<8x32xf32>
    %cst_113 = arith.constant 1.000000e+00 : f32
    %503 = vector.broadcast %cst_113 : f32 to vector<8x32xf32>
    %504 = arith.addf %503, %502 : vector<8x32xf32>
    %505 = arith.divf %503, %504 : vector<8x32xf32>
    %506 = vector.extract_strided_slice %493 {offsets = [0, 256], sizes = [8, 32], strides = [1, 1]} : vector<8x512xf32> to vector<8x32xf32>
    %507 = math.tanh %506 : vector<8x32xf32>
    %508 = vector.extract_strided_slice %493 {offsets = [0, 384], sizes = [8, 32], strides = [1, 1]} : vector<8x512xf32> to vector<8x32xf32>
    %509 = arith.negf %508 : vector<8x32xf32>
    %510 = math.exp %509 : vector<8x32xf32>
    %cst_114 = arith.constant 1.000000e+00 : f32
    %511 = vector.broadcast %cst_114 : f32 to vector<8x32xf32>
    %512 = arith.addf %511, %510 : vector<8x32xf32>
    %513 = arith.divf %511, %512 : vector<8x32xf32>
    %514 = arith.mulf %505, %486 : vector<8x32xf32>
    %515 = arith.mulf %499, %507 : vector<8x32xf32>
    %516 = arith.addf %514, %515 : vector<8x32xf32>
    %517 = math.tanh %516 : vector<8x32xf32>
    %518 = arith.mulf %513, %517 : vector<8x32xf32>
    %c0_115 = arith.constant 0 : index
    %c0_116 = arith.constant 0 : index
    %519 = vector.load %arg5[%c0_115, %c0_116] : memref<32x4xf32, #tpu.memory_space<vmem>>, vector<32x4xf32>
    %cst_117 = arith.constant dense<0.000000e+00> : vector<8x4xf32>
    %520 = tpu.matmul %518, %519, %cst_117 {dimension_numbers = #tpu.dot_dimension_numbers<[1], [0], [0], [1], [0, 0, 1, 1], [], []>} : vector<8x32xf32>, vector<32x4xf32>, vector<8x4xf32> -> vector<8x4xf32>
    %c0_118 = arith.constant 0 : index
    %c0_119 = arith.constant 0 : index
    %521 = vector.load %arg6[%c0_118, %c0_119] : memref<1x4xf32, #tpu.memory_space<vmem>>, vector<1x4xf32>
    %522 = vector.broadcast %521 : vector<1x4xf32> to vector<8x4xf32>
    %523 = arith.addf %520, %522 : vector<8x4xf32>
    %cst_120 = arith.constant 0.000000e+00 : f32
    %524 = vector.broadcast %cst_120 : f32 to vector<8x4xf32>
    %525 = arith.maximumf %523, %524 : vector<8x4xf32>
    %c0_121 = arith.constant 0 : index
    %c0_122 = arith.constant 0 : index
    %526 = vector.load %arg7[%c0_121, %c0_122] : memref<4x2xf32, #tpu.memory_space<vmem>>, vector<4x2xf32>
    %cst_123 = arith.constant dense<0.000000e+00> : vector<8x2xf32>
    %527 = tpu.matmul %525, %526, %cst_123 {dimension_numbers = #tpu.dot_dimension_numbers<[1], [0], [0], [1], [0, 0, 1, 1], [], []>} : vector<8x4xf32>, vector<4x2xf32>, vector<8x2xf32> -> vector<8x2xf32>
    %c0_124 = arith.constant 0 : index
    %c0_125 = arith.constant 0 : index
    %528 = vector.load %arg8[%c0_124, %c0_125] : memref<1x2xf32, #tpu.memory_space<vmem>>, vector<1x2xf32>
    %529 = vector.broadcast %528 : vector<1x2xf32> to vector<8x2xf32>
    %530 = arith.addf %527, %529 : vector<8x2xf32>
    %c0_126 = arith.constant 0 : index
    %c0_127 = arith.constant 0 : index
    %531 = vector.load %arg9[%c0_126, %c0_127] : memref<8x2xf32, #tpu.memory_space<vmem>>, vector<8x2xf32>
    tpu.vector_store %arg9[%c0_126, %c0_127], %530 {strides = array<i32>} : memref<8x2xf32, #tpu.memory_space<vmem>>, vector<8x2xf32>,
    return
  }
}

</mosaic_0001>

<bundles_post_ra>
// kernel: tpu_custom_call.1
= control target key start
LH: loop header
LB: loop body
LE: loop exit
PB: predicated region body
PF: predicated region fallthrough
CT: control target
= control target key end

     0   :  { %14 = vsyncpa [#allocation4], 0  ;;  %s3365_s12 = smov [#allocation3]   ;;  %s3366_s14 = smov 1024   ;;  %s4752_s0 = inlined_call_operand.vmem [shape: f32[64,8], index: 0, kind: input, shape index: {}]   ;;  %s4753_s1 = inlined_call_operand.vmem [shape: f32[8,512], index: 1, kind: input, shape index: {}]   ;;  %s4754_s2 = inlined_call_operand.vmem [shape: f32[1,512], index: 2, kind: input, shape index: {}]   ;;  %s4755_s3 = inlined_call_operand.hbm [shape: f32[64,1024], index: 3, kind: input, shape index: {}]   ;;  %s4756_s4 = inlined_call_operand.vmem [shape: f32[1,512], index: 4, kind: input, shape index: {}]   ;;  %s4757_s5 = inlined_call_operand.vmem [shape: f32[32,4], index: 5, kind: input, shape index: {}]   ;;  %s4758_s6 = inlined_call_operand.vmem [shape: f32[1,4], index: 6, kind: input, shape index: {}]   ;;  %s4759_s7 = inlined_call_operand.vmem [shape: f32[4,2], index: 7, kind: input, shape index: {}]   ;;  %s4760_s8 = inlined_call_operand.vmem [shape: f32[1,2], index: 8, kind: input, shape index: {}]   ;;  %s4761_s9 = inlined_call_operand.vmem [shape: f32[8,2], index: 9, kind: output, shape index: {}]  }
   0x1   :  { %s25_s11 = sshll.u32 %s4755_s3, 4  ;;  %s27_s13 = sshll.u32 %s3365_s12, 4  ;;  %s26_s11 = int_to_ptr.hbm [resolvable:$true] %s25_s11  ;;  %s28_s13 = int_to_ptr.vmem [resolvable:$true] %s27_s13 }
   0x2   :  { %s3367_s15 = smov 64  }
   0x3   :  { %33 = dma.hbm_to_vmem [thread:$0]  %s26_s11, 8192, %s28_s13, [#allocation4], %s3366_s14, %s3366_s14, %s3367_s15  }
   0x4   :  { %3363 = dma.done.wait [#allocation4], 8192  }
   0x5   :  { %3364 = vsyncadd [#allocation4], 4294959104  ;;  %vm70_vm0 = vcmask 64512   ;;  %v56_v0 = vld [vmem:[%s4753_s1] sm:$0xff]  ;;  %v57_v1 = vld [vmem:[%s4753_s1 + $0x8] sm:$0xff]  ;;  %vm375_vm13 = vcmask 261120  }
   0x6   :  { %v59_v2 = vld [vmem:[%s4753_s1 + $0x18] sm:$0xff]  ;;  %110 = vmatpush.msra.mxu0 %v56_v0  ;;  %151 = vmatpush.msra.mxu1 %v57_v1  ;;  %v48_v3 = vld [vmem:[%s4752_s0] sm:$0xff]  ;;  %v58_v4 = vld [vmem:[%s4753_s1 + $0x10] sm:$0xff]  ;;  %vm441_vm14 = vcmask 523264  }
   0x7   :  { %v3437_v5 = vld [vmem:[#allocation3 + $0x1c0] sm:$0xff]  ;;  %233 = vmatpush.msra.mxu3 %v59_v2  ;;  %2806 = vmatmul.msk.f32.vlgmr.msra.gmra.mxu0 %vm70_vm0, %v48_v3  ;;  %v3440_v6 = vld [vmem:[#allocation3 + $0x1c8] sm:$0xff]  ;;  %v3444_v7 = vld [vmem:[#allocation3 + $0x1d8] sm:$0xff] }
   0x8   :  { %2814 = vmatmul.msk.f32.vlgmr.msra.gmra.mxu1 %vm70_vm0, %v48_v3  ;;  %2830 = vmatmul.msk.f32.vlgmr.msra.gmra.mxu3 %vm70_vm0, %v48_v3  ;;  %v3446_v8 = vld [vmem:[#allocation3 + $0x180] sm:$0xff]  ;;  %v3449_v9 = vld [vmem:[#allocation3 + $0x188] sm:$0xff]  ;;  %v3451_v10 = vld [vmem:[#allocation3 + $0x1d0] sm:$0xff] }
   0x9   :  { %192 = vmatpush.msra.mxu2 %v58_v4  ;;  %453 = vmatpush.msrb.mxu0 %v3437_v5  ;;  %v3455_v11 = vld [vmem:[#allocation3 + $0x198] sm:$0xff]  ;;  %v3457_v12 = vld [vmem:[#allocation3 + $0x140] sm:$0xff]  ;;  %v3461_v13 = vld [vmem:[#allocation3 + $0x148] sm:$0xff] }
   0xa   :  { %2822 = vmatmul.msk.f32.vlgmr.msra.gmra.mxu2 %vm70_vm0, %v48_v3  ;;  %473 = vmatpush.msrb.mxu1 %v3440_v6  ;;  %v49_v14 = vld [vmem:[%s4752_s0 + $0x8] sm:$0xff]  ;;  %v50_v15 = vld [vmem:[%s4752_s0 + $0x10] sm:$0xff]  ;;  %v51_v16 = vld [vmem:[%s4752_s0 + $0x18] sm:$0xff] }
   0xb   :  { %513 = vmatpush.msrb.mxu3 %v3444_v7  ;;  %454 = vmatpush.msrb.mxu0 %v3446_v8  ;;  %v52_v17 = vld [vmem:[%s4752_s0 + $0x20] sm:$0xff]  ;;  %v53_v18 = vld [vmem:[%s4752_s0 + $0x28] sm:$0xff]  ;;  %v3508_v20 = vld [vmem:[#allocation3 + $0x190] sm:$0xff] }
   0xc   :  { %474 = vmatpush.msrb.mxu1 %v3449_v9  ;;  %493 = vmatpush.msrb.mxu2 %v3451_v10  ;;  %v3506_v19 = vld [vmem:[%s4754_s2] sm:$0xf]  ;;  %v3510_v21 = vld [vmem:[#allocation3 + $0x158] sm:$0xff]  ;;  %v3515_v23 = vld [vmem:[#allocation3 + $0x108] sm:$0xff] }
   0xd   :  { %514 = vmatpush.msrb.mxu3 %v3455_v11  ;;  %455 = vmatpush.msrb.mxu0 %v3457_v12  ;;  %v3513_v22 = vld [vmem:[#allocation3 + $0x100] sm:$0xff]  ;;  %v3519_v24 = vld [vmem:[#allocation3 + $0x150] sm:$0xff]  ;;  %v3524_v25 = vperm.slane %v3506_v19, 0  ;;  %v3526_v26 = vld [vmem:[#allocation3 + $0x118] sm:$0xff]  ;;  %v3531_v28 = vperm.slane %v3506_v19, 1  ;;  %v3567_v44 = vperm.slane %v3506_v19, 3 }
   0xe   :  { %475 = vmatpush.msrb.mxu1 %v3461_v13  ;;  %494 = vmatpush.msrb.mxu2 %v3508_v20  ;;  %v3528_v27 = vld [vmem:[#allocation3 + $0x110] sm:$0xff]  ;;  %v3538_v30 = vld [vmem:[#allocation3 + $0xc0] sm:$0xff]  ;;  %v3540_v31 = vld [vmem:[#allocation3 + $0xc8] sm:$0xff] }
   0xf   :  { %2807 = vmatmul.msk.f32.gmra.mxu0 %vm70_vm0, %v49_v14  ;;  %515 = vmatpush.msrb.mxu3 %v3510_v21  ;;  %4902 = vst [vmem:[#allocation6_spill] sm:$0xff] %v3524_v25  ;;  %v54_v29 = vld [vmem:[%s4752_s0 + $0x30] sm:$0xff]  ;;  %v3542_v32 = vld [vmem:[#allocation3 + $0xd8] sm:$0xff]  ;;  %v3554_v38 = vld [vmem:[#allocation3 + $0x80] sm:$0xff] }
  0x10   :  { %2815 = vmatmul.msk.f32.gmra.mxu1 %vm70_vm0, %v49_v14  ;;  %2831 = vmatmul.msk.f32.gmra.mxu3 %vm70_vm0, %v49_v14  ;;  %4903 = vst [vmem:[#allocation7_spill] sm:$0xff] %v3531_v28  ;;  %v3548_v34 = vld [vmem:[#allocation3 + $0xd0] sm:$0xff]  ;;  %v3556_v39 = vld [vmem:[#allocation3 + $0x88] sm:$0xff]  ;;  %v3558_v40 = vld [vmem:[#allocation3 + $0x98] sm:$0xff] }
  0x11   :  { %456 = vmatpush.msrb.mxu0 %v3513_v22  ;;  %476 = vmatpush.msrb.mxu1 %v3515_v23  ;;  %v3564_v42 = vld [vmem:[#allocation3 + $0x90] sm:$0xff]  ;;  %4904 = vst [vmem:[#allocation8_spill] sm:$0xff] %v3567_v44  ;;  %v3570_v45 = vld [vmem:[#allocation3 + $0x40] sm:$0xff]  ;;  %v3572_v46 = vld [vmem:[#allocation3 + $0x48] sm:$0xff] }
  0x12   :  { %2823 = vmatmul.msk.f32.gmra.mxu2 %vm70_vm0, %v49_v14  ;;  %516 = vmatpush.msrb.mxu3 %v3526_v26  ;;  %v3575_v47 = vld [vmem:[#allocation3 + $0x58] sm:$0xff]  ;;  %v3579_v48 = vld [vmem:[#allocation3 + $0x50] sm:$0xff]  ;;  %v3584_v50 = vld [vmem:[#allocation3] sm:$0xff] }
  0x13   :  { %495 = vmatpush.msrb.mxu2 %v3519_v24  ;;  %457 = vmatpush.msrb.mxu0 %v3538_v30  ;;  %v55_v49 = vld [vmem:[%s4752_s0 + $0x38] sm:$0xff]  ;;  %v3588_v51 = vld [vmem:[#allocation3 + $0x8] sm:$0xff]  ;;  %v3590_v52 = vld [vmem:[#allocation3 + $0x10] sm:$0xff] }
  0x14   :  { %477 = vmatpush.msrb.mxu1 %v3540_v31  ;;  %517 = vmatpush.msrb.mxu3 %v3542_v32  ;;  %v3592_v53 = vld [vmem:[#allocation3 + $0x18] sm:$0xff]  ;;  %v3599_v56 = vld [vmem:[#allocation3 + $0x1e0] sm:$0xff]  ;;  %v3601_v57 = vld [vmem:[#allocation3 + $0x1e8] sm:$0xff] }
  0x15   :  { %496 = vmatpush.msrb.mxu2 %v3528_v27  ;;  %458 = vmatpush.msrb.mxu0 %v3554_v38  ;;  %v3605_v58 = vld [vmem:[#allocation3 + $0x1f0] sm:$0xff]  ;;  %v3607_v59 = vld [vmem:[#allocation3 + $0x1f8] sm:$0xff]  ;;  %v3611_v61 = vld [vmem:[#allocation3 + $0x1a0] sm:$0xff] }
  0x16   :  { %478 = vmatpush.msrb.mxu1 %v3556_v39  ;;  %518 = vmatpush.msrb.mxu3 %v3558_v40  ;;  %v3613_v62 = vld [vmem:[#allocation3 + $0x1a8] sm:$0xff]  ;;  %v3617_v0 = vld [vmem:[#allocation3 + $0x1b0] sm:$0xff]  ;;  %v3619_v1 = vld [vmem:[#allocation3 + $0x1b8] sm:$0xff] }
  0x17   :  { %2808 = vmatmul.msk.f32.gmra.mxu0 %vm70_vm0, %v50_v15  ;;  %497 = vmatpush.msrb.mxu2 %v3548_v34  ;;  %4905 = vst [vmem:[#allocation9_spill] sm:$0xff] %v3617_v0  ;;  %v3625_v4 = vld [vmem:[#allocation3 + $0x160] sm:$0xff]  ;;  %v3627_v14 = vld [vmem:[#allocation3 + $0x168] sm:$0xff] }
  0x18   :  { %2816 = vmatmul.msk.f32.gmra.mxu1 %vm70_vm0, %v50_v15  ;;  %2832 = vmatmul.msk.f32.gmra.mxu3 %vm70_vm0, %v50_v15  ;;  %4906 = vst [vmem:[#allocation10_spill] sm:$0xff] %v3619_v1 }
  0x19   :  { %498 = vmatpush.msrb.mxu2 %v3564_v42  ;;  %459 = vmatpush.msrb.mxu0 %v3570_v45  ;;  %4907 = vst [vmem:[#allocation11_spill] sm:$0xff] %v3625_v4 }
  0x1a   :  { %2824 = vmatmul.msk.f32.gmra.mxu2 %vm70_vm0, %v50_v15  ;;  %479 = vmatpush.msrb.mxu1 %v3572_v46  ;;  %4908 = vst [vmem:[#allocation12_spill] sm:$0xff] %v3627_v14 }
  0x1b   :  { %519 = vmatpush.msrb.mxu3 %v3575_v47  ;;  %499 = vmatpush.msrb.mxu2 %v3579_v48 }
  0x1c   :  { %460 = vmatpush.msrb.mxu0 %v3584_v50  ;;  %480 = vmatpush.msrb.mxu1 %v3588_v51 }
  0x1d   :  { %500 = vmatpush.msrb.mxu2 %v3590_v52  ;;  %520 = vmatpush.msrb.mxu3 %v3592_v53 }
  0x1e   :  { %533 = vmatpush.msra.mxu0 %v3599_v56  ;;  %553 = vmatpush.msra.mxu1 %v3601_v57 }
  0x1f   :  { %2809 = vmatmul.msk.f32.gmra.mxu0 %vm70_vm0, %v51_v16  ;;  %573 = vmatpush.msra.mxu2 %v3605_v58 }
  0x20   :  { %2817 = vmatmul.msk.f32.gmra.mxu1 %vm70_vm0, %v51_v16  ;;  %2833 = vmatmul.msk.f32.gmra.mxu3 %vm70_vm0, %v51_v16 }
  0x21   :  { %593 = vmatpush.msra.mxu3 %v3607_v59  ;;  %534 = vmatpush.msra.mxu0 %v3611_v61 }
  0x22   :  { %2825 = vmatmul.msk.f32.gmra.mxu2 %vm70_vm0, %v51_v16  ;;  %554 = vmatpush.msra.mxu1 %v3613_v62  ;;  %v3633_v16 = vld [vmem:[#allocation3 + $0x170] sm:$0xff] }
  0x23   :  { %4909 = vst [vmem:[#allocation13_spill] sm:$0xff] %v3633_v16  ;;  %574 = vmatpush.msra.mxu2 %v3617_v0  ;;  %594 = vmatpush.msra.mxu3 %v3619_v1 }
  0x24   :  { %535 = vmatpush.msra.mxu0 %v3625_v4  ;;  %555 = vmatpush.msra.mxu1 %v3627_v14 }
  0x25   :  { %575 = vmatpush.msra.mxu2 %v3633_v16 }
  0x27   :  { %2810 = vmatmul.msk.f32.gmra.mxu0 %vm70_vm0, %v52_v17 }
  0x28   :  { %2818 = vmatmul.msk.f32.gmra.mxu1 %vm70_vm0, %v52_v17  ;;  %2834 = vmatmul.msk.f32.gmra.mxu3 %vm70_vm0, %v52_v17 }
  0x2a   :  { %2826 = vmatmul.msk.f32.gmra.mxu2 %vm70_vm0, %v52_v17  ;;  %v3635_v17 = vld [vmem:[#allocation3 + $0x178] sm:$0xff] }
  0x2b   :  { %4910 = vst [vmem:[#allocation14_spill] sm:$0xff] %v3635_v17  ;;  %595 = vmatpush.msra.mxu3 %v3635_v17 }
  0x2f   :  { %2811 = vmatmul.msk.f32.gmra.mxu0 %vm70_vm0, %v53_v18 }
  0x30   :  { %2819 = vmatmul.msk.f32.gmra.mxu1 %vm70_vm0, %v53_v18  ;;  %2835 = vmatmul.msk.f32.gmra.mxu3 %vm70_vm0, %v53_v18 }
  0x32   :  { %2827 = vmatmul.msk.f32.gmra.mxu2 %vm70_vm0, %v53_v18  ;;  %v3639_v18 = vperm.slane %v3506_v19, 2  ;;  %v3656_v19 = vld [vmem:[#allocation3 + $0xe0] sm:$0xff] }
  0x33   :  { %4916 = vst [vmem:[#allocation20_spill] sm:$0xff] %v3656_v19 }
  0x34   :  { %4911 = vst [vmem:[#allocation15_spill] sm:$0xff] %v3639_v18 }
  0x37   :  { %2812 = vmatmul.msk.f32.gmra.mxu0 %vm70_vm0, %v54_v29 }
  0x38   :  { %2820 = vmatmul.msk.f32.gmra.mxu1 %vm70_vm0, %v54_v29  ;;  %2836 = vmatmul.msk.f32.gmra.mxu3 %vm70_vm0, %v54_v29 }
  0x3a   :  { %2828 = vmatmul.msk.f32.gmra.mxu2 %vm70_vm0, %v54_v29  ;;  %v3643_v29 = vld [vmem:[#allocation3 + $0x120] sm:$0xff] }
  0x3b   :  { %4912 = vst [vmem:[#allocation16_spill] sm:$0xff] %v3643_v29  ;;  %536 = vmatpush.msra.mxu0 %v3643_v29 }
  0x3d   :  { %537 = vmatpush.msra.mxu0 %v3656_v19  ;;  %v3693_v19 = vld [vmem:[#allocation3 + $0x78] sm:$0xff] }
  0x3e   :  { %4927 = vst [vmem:[#allocation31_spill] sm:$0xff] %v3693_v19 }
  0x3f   :  { %2813 = vmatmul.msk.f32.gmra.mxu0 %vm70_vm0, %v55_v49 }
  0x40   :  { %2821 = vmatmul.msk.f32.gmra.mxu1 %vm70_vm0, %v55_v49  ;;  %2837 = vmatmul.msk.f32.gmra.mxu3 %vm70_vm0, %v55_v49 }
  0x42   :  { %2829 = vmatmul.msk.f32.gmra.mxu2 %vm70_vm0, %v55_v49  ;;  %v3664_v49 = vld [vmem:[#allocation3 + $0xf8] sm:$0xff] }
  0x43   :  { %4919 = vst [vmem:[#allocation23_spill] sm:$0xff] %v3664_v49 }
  0x84   :  { %v112_v33 = vpop.f32.mrf.mxu0 }
  0x85   :  { %v113_v35 = vadd.f32 %v112_v33, %v3524_v25  ;;  %v153_v36 = vpop.f32.mrf.mxu1  ;;  %v3645_v33 = vld [vmem:[#allocation3 + $0x128] sm:$0xff] }
  0x86   :  { %v154_v37 = vadd.f32 %v153_v36, %v3531_v28  ;;  %4913 = vst [vmem:[#allocation17_spill] sm:$0xff] %v3645_v33  ;;  %v3650_v36 = vld [vmem:[#allocation3 + $0x130] sm:$0xff]  ;;  %556 = vmatpush.msra.mxu1 %v3645_v33  ;;  %v3679_v28 = vld [vmem:[#allocation3 + $0xb8] sm:$0xff] }
  0x87   :  { %v2838_v41 = vmul.f32 -1.442695, %v113_v35  ;;  %4914 = vst [vmem:[#allocation18_spill] sm:$0xff] %v3650_v36  ;;  %576 = vmatpush.msra.mxu2 %v3650_v36  ;;  %v3700_v36 = vld [vmem:[#allocation3 + $0x28] sm:$0xff] }
  0x88   :  { %v2839_v43 = vmul.f32 -1.442695, %v154_v37  ;;  %v3652_v37 = vld [vmem:[#allocation3 + $0x138] sm:$0xff]  ;;  %4923 = vst [vmem:[#allocation27_spill] sm:$0xff] %v3679_v28 }
  0x89   :  { %2955 = vpow2.f32 %v2838_v41  ;;  %4915 = vst [vmem:[#allocation19_spill] sm:$0xff] %v3652_v37  ;;  %v3658_v41 = vld [vmem:[#allocation3 + $0xe8] sm:$0xff]  ;;  %596 = vmatpush.msra.mxu3 %v3652_v37 }
  0x8a   :  { %2957 = vpow2.f32 %v2839_v43  ;;  %4917 = vst [vmem:[#allocation21_spill] sm:$0xff] %v3658_v41  ;;  %v3662_v43 = vld [vmem:[#allocation3 + $0xf0] sm:$0xff]  ;;  %557 = vmatpush.msra.mxu1 %v3658_v41 }
  0x8b   :  { %v235_v54 = vpop.f32.mrf.mxu3  ;;  %4918 = vst [vmem:[#allocation22_spill] sm:$0xff] %v3662_v43  ;;  %577 = vmatpush.msra.mxu2 %v3662_v43  ;;  %597 = vmatpush.msra.mxu3 %v3664_v49  ;;  %v3691_v41 = vld [vmem:[#allocation3 + $0x70] sm:$0xff]  ;;  %v3698_v49 = vld [vmem:[#allocation3 + $0x20] sm:$0xff] }
  0x8c   :  { %v236_v55 = vadd.f32 %v235_v54, %v3567_v44  ;;  %v3677_v44 = vld [vmem:[#allocation3 + $0xb0] sm:$0xff]  ;;  %4926 = vst [vmem:[#allocation30_spill] sm:$0xff] %v3691_v41 }
  0x8d   :  { %v194_v35 = vpop.f32.mrf.mxu2  ;;  %4922 = vst [vmem:[#allocation26_spill] sm:$0xff] %v3677_v44  ;;  %578 = vmatpush.msra.mxu2 %v3677_v44  ;;  %598 = vmatpush.msra.mxu3 %v3679_v28 }
  0x8e   :  { %v2840_v60 = vmul.f32 -1.442695, %v236_v55  ;;  %v195_v55 = vadd.f32 %v194_v35, %v3639_v18  ;;  %v3683_v35 = vld [vmem:[#allocation3 + $0x60] sm:$0xff]  ;;  %v3685_v18 = vld [vmem:[#allocation3 + $0x68] sm:$0xff]  ;;  %4928 = vst [vmem:[#allocation32_spill] sm:$0xff] %v3698_v49 }
  0x8f   :  { %v2956_v63 = vpop.eup %2955  ;;  %4924 = vst [vmem:[#allocation28_spill] sm:$0xff] %v3683_v35  ;;  %579 = vmatpush.msra.mxu2 %v3691_v41  ;;  %599 = vmatpush.msra.mxu3 %v3693_v19 }
  0x90   :  { %v2958_v2 = vpop.eup %2957  ;;  %v3621_v3 = vadd.f32 1.0, %v2956_v63  ;;  %2959 = vpow2.f32 %v2840_v60  ;;  %v3669_v60 = vld [vmem:[#allocation3 + $0xa0] sm:$0xff]  ;;  %v3671_v63 = vld [vmem:[#allocation3 + $0xa8] sm:$0xff]  ;;  %4925 = vst [vmem:[#allocation29_spill] sm:$0xff] %v3685_v18 }
  0x91   :  { %v3629_v15 = vadd.f32 1.0, %v2958_v2  ;;  %4920 = vst [vmem:[#allocation24_spill] sm:$0xff] %v3669_v60  ;;  %538 = vmatpush.msra.mxu0 %v3669_v60  ;;  %558 = vmatpush.msra.mxu1 %v3671_v63  ;;  %v3706_v60 = vld [vmem:[#allocation3 + $0x38] sm:$0xff] }
  0x92   :  { %2961 = vrcp.f32 %v3621_v3  ;;  %4921 = vst [vmem:[#allocation25_spill] sm:$0xff] %v3671_v63  ;;  %v3704_v63 = vld [vmem:[#allocation3 + $0x30] sm:$0xff]  ;;  %600 = vmatpush.msra.mxu3 %v3706_v60  ;;  %vm321_vm3 = vweird.f32 %v3621_v3 }
  0x93   :  { %2963 = vrcp.f32 %v3629_v15  ;;  %4929 = vst [vmem:[#allocation33_spill] sm:$0xff] %v3700_v36  ;;  %539 = vmatpush.msra.mxu0 %v3683_v35  ;;  %559 = vmatpush.msra.mxu1 %v3685_v18  ;;  %v346_v28 = vand.u32 2147483648, %v3629_v15  ;;  %vm340_vm4 = vweird.f32 %v3629_v15 }
  0x94   :  { %4930 = vst [vmem:[#allocation34_spill] sm:$0xff] %v3704_v63  ;;  %580 = vmatpush.msra.mxu2 %v3704_v63 }
  0x95   :  { %4931 = vst [vmem:[#allocation35_spill] sm:$0xff] %v3706_v60  ;;  %540 = vmatpush.msra.mxu0 %v3698_v49  ;;  %560 = vmatpush.msra.mxu1 %v3700_v36  ;;  %v347_v49 = vor.u32 1.1754944e-38, %v346_v28 }
  0x96   :  { %v2960_v54 = vpop.eup %2959 }
  0x97   :  { %v3673_v2 = vadd.f32 1.0, %v2960_v54 }
  0x98   :  { %v2962_v25 = vpop.eup %2961 }
  0x99   :  { %v2964_v37 = vpop.eup %2963  ;;  %v317_v54 = vmul.f32 %v2962_v25, %v3621_v3  ;;  %2965 = vrcp.f32 %v3673_v2  ;;  %vm322_vm1 = vweird.f32 %v2962_v25  ;;  %vm360_vm10 = vweird.f32 %v3673_v2 }
  0x9a   :  { %v336_v43 = vmul.f32 %v2964_v37, %v3629_v15  ;;  %2967 = vtanh.f32 %v195_v55  ;;  %v327_v55 = vand.u32 2147483648, %v3621_v3  ;;  %vm341_vm2 = vweird.f32 %v2964_v37  ;;  %vm323_vm5 = vmor %vm321_vm3, %vm322_vm1 }
  0x9b   :  { %v318_v33 = vsub.f32 1.0, %v317_v54  ;;  %v325_v54 = vand.u32 2147483647, %v3621_v3  ;;  %vm342_vm7 = vmor %vm340_vm4, %vm341_vm2 }
  0x9c   :  { %v337_v29 = vsub.f32 1.0, %v336_v43  ;;  %v344_v43 = vand.u32 2147483647, %v3629_v15  ;;  %v328_v36 = vor.u32 1.1754944e-38, %v327_v55  ;;  %v366_v55 = vand.u32 2147483648, %v3673_v2 }
  0x9d   :  { %v319_v44 = vmul.f32 %v2962_v25, %v318_v33  ;;  %vm326_vm6 = vcmp.eq.f32.partialorder %v325_v54, 8.507059e+37  ;;  %v4946_v54 = vld [vmem:[#allocation25_spill] sm:$0xff] }
  0x9e   :  { %v338_v18 = vmul.f32 %v2964_v37, %v337_v29  ;;  %vm345_vm8 = vcmp.eq.f32.partialorder %v344_v43, 8.507059e+37  ;;  %v4947_v43 = vld [vmem:[#allocation26_spill] sm:$0xff] }
  0x9f   :  { %v2966_v41 = vpop.eup %2965  ;;  %v320_v19 = vadd.f32 %v2962_v25, %v319_v44 }
  0xa0   :  { %v2968_v33 = vpop.eup %2967  ;;  %v356_v35 = vmul.f32 %v2966_v41, %v3673_v2  ;;  %v339_v29 = vadd.f32 %v2964_v37, %v338_v18  ;;  %vm361_vm9 = vweird.f32 %v2966_v41 }
  0xa1   :  { %v324_v17 = vsel %vm323_vm5, %v2962_v25, %v320_v19  ;;  %v364_v25 = vand.u32 2147483647, %v3673_v2  ;;  %vm362_vm11 = vmor %vm360_vm10, %vm361_vm9  ;;  %v4939_v19 = vld [vmem:[#allocation18_spill] sm:$0xff]  ;;  %v4944_v2 = vld [vmem:[#allocation23_spill] sm:$0xff] }
  0xa2   :  { %v357_v63 = vsub.f32 1.0, %v356_v35  ;;  %v329_v60 = vsel %vm326_vm6, %v328_v36, %v324_v17  ;;  %v343_v16 = vsel %vm342_vm7, %v2964_v37, %v339_v29  ;;  %v367_v17 = vor.u32 1.1754944e-38, %v366_v55  ;;  %v4938_v37 = vld [vmem:[#allocation17_spill] sm:$0xff]  ;;  %v4945_v35 = vld [vmem:[#allocation24_spill] sm:$0xff]  ;;  %v4952_v55 = vld [vmem:[#allocation31_spill] sm:$0xff] }
  0xa3   :  { %v348_v44 = vsel %vm345_vm8, %v347_v49, %v343_v16  ;;  %v371_v3 = vmul.f32 %v2968_v33, %v329_v60  ;;  %vm365_vm12 = vcmp.eq.f32.partialorder %v364_v25, 8.507059e+37  ;;  %v4941_v49 = vld [vmem:[#allocation20_spill] sm:$0xff]  ;;  %v4942_v60 = vld [vmem:[#allocation21_spill] sm:$0xff]  ;;  %v4948_v33 = vld [vmem:[#allocation27_spill] sm:$0xff] }
  0xa4   :  { %v358_v14 = vmul.f32 %v2966_v41, %v357_v63  ;;  %v370_v4 = vmul.f32 0.0, %v348_v44  ;;  %v4943_v63 = vld [vmem:[#allocation22_spill] sm:$0xff]  ;;  %v4949_v29 = vld [vmem:[#allocation28_spill] sm:$0xff]  ;;  %v4950_v44 = vld [vmem:[#allocation29_spill] sm:$0xff] }
  0xa5   :  { %v4953_v25 = vld [vmem:[#allocation32_spill] sm:$0xff] }
  0xa6   :  { %v3723_v15 = vadd.f32 %v371_v3, %v370_v4  ;;  %v359_v1 = vadd.f32 %v2966_v41, %v358_v14  ;;  %v4937_v14 = vld [vmem:[#allocation16_spill] sm:$0xff]  ;;  %v4951_v3 = vld [vmem:[#allocation30_spill] sm:$0xff] }
  0xa8   :  { %2969 = vtanh.f32 %v3723_v15  ;;  %v363_v28 = vsel %vm362_vm11, %v2966_v41, %v359_v1  ;;  %v4936_v1 = vld [vmem:[#allocation14_spill] sm:$0xff]  ;;  %v4940_v41 = vld [vmem:[#allocation19_spill] sm:$0xff] }
  0xa9   :  { %v368_v18 = vsel %vm365_vm12, %v367_v17, %v363_v28  ;;  %v4954_v28 = vld [vmem:[#allocation33_spill] sm:$0xff]  ;;  %v4955_v17 = vld [vmem:[#allocation34_spill] sm:$0xff] }
  0xae   :  { %v2970_v16 = vpop.eup %2969 }
  0xaf   :  { %v374_v36 = vmul.f32 %v2970_v16, %v368_v18  ;;  %v4956_v16 = vld [vmem:[#allocation35_spill] sm:$0xff]  ;;  %v115_v18 = vpop.f32.mrf.mxu0 }
  0xb1   :  { %v376_v4 = vsel %vm375_vm13, %v374_v36, 0.0  ;;  %v156_v36 = vpop.f32.mrf.mxu1 }
  0xb2   :  { %2841 = vmatmul.msk.f32.vlgmr.msrb.gmra.mxu0 %vm441_vm14, %v376_v4  ;;  %2842 = vmatmul.msk.f32.vlgmr.msrb.gmra.mxu1 %vm441_vm14, %v376_v4 }
  0xb3   :  { %2843 = vmatmul.msk.f32.vlgmr.msrb.gmra.mxu2 %vm441_vm14, %v376_v4  ;;  %2844 = vmatmul.msk.f32.vlgmr.msrb.gmra.mxu3 %vm441_vm14, %v376_v4 }
  0xb4   :  { %759 = vmatpush.msrb.mxu0 %v3437_v5  ;;  %779 = vmatpush.msrb.mxu1 %v3440_v6  ;;  %v4932_v5 = vld [vmem:[#allocation10_spill] sm:$0xff]  ;;  %v4933_v6 = vld [vmem:[#allocation11_spill] sm:$0xff] }
  0xb5   :  { %799 = vmatpush.msrb.mxu2 %v3451_v10  ;;  %819 = vmatpush.msrb.mxu3 %v3444_v7  ;;  %v4934_v7 = vld [vmem:[#allocation12_spill] sm:$0xff] }
  0xb6   :  { %760 = vmatpush.msrb.mxu0 %v3446_v8  ;;  %780 = vmatpush.msrb.mxu1 %v3449_v9  ;;  %v4935_v8 = vld [vmem:[#allocation13_spill] sm:$0xff] }
  0xb7   :  { %800 = vmatpush.msrb.mxu2 %v3508_v20  ;;  %820 = vmatpush.msrb.mxu3 %v3455_v11 }
  0xb8   :  { %761 = vmatpush.msrb.mxu0 %v3457_v12  ;;  %781 = vmatpush.msrb.mxu1 %v3461_v13 }
  0xb9   :  { %801 = vmatpush.msrb.mxu2 %v3519_v24  ;;  %821 = vmatpush.msrb.mxu3 %v3510_v21 }
  0xba   :  { %2845 = vmatmul.msk.f32.vlgmr.msra.gmra.mxu0 %vm441_vm14, %v376_v4  ;;  %2846 = vmatmul.msk.f32.vlgmr.msra.gmra.mxu1 %vm441_vm14, %v376_v4 }
  0xbb   :  { %2847 = vmatmul.msk.f32.vlgmr.msra.gmra.mxu2 %vm441_vm14, %v376_v4  ;;  %2848 = vmatmul.msk.f32.vlgmr.msra.gmra.mxu3 %vm441_vm14, %v376_v4  ;;  %v197_v4 = vpop.f32.mrf.mxu2 }
  0xbc   :  { %762 = vmatpush.msrb.mxu0 %v3513_v22  ;;  %782 = vmatpush.msrb.mxu1 %v3515_v23 }
  0xbd   :  { %802 = vmatpush.msrb.mxu2 %v3528_v27  ;;  %822 = vmatpush.msrb.mxu3 %v3526_v26 }
  0xbe   :  { %763 = vmatpush.msrb.mxu0 %v3538_v30  ;;  %783 = vmatpush.msrb.mxu1 %v3540_v31 }
  0xbf   :  { %803 = vmatpush.msrb.mxu2 %v3548_v34  ;;  %823 = vmatpush.msrb.mxu3 %v3542_v32 }
  0xc0   :  { %764 = vmatpush.msrb.mxu0 %v3554_v38  ;;  %784 = vmatpush.msrb.mxu1 %v3556_v39 }
  0xc1   :  { %804 = vmatpush.msrb.mxu2 %v3564_v42  ;;  %824 = vmatpush.msrb.mxu3 %v3558_v40 }
  0xc2   :  { %765 = vmatpush.msrb.mxu0 %v3570_v45  ;;  %785 = vmatpush.msrb.mxu1 %v3572_v46 }
  0xc3   :  { %805 = vmatpush.msrb.mxu2 %v3579_v48  ;;  %825 = vmatpush.msrb.mxu3 %v3575_v47 }
  0xc4   :  { %766 = vmatpush.msrb.mxu0 %v3584_v50  ;;  %786 = vmatpush.msrb.mxu1 %v3588_v51 }
  0xc5   :  { %806 = vmatpush.msrb.mxu2 %v3590_v52  ;;  %826 = vmatpush.msrb.mxu3 %v3592_v53 }
  0xc6   :  { %839 = vmatpush.msra.mxu0 %v3599_v56  ;;  %859 = vmatpush.msra.mxu1 %v3601_v57 }
  0xc7   :  { %879 = vmatpush.msra.mxu2 %v3605_v58  ;;  %899 = vmatpush.msra.mxu3 %v3607_v59 }
  0xc8   :  { %840 = vmatpush.msra.mxu0 %v3611_v61  ;;  %860 = vmatpush.msra.mxu1 %v3613_v62 }
  0xc9   :  { %880 = vmatpush.msra.mxu2 %v3617_v0  ;;  %900 = vmatpush.msra.mxu3 %v4932_v5 }
  0xca   :  { %841 = vmatpush.msra.mxu0 %v4933_v6  ;;  %861 = vmatpush.msra.mxu1 %v4934_v7 }
  0xcb   :  { %881 = vmatpush.msra.mxu2 %v4935_v8  ;;  %901 = vmatpush.msra.mxu3 %v4936_v1 }
  0xcc   :  { %842 = vmatpush.msra.mxu0 %v4937_v14  ;;  %862 = vmatpush.msra.mxu1 %v4938_v37 }
  0xcd   :  { %882 = vmatpush.msra.mxu2 %v4939_v19  ;;  %902 = vmatpush.msra.mxu3 %v4940_v41 }
  0xce   :  { %843 = vmatpush.msra.mxu0 %v4941_v49  ;;  %863 = vmatpush.msra.mxu1 %v4942_v60 }
  0xcf   :  { %883 = vmatpush.msra.mxu2 %v4943_v63  ;;  %903 = vmatpush.msra.mxu3 %v4944_v2  ;;  %v4982_v2 = vld [vmem:[#allocation7_spill] sm:$0xff] }
  0xd0   :  { %844 = vmatpush.msra.mxu0 %v4945_v35  ;;  %864 = vmatpush.msra.mxu1 %v4946_v54 }
  0xd1   :  { %884 = vmatpush.msra.mxu2 %v4947_v43  ;;  %904 = vmatpush.msra.mxu3 %v4948_v33  ;;  %v238_v33 = vpop.f32.mrf.mxu3  ;;  %v3802_v43 = vpop.f32.mrf.mxu0 }
  0xd2   :  { %845 = vmatpush.msra.mxu0 %v4949_v29  ;;  %865 = vmatpush.msra.mxu1 %v4950_v44  ;;  %4957 = vst [vmem:[#allocation36_spill] sm:$0xff] %v3802_v43  ;;  %v3804_v29 = vpop.f32.mrf.mxu1  ;;  %v3806_v44 = vpop.f32.mrf.mxu2 }
  0xd3   :  { %885 = vmatpush.msra.mxu2 %v4951_v3  ;;  %905 = vmatpush.msra.mxu3 %v4952_v55  ;;  %4958 = vst [vmem:[#allocation37_spill] sm:$0xff] %v3804_v29 }
  0xd4   :  { %846 = vmatpush.msra.mxu0 %v4953_v25  ;;  %866 = vmatpush.msra.mxu1 %v4954_v28  ;;  %4959 = vst [vmem:[#allocation38_spill] sm:$0xff] %v3806_v44 }
  0xd5   :  { %886 = vmatpush.msra.mxu2 %v4955_v17  ;;  %906 = vmatpush.msra.mxu3 %v4956_v16 }
  0xd9   :  { %v3808_v3 = vpop.f32.mrf.mxu3  ;;  %v3810_v55 = vpop.f32.mrf.mxu0 }
  0xda   :  { %4960 = vst [vmem:[#allocation39_spill] sm:$0xff] %v3808_v3  ;;  %v3812_v25 = vpop.f32.mrf.mxu1  ;;  %v3814_v28 = vpop.f32.mrf.mxu2 }
  0xdb   :  { %4961 = vst [vmem:[#allocation40_spill] sm:$0xff] %v3810_v55 }
  0xdc   :  { %4962 = vst [vmem:[#allocation41_spill] sm:$0xff] %v3812_v25 }
  0xdd   :  { %4963 = vst [vmem:[#allocation42_spill] sm:$0xff] %v3814_v28 }
  0xe1   :  { %v3816_v17 = vpop.f32.mrf.mxu3  ;;  %v3818_v16 = vpop.f32.mrf.mxu0 }
  0xe2   :  { %4964 = vst [vmem:[#allocation43_spill] sm:$0xff] %v3816_v17  ;;  %v3820_v54 = vpop.f32.mrf.mxu1  ;;  %v3822_v35 = vpop.f32.mrf.mxu2 }
  0xe3   :  { %4965 = vst [vmem:[#allocation44_spill] sm:$0xff] %v3818_v16 }
  0xe4   :  { %4966 = vst [vmem:[#allocation45_spill] sm:$0xff] %v3820_v54 }
  0xe5   :  { %4967 = vst [vmem:[#allocation46_spill] sm:$0xff] %v3822_v35 }
  0xe9   :  { %v3824_v43 = vpop.f32.mrf.mxu3  ;;  %v3826_v29 = vpop.f32.mrf.mxu0 }
  0xea   :  { %4968 = vst [vmem:[#allocation47_spill] sm:$0xff] %v3824_v43  ;;  %v3828_v44 = vpop.f32.mrf.mxu1  ;;  %v3830_v3 = vpop.f32.mrf.mxu2 }
  0xeb   :  { %4969 = vst [vmem:[#allocation48_spill] sm:$0xff] %v3826_v29 }
  0xec   :  { %4970 = vst [vmem:[#allocation49_spill] sm:$0xff] %v3828_v44  ;;  %v4981_v44 = vld [vmem:[#allocation6_spill] sm:$0xff] }
  0xed   :  { %4971 = vst [vmem:[#allocation50_spill] sm:$0xff] %v3830_v3  ;;  %v116_v3 = vadd.f32 %v115_v18, %v4981_v44  ;;  %v4986_v18 = vld [vmem:[#allocation8_spill] sm:$0xff] }
  0xee   :  { %v239_v44 = vadd.f32 %v238_v33, %v4986_v18 }
  0xf1   :  { %v3832_v55 = vpop.f32.mrf.mxu3  ;;  %v3834_v25 = vpop.f32.mrf.mxu0 }
  0xf2   :  { %4972 = vst [vmem:[#allocation51_spill] sm:$0xff] %v3832_v55  ;;  %v3836_v28 = vpop.f32.mrf.mxu1  ;;  %v3838_v17 = vpop.f32.mrf.mxu2  ;;  %v157_v55 = vadd.f32 %v156_v36, %v4982_v2 }
  0xf3   :  { %4973 = vst [vmem:[#allocation52_spill] sm:$0xff] %v3834_v25 }
  0xf4   :  { %4974 = vst [vmem:[#allocation53_spill] sm:$0xff] %v3836_v28 }
  0xf5   :  { %4975 = vst [vmem:[#allocation54_spill] sm:$0xff] %v3838_v17 }
  0xf9   :  { %v3840_v16 = vpop.f32.mrf.mxu3  ;;  %v3842_v54 = vpop.f32.mrf.mxu0 }
  0xfa   :  { %4976 = vst [vmem:[#allocation55_spill] sm:$0xff] %v3840_v16  ;;  %v3844_v35 = vpop.f32.mrf.mxu1  ;;  %v3846_v43 = vpop.f32.mrf.mxu2  ;;  %v298_v16 = vld [vmem:[%s4756_s4] sm:$0xf]  ;;  %s3368_s4 = smov 32  }
  0xfb   :  { %4977 = vst [vmem:[#allocation56_spill] sm:$0xff] %v3842_v54  ;;  %v3865_v33 = vperm.slane %v298_v16, 3 }
  0xfc   :  { %4978 = vst [vmem:[#allocation57_spill] sm:$0xff] %v3844_v35  ;;  %v3855_v35 = vperm.slane %v298_v16, 0 }
  0xfd   :  { %4979 = vst [vmem:[#allocation58_spill] sm:$0xff] %v3846_v43  ;;  %v3857_v43 = vperm.slane %v298_v16, 1 }
  0xfe   :  { %4983 = vst [vmem:[#allocation60_spill] sm:$0xff] %v3855_v35 }
  0xff   :  { %4984 = vst [vmem:[#allocation61_spill] sm:$0xff] %v3857_v43 }
 0x100   :  { %4987 = vst [vmem:[#allocation62_spill] sm:$0xff] %v3865_v33 }
 0x101   :  { %v3848_v29 = vpop.f32.mrf.mxu3 }
 0x102   :  { %4980 = vst [vmem:[#allocation59_spill] sm:$0xff] %v3848_v29  ;;  %v4985_v29 = vld [vmem:[#allocation15_spill] sm:$0xff] }
 0x103   :  { %v198_v49 = vadd.f32 %v197_v4, %v4985_v29 }
 0x12f   :  { %v462_v63 = vpop.f32.mrf.mxu0  ;;  %v482_v25 = vpop.f32.mrf.mxu1 }
 0x130   :  { %v609_v60 = vadd.f32 %v462_v63, %v116_v3  ;;  %v610_v28 = vadd.f32 %v482_v25, %v157_v55 }
 0x132   :  { %v2849_v17 = vmul.f32 -1.442695, %v609_v60  ;;  %v2850_v54 = vmul.f32 -1.442695, %v610_v28 }
 0x134   :  { %2971 = vpow2.f32 %v2849_v17 }
 0x135   :  { %2973 = vpow2.f32 %v2850_v54 }
 0x136   :  { %v502_v36 = vpop.f32.mrf.mxu2  ;;  %v522_v2 = vpop.f32.mrf.mxu3 }
 0x137   :  { %v611_v63 = vadd.f32 %v502_v36, %v198_v49  ;;  %v3861_v3 = vadd.f32 %v522_v2, %v239_v44  ;;  %v542_v55 = vpop.f32.mrf.mxu0  ;;  %v562_v25 = vpop.f32.mrf.mxu1 }
 0x138   :  { %v613_v60 = vadd.f32 %v542_v55, %v3855_v35  ;;  %v614_v28 = vadd.f32 %v562_v25, %v3857_v43 }
 0x13a   :  { %v2972_v17 = vpop.eup %2971  ;;  %v2852_v41 = vmul.f32 -1.442695, %v613_v60  ;;  %v2853_v14 = vmul.f32 -1.442695, %v614_v28  ;;  %v3873_v28 = vperm.slane %v298_v16, 2 }
 0x13b   :  { %v2974_v19 = vpop.eup %2973  ;;  %v620_v37 = vadd.f32 1.0, %v2972_v17 }
 0x13c   :  { %v639_v4 = vadd.f32 1.0, %v2974_v19  ;;  %2975 = vpow2.f32 %v2852_v41 }
 0x13d   :  { %2977 = vrcp.f32 %v620_v37  ;;  %v630_v29 = vand.u32 2147483647, %v620_v37  ;;  %vm626_vm1 = vweird.f32 %v620_v37 }
 0x13e   :  { %2979 = vrcp.f32 %v639_v4  ;;  %v602_v49 = vpop.f32.mrf.mxu3  ;;  %v649_v35 = vand.u32 2147483647, %v639_v4  ;;  %vm645_vm2 = vweird.f32 %v639_v4 }
 0x13f   :  { %2981 = vpow2.f32 %v2853_v14  ;;  %v616_v2 = vadd.f32 %v602_v49, %v3865_v33  ;;  %v632_v49 = vand.u32 2147483648, %v620_v37  ;;  %v651_v33 = vand.u32 2147483648, %v639_v4 }
 0x140   :  { %vm631_vm5 = vcmp.eq.f32.partialorder %v630_v29, 8.507059e+37  ;;  %vm650_vm6 = vcmp.eq.f32.partialorder %v649_v35, 8.507059e+37 }
 0x141   :  { %v2854_v55 = vmul.f32 -1.442695, %v616_v2  ;;  %v582_v2 = vpop.f32.mrf.mxu2  ;;  %v633_v16 = vor.u32 1.1754944e-38, %v632_v49 }
 0x142   :  { %v2976_v54 = vpop.eup %2975 }
 0x143   :  { %v2978_v44 = vpop.eup %2977  ;;  %v3868_v36 = vadd.f32 1.0, %v2976_v54 }
 0x144   :  { %v2980_v25 = vpop.eup %2979  ;;  %v622_v60 = vmul.f32 %v2978_v44, %v620_v37  ;;  %vm627_vm15 = vweird.f32 %v2978_v44 }
 0x145   :  { %v2982_v18 = vpop.eup %2981  ;;  %v641_v17 = vmul.f32 %v2980_v25, %v639_v4  ;;  %2983 = vrcp.f32 %v3868_v36  ;;  %vm646_vm0 = vweird.f32 %v2980_v25  ;;  %vm628_vm3 = vmor %vm626_vm1, %vm627_vm15  ;;  %v693_v29 = vand.u32 2147483647, %v3868_v36 }
 0x146   :  { %v623_v19 = vsub.f32 1.0, %v622_v60  ;;  %2985 = vtanh.f32 %v611_v63  ;;  %v3871_v41 = vadd.f32 1.0, %v2982_v18  ;;  %v615_v60 = vadd.f32 %v582_v2, %v3873_v28  ;;  %vm647_vm4 = vmor %vm645_vm2, %vm646_vm0 }
 0x147   :  { %v642_v14 = vsub.f32 1.0, %v641_v17  ;;  %2987 = vpow2.f32 %v2854_v55  ;;  %v652_v55 = vor.u32 1.1754944e-38, %v651_v33  ;;  %v695_v2 = vand.u32 2147483648, %v3868_v36 }
 0x148   :  { %v624_v54 = vmul.f32 %v2978_v44, %v623_v19  ;;  %2989 = vrcp.f32 %v3871_v41  ;;  %vm689_vm8 = vweird.f32 %v3868_v36  ;;  %vm694_vm11 = vcmp.eq.f32.partialorder %v693_v29, 8.507059e+37 }
 0x149   :  { %v643_v43 = vmul.f32 %v2980_v25, %v642_v14  ;;  %2991 = vtanh.f32 %v615_v60  ;;  %vm708_vm12 = vweird.f32 %v3871_v41 }
 0x14a   :  { %v625_v1 = vadd.f32 %v2978_v44, %v624_v54 }
 0x14b   :  { %v2984_v63 = vpop.eup %2983  ;;  %v644_v18 = vadd.f32 %v2980_v25, %v643_v43 }
 0x14c   :  { %v2986_v17 = vpop.eup %2985  ;;  %v629_v19 = vsel %vm628_vm3, %v2978_v44, %v625_v1  ;;  %v685_v8 = vmul.f32 %v2984_v63, %v3868_v36  ;;  %vm690_vm7 = vweird.f32 %v2984_v63 }
 0x14d   :  { %v2988_v7 = vpop.eup %2987  ;;  %v634_v14 = vsel %vm631_vm5, %v633_v16, %v629_v19  ;;  %v648_v6 = vsel %vm647_vm4, %v2980_v25, %v644_v18  ;;  %vm691_vm9 = vmor %vm689_vm8, %vm690_vm7 }
 0x14e   :  { %v2990_v54 = vpop.eup %2989  ;;  %v653_v37 = vsel %vm650_vm6, %v652_v55, %v648_v6  ;;  %v676_v5 = vmul.f32 %v2986_v17, %v634_v14  ;;  %v686_v4 = vsub.f32 1.0, %v685_v8  ;;  %v722_v0 = vadd.f32 1.0, %v2988_v7 }
 0x14f   :  { %v675_v43 = vmul.f32 %v653_v37, %v3723_v15  ;;  %v704_v49 = vmul.f32 %v2990_v54, %v3871_v41  ;;  %v714_v6 = vand.u32 2147483648, %v3871_v41  ;;  %v696_v15 = vor.u32 1.1754944e-38, %v695_v2  ;;  %v2992_v16 = vpop.eup %2991 }
 0x150   :  { %v687_v1 = vmul.f32 %v2984_v63, %v686_v4  ;;  %2993 = vrcp.f32 %v722_v0  ;;  %vm709_vm10 = vweird.f32 %v2990_v54  ;;  %v712_v8 = vand.u32 2147483647, %v3871_v41 }
 0x151   :  { %v3882_v33 = vadd.f32 %v676_v5, %v675_v43  ;;  %v705_v35 = vsub.f32 1.0, %v704_v49  ;;  %v715_v17 = vor.u32 1.1754944e-38, %v714_v6  ;;  %vm710_vm15 = vmor %vm708_vm12, %vm709_vm10  ;;  %v734_v2 = vand.u32 2147483648, %v722_v0 }
 0x152   :  { %v688_v44 = vadd.f32 %v2984_v63, %v687_v1  ;;  %vm713_vm0 = vcmp.eq.f32.partialorder %v712_v8, 8.507059e+37  ;;  %vm728_vm2 = vweird.f32 %v722_v0  ;;  %v732_v41 = vand.u32 2147483647, %v722_v0 }
 0x153   :  { %v706_v7 = vmul.f32 %v2990_v54, %v705_v35  ;;  %v735_v29 = vor.u32 1.1754944e-38, %v734_v2  ;;  %v3909_v2 = vld [vmem:[#allocation3 + $0x180] sm:$0xff] }
 0x154   :  { %v692_v25 = vsel %vm691_vm9, %v2984_v63, %v688_v44  ;;  %vm733_vm4 = vcmp.eq.f32.partialorder %v732_v41, 8.507059e+37  ;;  %v2851_v44 = vmul.f32 -1.442695, %v3861_v3 }
 0x155   :  { %v697_v18 = vsel %vm694_vm11, %v696_v15, %v692_v25  ;;  %v707_v5 = vadd.f32 %v2990_v54, %v706_v7 }
 0x156   :  { %v2994_v60 = vpop.eup %2993  ;;  %v739_v19 = vmul.f32 %v2992_v16, %v697_v18 }
 0x157   :  { %v711_v55 = vsel %vm710_vm15, %v2990_v54, %v707_v5  ;;  %v724_v36 = vmul.f32 %v2994_v60, %v722_v0  ;;  %vm729_vm1 = vweird.f32 %v2994_v60 }
 0x158   :  { %v716_v14 = vsel %vm713_vm0, %v715_v17, %v711_v55  ;;  %vm730_vm3 = vmor %vm728_vm2, %vm729_vm1 }
 0x159   :  { %v738_v37 = vmul.f32 0.0, %v716_v14  ;;  %v725_v4 = vsub.f32 1.0, %v724_v36 }
 0x15b   :  { %v3888_v43 = vadd.f32 %v739_v19, %v738_v37  ;;  %v726_v49 = vmul.f32 %v2994_v60, %v725_v4  ;;  %v3899_v4 = vld [vmem:[#allocation3 + $0x1c0] sm:$0xff] }
 0x15d   :  { %v727_v63 = vadd.f32 %v2994_v60, %v726_v49  ;;  %2995 = vtanh.f32 %v3888_v43  ;;  %v3902_v49 = vld [vmem:[#allocation3 + $0x1c8] sm:$0xff] }
 0x15e   :  { %2997 = vpow2.f32 %v2851_v44 }
 0x15f   :  { %v731_v1 = vsel %vm730_vm3, %v2994_v60, %v727_v63  ;;  %v3906_v63 = vld [vmem:[#allocation3 + $0x1d8] sm:$0xff] }
 0x160   :  { %v736_v35 = vsel %vm733_vm4, %v735_v29, %v731_v1 }
 0x163   :  { %v2996_v54 = vpop.eup %2995 }
 0x164   :  { %v742_v6 = vmul.f32 %v2996_v54, %v736_v35  ;;  %v2998_v7 = vpop.eup %2997 }
 0x165   :  { %v659_v15 = vadd.f32 1.0, %v2998_v7  ;;  %v5018_v7 = vld [vmem:[#allocation60_spill] sm:$0xff] }
 0x166   :  { %744 = vrot.lane.b32.xlu0 %v742_v6, %s3368_s4 }
 0x167   :  { %2999 = vrcp.f32 %v659_v15  ;;  %v671_v5 = vand.u32 2147483648, %v659_v15  ;;  %vm665_vm6 = vweird.f32 %v659_v15  ;;  %v669_v60 = vand.u32 2147483647, %v659_v15 }
 0x168   :  { %3001 = vtanh.f32 %v3882_v33 }
 0x169   :  { %v672_v19 = vor.u32 1.1754944e-38, %v671_v5  ;;  %vm670_vm8 = vcmp.eq.f32.partialorder %v669_v60, 8.507059e+37 }
 0x16d   :  { %v3000_v8 = vpop.eup %2999 }
 0x16e   :  { %v661_v25 = vmul.f32 %v3000_v8, %v659_v15  ;;  %vm666_vm5 = vweird.f32 %v3000_v8  ;;  %v3002_v55 = vpop.eup %3001 }
 0x16f   :  { %vm667_vm7 = vmor %vm665_vm6, %vm666_vm5 }
 0x170   :  { %v662_v16 = vsub.f32 1.0, %v661_v25 }
 0x172   :  { %v663_v0 = vmul.f32 %v3000_v8, %v662_v16 }
 0x174   :  { %v664_v18 = vadd.f32 %v3000_v8, %v663_v0 }
 0x176   :  { %v668_v17 = vsel %vm667_vm7, %v3000_v8, %v664_v18  ;;  %v5019_v8 = vld [vmem:[#allocation61_spill] sm:$0xff] }
 0x177   :  { %v673_v3 = vsel %vm670_vm8, %v672_v19, %v668_v17 }
 0x178   :  { %v679_v36 = vmul.f32 %v3002_v55, %v673_v3  ;;  %v5020_v3 = vld [vmem:[#allocation15_spill] sm:$0xff] }
 0x1d8   :  { %v745_v14 = vpop.permute.xlu0 %744 }
 0x1d9   :  { %v747_v37 = vsel %vm375_vm13, %v679_v36, %v745_v14  ;;  %v5021_v36 = vld [vmem:[#allocation38_spill] sm:$0xff] }
 0x1da   :  { %2855 = vmatmul.msk.f32.vlgmr.msrb.gmra.mxu0 %vm441_vm14, %v747_v37  ;;  %2856 = vmatmul.msk.f32.vlgmr.msrb.gmra.mxu1 %vm441_vm14, %v747_v37  ;;  %v201_v14 = vadd.f32 %v5021_v36, %v5020_v3 }
 0x1db   :  { %2857 = vmatmul.msk.f32.vlgmr.msrb.gmra.mxu2 %vm441_vm14, %v747_v37  ;;  %2858 = vmatmul.msk.f32.vlgmr.msrb.gmra.mxu3 %vm441_vm14, %v747_v37 }
 0x1dc   :  { %1065 = vmatpush.msrb.mxu0 %v3899_v4  ;;  %1085 = vmatpush.msrb.mxu1 %v3902_v49 }
 0x1dd   :  { %1105 = vmatpush.msrb.mxu2 %v3451_v10  ;;  %1125 = vmatpush.msrb.mxu3 %v3906_v63  ;;  %v4989_v10 = vld [vmem:[#allocation10_spill] sm:$0xff] }
 0x1de   :  { %1066 = vmatpush.msrb.mxu0 %v3909_v2  ;;  %1086 = vmatpush.msrb.mxu1 %v3449_v9  ;;  %v4988_v9 = vld [vmem:[#allocation9_spill] sm:$0xff] }
 0x1df   :  { %1106 = vmatpush.msrb.mxu2 %v3508_v20  ;;  %1126 = vmatpush.msrb.mxu3 %v3455_v11  ;;  %v4990_v11 = vld [vmem:[#allocation11_spill] sm:$0xff]  ;;  %v4993_v20 = vld [vmem:[#allocation14_spill] sm:$0xff] }
 0x1e0   :  { %1067 = vmatpush.msrb.mxu0 %v3457_v12  ;;  %1087 = vmatpush.msrb.mxu1 %v3461_v13  ;;  %v4991_v12 = vld [vmem:[#allocation12_spill] sm:$0xff]  ;;  %v4992_v13 = vld [vmem:[#allocation13_spill] sm:$0xff] }
 0x1e1   :  { %1107 = vmatpush.msrb.mxu2 %v3519_v24  ;;  %1127 = vmatpush.msrb.mxu3 %v3510_v21  ;;  %v4994_v21 = vld [vmem:[#allocation16_spill] sm:$0xff]  ;;  %v4997_v24 = vld [vmem:[#allocation19_spill] sm:$0xff] }
 0x1e2   :  { %2859 = vmatmul.msk.f32.vlgmr.msra.gmra.mxu0 %vm441_vm14, %v747_v37  ;;  %2860 = vmatmul.msk.f32.vlgmr.msra.gmra.mxu1 %vm441_vm14, %v747_v37 }
 0x1e3   :  { %2861 = vmatmul.msk.f32.vlgmr.msra.gmra.mxu2 %vm441_vm14, %v747_v37  ;;  %2862 = vmatmul.msk.f32.vlgmr.msra.gmra.mxu3 %vm441_vm14, %v747_v37  ;;  %v5022_v37 = vld [vmem:[#allocation62_spill] sm:$0xff] }
 0x1e4   :  { %1068 = vmatpush.msrb.mxu0 %v3513_v22  ;;  %1088 = vmatpush.msrb.mxu1 %v3515_v23  ;;  %v4995_v22 = vld [vmem:[#allocation17_spill] sm:$0xff]  ;;  %v4996_v23 = vld [vmem:[#allocation18_spill] sm:$0xff] }
 0x1e5   :  { %1108 = vmatpush.msrb.mxu2 %v3528_v27  ;;  %1128 = vmatpush.msrb.mxu3 %v3526_v26  ;;  %v4998_v26 = vld [vmem:[#allocation20_spill] sm:$0xff]  ;;  %v4999_v27 = vld [vmem:[#allocation21_spill] sm:$0xff] }
 0x1e6   :  { %1069 = vmatpush.msrb.mxu0 %v3538_v30  ;;  %1089 = vmatpush.msrb.mxu1 %v3540_v31  ;;  %v5000_v30 = vld [vmem:[#allocation22_spill] sm:$0xff]  ;;  %v5001_v31 = vld [vmem:[#allocation23_spill] sm:$0xff] }
 0x1e7   :  { %1109 = vmatpush.msrb.mxu2 %v3548_v34  ;;  %1129 = vmatpush.msrb.mxu3 %v3542_v32  ;;  %v5002_v32 = vld [vmem:[#allocation24_spill] sm:$0xff]  ;;  %v5003_v34 = vld [vmem:[#allocation25_spill] sm:$0xff] }
 0x1e8   :  { %1070 = vmatpush.msrb.mxu0 %v3554_v38  ;;  %1090 = vmatpush.msrb.mxu1 %v3556_v39  ;;  %v5004_v38 = vld [vmem:[#allocation26_spill] sm:$0xff]  ;;  %v5005_v39 = vld [vmem:[#allocation27_spill] sm:$0xff] }
 0x1e9   :  { %1110 = vmatpush.msrb.mxu2 %v3564_v42  ;;  %1130 = vmatpush.msrb.mxu3 %v3558_v40  ;;  %v5006_v40 = vld [vmem:[#allocation28_spill] sm:$0xff]  ;;  %v5007_v42 = vld [vmem:[#allocation29_spill] sm:$0xff] }
 0x1ea   :  { %1071 = vmatpush.msrb.mxu0 %v3570_v45  ;;  %1091 = vmatpush.msrb.mxu1 %v3572_v46  ;;  %v5008_v45 = vld [vmem:[#allocation30_spill] sm:$0xff]  ;;  %v5009_v46 = vld [vmem:[#allocation31_spill] sm:$0xff] }
 0x1eb   :  { %1111 = vmatpush.msrb.mxu2 %v3579_v48  ;;  %1131 = vmatpush.msrb.mxu3 %v3575_v47  ;;  %v5010_v47 = vld [vmem:[#allocation32_spill] sm:$0xff]  ;;  %v5011_v48 = vld [vmem:[#allocation33_spill] sm:$0xff] }
 0x1ec   :  { %1072 = vmatpush.msrb.mxu0 %v3584_v50  ;;  %1092 = vmatpush.msrb.mxu1 %v3588_v51  ;;  %v5012_v50 = vld [vmem:[#allocation34_spill] sm:$0xff]  ;;  %v5013_v51 = vld [vmem:[#allocation35_spill] sm:$0xff] }
 0x1ed   :  { %1112 = vmatpush.msrb.mxu2 %v3590_v52  ;;  %1132 = vmatpush.msrb.mxu3 %v3592_v53  ;;  %v5014_v52 = vld [vmem:[#allocation6_spill] sm:$0xff]  ;;  %v5015_v53 = vld [vmem:[#allocation36_spill] sm:$0xff] }
 0x1ee   :  { %1145 = vmatpush.msra.mxu0 %v3599_v56  ;;  %1165 = vmatpush.msra.mxu1 %v3601_v57  ;;  %v119_v56 = vadd.f32 %v5015_v53, %v5014_v52  ;;  %v5016_v57 = vld [vmem:[#allocation7_spill] sm:$0xff] }
 0x1ef   :  { %1185 = vmatpush.msra.mxu2 %v3605_v58  ;;  %1205 = vmatpush.msra.mxu3 %v3607_v59  ;;  %v5017_v58 = vld [vmem:[#allocation37_spill] sm:$0xff] }
 0x1f0   :  { %1146 = vmatpush.msra.mxu0 %v3611_v61  ;;  %1166 = vmatpush.msra.mxu1 %v3613_v62  ;;  %v160_v59 = vadd.f32 %v5017_v58, %v5016_v57 }
 0x1f1   :  { %1186 = vmatpush.msra.mxu2 %v4988_v9  ;;  %1206 = vmatpush.msra.mxu3 %v4989_v10 }
 0x1f2   :  { %1147 = vmatpush.msra.mxu0 %v4990_v11  ;;  %1167 = vmatpush.msra.mxu1 %v4991_v12 }
 0x1f3   :  { %1187 = vmatpush.msra.mxu2 %v4992_v13  ;;  %1207 = vmatpush.msra.mxu3 %v4993_v20 }
 0x1f4   :  { %1148 = vmatpush.msra.mxu0 %v4994_v21  ;;  %1168 = vmatpush.msra.mxu1 %v4995_v22 }
 0x1f5   :  { %1188 = vmatpush.msra.mxu2 %v4996_v23  ;;  %1208 = vmatpush.msra.mxu3 %v4997_v24 }
 0x1f6   :  { %1149 = vmatpush.msra.mxu0 %v4998_v26  ;;  %1169 = vmatpush.msra.mxu1 %v4999_v27 }
 0x1f7   :  { %1189 = vmatpush.msra.mxu2 %v5000_v30  ;;  %1209 = vmatpush.msra.mxu3 %v5001_v31 }
 0x1f8   :  { %1150 = vmatpush.msra.mxu0 %v5002_v32  ;;  %1170 = vmatpush.msra.mxu1 %v5003_v34 }
 0x1f9   :  { %1190 = vmatpush.msra.mxu2 %v5004_v38  ;;  %1210 = vmatpush.msra.mxu3 %v5005_v39 }
 0x1fa   :  { %1151 = vmatpush.msra.mxu0 %v5006_v40  ;;  %1171 = vmatpush.msra.mxu1 %v5007_v42 }
 0x1fb   :  { %1191 = vmatpush.msra.mxu2 %v5008_v45  ;;  %1211 = vmatpush.msra.mxu3 %v5009_v46 }
 0x1fc   :  { %1152 = vmatpush.msra.mxu0 %v5010_v47  ;;  %1172 = vmatpush.msra.mxu1 %v5011_v48 }
 0x1fd   :  { %1192 = vmatpush.msra.mxu2 %v5012_v50  ;;  %1212 = vmatpush.msra.mxu3 %v5013_v51 }
 0x257   :  { %v768_v61 = vpop.f32.mrf.mxu0  ;;  %v788_v62 = vpop.f32.mrf.mxu1 }
 0x258   :  { %v915_v41 = vadd.f32 %v768_v61, %v119_v56  ;;  %v916_v1 = vadd.f32 %v788_v62, %v160_v59 }
 0x25a   :  { %v2863_v29 = vmul.f32 -1.442695, %v915_v41  ;;  %v2864_v54 = vmul.f32 -1.442695, %v916_v1 }
 0x25c   :  { %3003 = vpow2.f32 %v2863_v29 }
 0x25d   :  { %3005 = vpow2.f32 %v2864_v54 }
 0x25e   :  { %v3979_v35 = vpop.f32.mrf.mxu3  ;;  %v808_v55 = vpop.f32.mrf.mxu2 }
 0x25f   :  { %v848_v6 = vpop.f32.mrf.mxu0  ;;  %v868_v44 = vpop.f32.mrf.mxu1  ;;  %v917_v11 = vadd.f32 %v808_v55, %v201_v14 }
 0x260   :  { %v919_v15 = vadd.f32 %v848_v6, %v5018_v7  ;;  %v920_v25 = vadd.f32 %v868_v44, %v5019_v8 }
 0x262   :  { %v3004_v16 = vpop.eup %3003  ;;  %v2866_v0 = vmul.f32 -1.442695, %v919_v15  ;;  %v2867_v60 = vmul.f32 -1.442695, %v920_v25 }
 0x263   :  { %v3006_v18 = vpop.eup %3005  ;;  %v926_v5 = vadd.f32 1.0, %v3004_v16 }
 0x264   :  { %v945_v17 = vadd.f32 1.0, %v3006_v18  ;;  %3007 = vpow2.f32 %v2866_v0 }
 0x265   :  { %3009 = vrcp.f32 %v926_v5  ;;  %v936_v31 = vand.u32 2147483647, %v926_v5  ;;  %v938_v32 = vand.u32 2147483648, %v926_v5  ;;  %vm932_vm11 = vweird.f32 %v926_v5 }
 0x266   :  { %3011 = vrcp.f32 %v945_v17  ;;  %v908_v19 = vpop.f32.mrf.mxu3  ;;  %v957_v34 = vand.u32 2147483648, %v945_v17  ;;  %v888_v39 = vpop.f32.mrf.mxu2  ;;  %v955_v42 = vand.u32 2147483647, %v945_v17  ;;  %vm951_vm12 = vweird.f32 %v945_v17 }
 0x267   :  { %3013 = vpow2.f32 %v2867_v60  ;;  %v922_v9 = vadd.f32 %v908_v19, %v5022_v37  ;;  %v939_v47 = vor.u32 1.1754944e-38, %v938_v32  ;;  %v921_v50 = vadd.f32 %v888_v39, %v3873_v28 }
 0x268   :  { %v958_v53 = vor.u32 1.1754944e-38, %v957_v34  ;;  %vm937_vm1 = vcmp.eq.f32.partialorder %v936_v31, 8.507059e+37  ;;  %vm956_vm2 = vcmp.eq.f32.partialorder %v955_v42, 8.507059e+37 }
 0x269   :  { %v2868_v20 = vmul.f32 -1.442695, %v922_v9 }
 0x26a   :  { %v3008_v10 = vpop.eup %3007 }
 0x26b   :  { %v3010_v12 = vpop.eup %3009  ;;  %v3986_v13 = vadd.f32 1.0, %v3008_v10 }
 0x26c   :  { %v3012_v21 = vpop.eup %3011  ;;  %v928_v22 = vmul.f32 %v3010_v12, %v926_v5  ;;  %vm933_vm9 = vweird.f32 %v3010_v12 }
 0x26d   :  { %v3014_v23 = vpop.eup %3013  ;;  %v947_v24 = vmul.f32 %v3012_v21, %v945_v17  ;;  %3015 = vrcp.f32 %v3986_v13  ;;  %vm952_vm10 = vweird.f32 %v3012_v21  ;;  %vm934_vm15 = vmor %vm932_vm11, %vm933_vm9  ;;  %v1001_v25 = vand.u32 2147483648, %v3986_v13 }
 0x26e   :  { %v929_v26 = vsub.f32 1.0, %v928_v22  ;;  %3017 = vtanh.f32 %v917_v11  ;;  %v3989_v27 = vadd.f32 1.0, %v3014_v23  ;;  %vm953_vm0 = vmor %vm951_vm12, %vm952_vm10  ;;  %v999_v0 = vand.u32 2147483647, %v3986_v13 }
 0x26f   :  { %v948_v30 = vsub.f32 1.0, %v947_v24  ;;  %3019 = vpow2.f32 %v2868_v20  ;;  %vm995_vm4 = vweird.f32 %v3986_v13 }
 0x270   :  { %v930_v38 = vmul.f32 %v3010_v12, %v929_v26  ;;  %3021 = vrcp.f32 %v3989_v27  ;;  %v1020_v60 = vand.u32 2147483648, %v3989_v27  ;;  %v1018_v19 = vand.u32 2147483647, %v3989_v27 }
 0x271   :  { %v949_v40 = vmul.f32 %v3012_v21, %v948_v30  ;;  %3023 = vtanh.f32 %v921_v50  ;;  %vm1000_vm7 = vcmp.eq.f32.partialorder %v999_v0, 8.507059e+37  ;;  %vm1014_vm8 = vweird.f32 %v3989_v27  ;;  %v4028_v0 = vld [vmem:[#allocation3 + $0x190] sm:$0xff] }
 0x272   :  { %v931_v45 = vadd.f32 %v3010_v12, %v930_v38  ;;  %vm1019_vm10 = vcmp.eq.f32.partialorder %v1018_v19, 8.507059e+37  ;;  %v4050_v19 = vld [vmem:[#allocation3 + $0x100] sm:$0xff] }
 0x273   :  { %v3016_v46 = vpop.eup %3015  ;;  %v950_v48 = vadd.f32 %v3012_v21, %v949_v40 }
 0x274   :  { %v3018_v51 = vpop.eup %3017  ;;  %v935_v56 = vsel %vm934_vm15, %v3010_v12, %v931_v45  ;;  %v991_v58 = vmul.f32 %v3016_v46, %v3986_v13  ;;  %vm996_vm3 = vweird.f32 %v3016_v46  ;;  %v1021_v12 = vor.u32 1.1754944e-38, %v1020_v60  ;;  %v5024_v45 = vld [vmem:[#allocation39_spill] sm:$0xff]  ;;  %v4034_v60 = vld [vmem:[#allocation3 + $0x140] sm:$0xff] }
 0x275   :  { %v3020_v59 = vpop.eup %3019  ;;  %v940_v61 = vsel %vm937_vm1, %v939_v47, %v935_v56  ;;  %v954_v62 = vsel %vm953_vm0, %v3012_v21, %v950_v48  ;;  %vm997_vm6 = vmor %vm995_vm4, %vm996_vm3 }
 0x276   :  { %v3022_v41 = vpop.eup %3021  ;;  %v959_v1 = vsel %vm956_vm2, %v958_v53, %v954_v62  ;;  %v982_v29 = vmul.f32 %v3018_v51, %v940_v61  ;;  %v992_v54 = vsub.f32 1.0, %v991_v58  ;;  %v1028_v6 = vadd.f32 1.0, %v3020_v59 }
 0x277   :  { %v981_v44 = vmul.f32 %v959_v1, %v3882_v33  ;;  %v1010_v15 = vmul.f32 %v3022_v41, %v3989_v27  ;;  %vm1015_vm5 = vweird.f32 %v3022_v41  ;;  %v1002_v33 = vor.u32 1.1754944e-38, %v1001_v25  ;;  %v3024_v14 = vpop.eup %3023  ;;  %v4020_v25 = vld [vmem:[#allocation3 + $0x1d0] sm:$0xff] }
 0x278   :  { %v993_v16 = vmul.f32 %v3016_v46, %v992_v54  ;;  %3025 = vrcp.f32 %v1028_v6  ;;  %vm1016_vm9 = vmor %vm1014_vm8, %vm1015_vm5  ;;  %v1040_v32 = vand.u32 2147483648, %v1028_v6  ;;  %vm1034_vm12 = vweird.f32 %v1028_v6 }
 0x279   :  { %v3998_v18 = vadd.f32 %v982_v29, %v981_v44  ;;  %v1011_v5 = vsub.f32 1.0, %v1010_v15  ;;  %v1038_v27 = vand.u32 2147483647, %v1028_v6 }
 0x27a   :  { %v994_v17 = vadd.f32 %v3016_v46, %v993_v16  ;;  %v1041_v38 = vor.u32 1.1754944e-38, %v1040_v32  ;;  %v4025_v16 = vld [vmem:[#allocation3 + $0x188] sm:$0xff]  ;;  %v4095_v32 = vld [vmem:[#allocation3 + $0x58] sm:$0xff] }
 0x27b   :  { %v1012_v55 = vmul.f32 %v3022_v41, %v1011_v5  ;;  %vm1039_vm0 = vcmp.eq.f32.partialorder %v1038_v27, 8.507059e+37  ;;  %v4031_v5 = vld [vmem:[#allocation3 + $0x198] sm:$0xff]  ;;  %v4098_v27 = vld [vmem:[#allocation3] sm:$0xff] }
 0x27c   :  { %v998_v36 = vsel %vm997_vm6, %v3016_v46, %v994_v17  ;;  %v4037_v17 = vld [vmem:[#allocation3 + $0x148] sm:$0xff] }
 0x27d   :  { %v1003_v9 = vsel %vm1000_vm7, %v1002_v33, %v998_v36  ;;  %v1013_v10 = vadd.f32 %v3022_v41, %v1012_v55  ;;  %v4040_v55 = vld [vmem:[#allocation3 + $0x150] sm:$0xff]  ;;  %v4043_v33 = vld [vmem:[#allocation3 + $0x158] sm:$0xff]  ;;  %v4053_v36 = vld [vmem:[#allocation3 + $0x108] sm:$0xff] }
 0x27e   :  { %v3026_v11 = vpop.eup %3025  ;;  %v1045_v21 = vmul.f32 %v3024_v14, %v1003_v9  ;;  %v4056_v14 = vld [vmem:[#allocation3 + $0x110] sm:$0xff]  ;;  %v4059_v9 = vld [vmem:[#allocation3 + $0x118] sm:$0xff] }
 0x27f   :  { %v1017_v20 = vsel %vm1016_vm9, %v3022_v41, %v1013_v10  ;;  %v1030_v13 = vmul.f32 %v3026_v11, %v1028_v6  ;;  %vm1035_vm11 = vweird.f32 %v3026_v11  ;;  %v4062_v10 = vld [vmem:[#allocation3 + $0xc0] sm:$0xff] }
 0x280   :  { %v1022_v22 = vsel %vm1019_vm10, %v1021_v12, %v1017_v20  ;;  %vm1036_vm15 = vmor %vm1034_vm12, %vm1035_vm11  ;;  %v4068_v12 = vld [vmem:[#allocation3 + $0xd0] sm:$0xff]  ;;  %v4071_v20 = vld [vmem:[#allocation3 + $0xd8] sm:$0xff] }
 0x281   :  { %v1044_v23 = vmul.f32 %v1022_v22, %v3888_v43  ;;  %v1031_v24 = vsub.f32 1.0, %v1030_v13  ;;  %v5023_v43 = vld [vmem:[#allocation8_spill] sm:$0xff]  ;;  %v4077_v13 = vld [vmem:[#allocation3 + $0x88] sm:$0xff] }
 0x282   :  { %v242_v46 = vadd.f32 %v5024_v45, %v5023_v43  ;;  %v4080_v22 = vld [vmem:[#allocation3 + $0x90] sm:$0xff] }
 0x283   :  { %v4005_v26 = vadd.f32 %v1045_v21, %v1044_v23  ;;  %v1032_v30 = vmul.f32 %v3026_v11, %v1031_v24  ;;  %v4074_v21 = vld [vmem:[#allocation3 + $0x80] sm:$0xff]  ;;  %v4083_v23 = vld [vmem:[#allocation3 + $0x98] sm:$0xff]  ;;  %v4116_v45 = vld [vmem:[#allocation3 + $0x1f0] sm:$0xff] }
 0x284   :  { %v918_v47 = vadd.f32 %v3979_v35, %v242_v46  ;;  %v4086_v24 = vld [vmem:[#allocation3 + $0x40] sm:$0xff]  ;;  %5026 = vst [vmem:[#allocation10_spill] sm:$0xff] %v4116_v45  ;;  %v4119_v46 = vld [vmem:[#allocation3 + $0x1f8] sm:$0xff] }
 0x285   :  { %v1033_v31 = vadd.f32 %v3026_v11, %v1032_v30  ;;  %3027 = vtanh.f32 %v4005_v26  ;;  %v4089_v30 = vld [vmem:[#allocation3 + $0x48] sm:$0xff]  ;;  %5027 = vst [vmem:[#allocation11_spill] sm:$0xff] %v4119_v46 }
 0x286   :  { %v2865_v48 = vmul.f32 -1.442695, %v918_v47  ;;  %v4122_v47 = vld [vmem:[#allocation3 + $0x1a0] sm:$0xff] }
 0x287   :  { %v1037_v34 = vsel %vm1036_vm15, %v3026_v11, %v1033_v31  ;;  %v4065_v11 = vld [vmem:[#allocation3 + $0xc8] sm:$0xff]  ;;  %v4092_v31 = vld [vmem:[#allocation3 + $0x50] sm:$0xff]  ;;  %5028 = vst [vmem:[#allocation12_spill] sm:$0xff] %v4122_v47 }
 0x288   :  { %v1042_v40 = vsel %vm1039_vm0, %v1041_v38, %v1037_v34  ;;  %3029 = vpow2.f32 %v2865_v48  ;;  %v4101_v34 = vld [vmem:[#allocation3 + $0x8] sm:$0xff]  ;;  %v4104_v38 = vld [vmem:[#allocation3 + $0x10] sm:$0xff] }
 0x289   :  { %v4125_v48 = vld [vmem:[#allocation3 + $0x1a8] sm:$0xff] }
 0x28a   :  { %5029 = vst [vmem:[#allocation13_spill] sm:$0xff] %v4125_v48 }
 0x28b   :  { %v3028_v39 = vpop.eup %3027 }
 0x28c   :  { %v1048_v42 = vmul.f32 %v3028_v39, %v1042_v40  ;;  %v4107_v39 = vld [vmem:[#allocation3 + $0x18] sm:$0xff]  ;;  %v4110_v40 = vld [vmem:[#allocation3 + $0x1e0] sm:$0xff] }
 0x28e   :  { %1050 = vrot.lane.b32.xlu0 %v1048_v42, %s3368_s4  ;;  %v3030_v50 = vpop.eup %3029  ;;  %v4113_v42 = vld [vmem:[#allocation3 + $0x1e8] sm:$0xff] }
 0x28f   :  { %v965_v51 = vadd.f32 1.0, %v3030_v50  ;;  %5025 = vst [vmem:[#allocation9_spill] sm:$0xff] %v4113_v42  ;;  %v4128_v50 = vld [vmem:[#allocation3 + $0x1b0] sm:$0xff] }
 0x290   :  { %5030 = vst [vmem:[#allocation14_spill] sm:$0xff] %v4128_v50 }
 0x291   :  { %3031 = vrcp.f32 %v965_v51  ;;  %v977_v62 = vand.u32 2147483648, %v965_v51  ;;  %vm971_vm2 = vweird.f32 %v965_v51  ;;  %v975_v41 = vand.u32 2147483647, %v965_v51 }
 0x292   :  { %3033 = vtanh.f32 %v3998_v18 }
 0x293   :  { %v978_v35 = vor.u32 1.1754944e-38, %v977_v62  ;;  %vm976_vm4 = vcmp.eq.f32.partialorder %v975_v41, 8.507059e+37  ;;  %v4149_v62 = vld [vmem:[#allocation3 + $0x128] sm:$0xff]  ;;  %v4152_v41 = vld [vmem:[#allocation3 + $0x130] sm:$0xff] }
 0x294   :  { %5037 = vst [vmem:[#allocation22_spill] sm:$0xff] %v4149_v62 }
 0x295   :  { %5038 = vst [vmem:[#allocation23_spill] sm:$0xff] %v4152_v41 }
 0x297   :  { %v3032_v53 = vpop.eup %3031 }
 0x298   :  { %v967_v56 = vmul.f32 %v3032_v53, %v965_v51  ;;  %vm972_vm1 = vweird.f32 %v3032_v53  ;;  %v3034_v29 = vpop.eup %3033  ;;  %v4131_v51 = vld [vmem:[#allocation3 + $0x1b8] sm:$0xff] }
 0x299   :  { %vm973_vm3 = vmor %vm971_vm2, %vm972_vm1  ;;  %5031 = vst [vmem:[#allocation16_spill] sm:$0xff] %v4131_v51 }
 0x29a   :  { %v968_v58 = vsub.f32 1.0, %v967_v56  ;;  %v4137_v56 = vld [vmem:[#allocation3 + $0x168] sm:$0xff] }
 0x29b   :  { %5033 = vst [vmem:[#allocation18_spill] sm:$0xff] %v4137_v56 }
 0x29c   :  { %v969_v59 = vmul.f32 %v3032_v53, %v968_v58  ;;  %v4140_v58 = vld [vmem:[#allocation3 + $0x170] sm:$0xff] }
 0x29d   :  { %5034 = vst [vmem:[#allocation19_spill] sm:$0xff] %v4140_v58 }
 0x29e   :  { %v970_v61 = vadd.f32 %v3032_v53, %v969_v59  ;;  %v4143_v59 = vld [vmem:[#allocation3 + $0x178] sm:$0xff] }
 0x29f   :  { %5035 = vst [vmem:[#allocation20_spill] sm:$0xff] %v4143_v59 }
 0x2a0   :  { %v974_v1 = vsel %vm973_vm3, %v3032_v53, %v970_v61  ;;  %v4134_v53 = vld [vmem:[#allocation3 + $0x160] sm:$0xff] }
 0x2a1   :  { %v979_v54 = vsel %vm976_vm4, %v978_v35, %v974_v1  ;;  %5032 = vst [vmem:[#allocation17_spill] sm:$0xff] %v4134_v53  ;;  %v4146_v61 = vld [vmem:[#allocation3 + $0x120] sm:$0xff]  ;;  %v4155_v1 = vld [vmem:[#allocation3 + $0x138] sm:$0xff]  ;;  %v4161_v35 = vld [vmem:[#allocation3 + $0xe8] sm:$0xff] }
 0x2a2   :  { %v985_v6 = vmul.f32 %v3034_v29, %v979_v54  ;;  %5036 = vst [vmem:[#allocation21_spill] sm:$0xff] %v4146_v61  ;;  %v4158_v29 = vld [vmem:[#allocation3 + $0xe0] sm:$0xff]  ;;  %v4164_v54 = vld [vmem:[#allocation3 + $0xf0] sm:$0xff] }
 0x2a3   :  { %5039 = vst [vmem:[#allocation24_spill] sm:$0xff] %v4155_v1 }
 0x2a4   :  { %5040 = vst [vmem:[#allocation25_spill] sm:$0xff] %v4158_v29 }
 0x2a5   :  { %5041 = vst [vmem:[#allocation26_spill] sm:$0xff] %v4161_v35 }
 0x2a6   :  { %5042 = vst [vmem:[#allocation27_spill] sm:$0xff] %v4164_v54 }
 0x300   :  { %v1051_v44 = vpop.permute.xlu0 %1050 }
 0x301   :  { %v1053_v15 = vsel %vm375_vm13, %v985_v6, %v1051_v44  ;;  %v4167_v6 = vld [vmem:[#allocation3 + $0xf8] sm:$0xff]  ;;  %v4170_v44 = vld [vmem:[#allocation3 + $0xa0] sm:$0xff] }
 0x302   :  { %2869 = vmatmul.msk.f32.vlgmr.msrb.gmra.mxu0 %vm441_vm14, %v1053_v15  ;;  %2870 = vmatmul.msk.f32.vlgmr.msrb.gmra.mxu1 %vm441_vm14, %v1053_v15  ;;  %5043 = vst [vmem:[#allocation28_spill] sm:$0xff] %v4167_v6 }
 0x303   :  { %2871 = vmatmul.msk.f32.vlgmr.msrb.gmra.mxu2 %vm441_vm14, %v1053_v15  ;;  %2872 = vmatmul.msk.f32.vlgmr.msrb.gmra.mxu3 %vm441_vm14, %v1053_v15  ;;  %5044 = vst [vmem:[#allocation29_spill] sm:$0xff] %v4170_v44 }
 0x304   :  { %1371 = vmatpush.msrb.mxu0 %v3899_v4  ;;  %1391 = vmatpush.msrb.mxu1 %v3902_v49 }
 0x305   :  { %1411 = vmatpush.msrb.mxu2 %v4020_v25  ;;  %1431 = vmatpush.msrb.mxu3 %v3906_v63 }
 0x306   :  { %1372 = vmatpush.msrb.mxu0 %v3909_v2  ;;  %1392 = vmatpush.msrb.mxu1 %v4025_v16 }
 0x307   :  { %1412 = vmatpush.msrb.mxu2 %v4028_v0  ;;  %1432 = vmatpush.msrb.mxu3 %v4031_v5 }
 0x308   :  { %1373 = vmatpush.msrb.mxu0 %v4034_v60  ;;  %1393 = vmatpush.msrb.mxu1 %v4037_v17 }
 0x309   :  { %1413 = vmatpush.msrb.mxu2 %v4040_v55  ;;  %1433 = vmatpush.msrb.mxu3 %v4043_v33 }
 0x30a   :  { %2873 = vmatmul.msk.f32.vlgmr.msra.gmra.mxu0 %vm441_vm14, %v1053_v15  ;;  %2874 = vmatmul.msk.f32.vlgmr.msra.gmra.mxu1 %vm441_vm14, %v1053_v15 }
 0x30b   :  { %2875 = vmatmul.msk.f32.vlgmr.msra.gmra.mxu2 %vm441_vm14, %v1053_v15  ;;  %2876 = vmatmul.msk.f32.vlgmr.msra.gmra.mxu3 %vm441_vm14, %v1053_v15  ;;  %v4173_v15 = vld [vmem:[#allocation3 + $0xa8] sm:$0xff] }
 0x30c   :  { %1374 = vmatpush.msrb.mxu0 %v4050_v19  ;;  %1394 = vmatpush.msrb.mxu1 %v4053_v36  ;;  %5045 = vst [vmem:[#allocation30_spill] sm:$0xff] %v4173_v15 }
 0x30d   :  { %1414 = vmatpush.msrb.mxu2 %v4056_v14  ;;  %1434 = vmatpush.msrb.mxu3 %v4059_v9 }
 0x30e   :  { %1375 = vmatpush.msrb.mxu0 %v4062_v10  ;;  %1395 = vmatpush.msrb.mxu1 %v4065_v11 }
 0x30f   :  { %1415 = vmatpush.msrb.mxu2 %v4068_v12  ;;  %1435 = vmatpush.msrb.mxu3 %v4071_v20 }
 0x310   :  { %1376 = vmatpush.msrb.mxu0 %v4074_v21  ;;  %1396 = vmatpush.msrb.mxu1 %v4077_v13 }
 0x311   :  { %1416 = vmatpush.msrb.mxu2 %v4080_v22  ;;  %1436 = vmatpush.msrb.mxu3 %v4083_v23 }
 0x312   :  { %1377 = vmatpush.msrb.mxu0 %v4086_v24  ;;  %1397 = vmatpush.msrb.mxu1 %v4089_v30 }
 0x313   :  { %1417 = vmatpush.msrb.mxu2 %v4092_v31  ;;  %1437 = vmatpush.msrb.mxu3 %v4095_v32 }
 0x314   :  { %1378 = vmatpush.msrb.mxu0 %v4098_v27  ;;  %1398 = vmatpush.msrb.mxu1 %v4101_v34 }
 0x315   :  { %1418 = vmatpush.msrb.mxu2 %v4104_v38  ;;  %1438 = vmatpush.msrb.mxu3 %v4107_v39 }
 0x316   :  { %1451 = vmatpush.msra.mxu0 %v4110_v40  ;;  %1471 = vmatpush.msra.mxu1 %v4113_v42 }
 0x317   :  { %1491 = vmatpush.msra.mxu2 %v4116_v45  ;;  %1511 = vmatpush.msra.mxu3 %v4119_v46 }
 0x318   :  { %1452 = vmatpush.msra.mxu0 %v4122_v47  ;;  %1472 = vmatpush.msra.mxu1 %v4125_v48 }
 0x319   :  { %1492 = vmatpush.msra.mxu2 %v4128_v50  ;;  %1512 = vmatpush.msra.mxu3 %v4131_v51 }
 0x31a   :  { %1453 = vmatpush.msra.mxu0 %v4134_v53  ;;  %1473 = vmatpush.msra.mxu1 %v4137_v56  ;;  %v5058_v56 = vld [vmem:[#allocation42_spill] sm:$0xff]  ;;  %v5059_v53 = vld [vmem:[#allocation43_spill] sm:$0xff] }
 0x31b   :  { %1493 = vmatpush.msra.mxu2 %v4140_v58  ;;  %1513 = vmatpush.msra.mxu3 %v4143_v59  ;;  %v245_v51 = vadd.f32 %v5059_v53, %v5023_v43 }
 0x31c   :  { %1454 = vmatpush.msra.mxu0 %v4146_v61  ;;  %1474 = vmatpush.msra.mxu1 %v4149_v62 }
 0x31d   :  { %1494 = vmatpush.msra.mxu2 %v4152_v41  ;;  %1514 = vmatpush.msra.mxu3 %v4155_v1 }
 0x31e   :  { %1455 = vmatpush.msra.mxu0 %v4158_v29  ;;  %1475 = vmatpush.msra.mxu1 %v4161_v35  ;;  %v4176_v29 = vld [vmem:[#allocation3 + $0xb0] sm:$0xff]  ;;  %v4179_v35 = vld [vmem:[#allocation3 + $0xb8] sm:$0xff] }
 0x31f   :  { %1495 = vmatpush.msra.mxu2 %v4164_v54  ;;  %1515 = vmatpush.msra.mxu3 %v4167_v6  ;;  %5046 = vst [vmem:[#allocation31_spill] sm:$0xff] %v4176_v29  ;;  %v4182_v54 = vld [vmem:[#allocation3 + $0x60] sm:$0xff]  ;;  %v4185_v6 = vld [vmem:[#allocation3 + $0x68] sm:$0xff] }
 0x320   :  { %1456 = vmatpush.msra.mxu0 %v4170_v44  ;;  %1476 = vmatpush.msra.mxu1 %v4173_v15  ;;  %5047 = vst [vmem:[#allocation32_spill] sm:$0xff] %v4179_v35  ;;  %v4188_v44 = vld [vmem:[#allocation3 + $0x70] sm:$0xff]  ;;  %v4191_v15 = vld [vmem:[#allocation3 + $0x78] sm:$0xff] }
 0x321   :  { %1496 = vmatpush.msra.mxu2 %v4176_v29  ;;  %1516 = vmatpush.msra.mxu3 %v4179_v35  ;;  %5048 = vst [vmem:[#allocation33_spill] sm:$0xff] %v4182_v54  ;;  %v4194_v29 = vld [vmem:[#allocation3 + $0x20] sm:$0xff]  ;;  %v4197_v35 = vld [vmem:[#allocation3 + $0x28] sm:$0xff] }
 0x322   :  { %1457 = vmatpush.msra.mxu0 %v4182_v54  ;;  %5049 = vst [vmem:[#allocation34_spill] sm:$0xff] %v4185_v6  ;;  %1477 = vmatpush.msra.mxu1 %v4185_v6  ;;  %v4200_v54 = vld [vmem:[#allocation3 + $0x30] sm:$0xff]  ;;  %v4203_v6 = vld [vmem:[#allocation3 + $0x38] sm:$0xff] }
 0x323   :  { %5050 = vst [vmem:[#allocation35_spill] sm:$0xff] %v4188_v44  ;;  %1497 = vmatpush.msra.mxu2 %v4188_v44  ;;  %1517 = vmatpush.msra.mxu3 %v4191_v15  ;;  %v5056_v44 = vld [vmem:[#allocation40_spill] sm:$0xff] }
 0x324   :  { %5051 = vst [vmem:[#allocation36_spill] sm:$0xff] %v4191_v15  ;;  %1458 = vmatpush.msra.mxu0 %v4194_v29  ;;  %1478 = vmatpush.msra.mxu1 %v4197_v35  ;;  %v122_v1 = vadd.f32 %v5056_v44, %v5014_v52  ;;  %v5057_v15 = vld [vmem:[#allocation41_spill] sm:$0xff] }
 0x325   :  { %5052 = vst [vmem:[#allocation37_spill] sm:$0xff] %v4194_v29  ;;  %1498 = vmatpush.msra.mxu2 %v4200_v54  ;;  %1518 = vmatpush.msra.mxu3 %v4203_v6  ;;  %v163_v41 = vadd.f32 %v5057_v15, %v5016_v57 }
 0x326   :  { %5053 = vst [vmem:[#allocation38_spill] sm:$0xff] %v4197_v35 }
 0x327   :  { %5054 = vst [vmem:[#allocation39_spill] sm:$0xff] %v4200_v54  ;;  %v204_v54 = vadd.f32 %v5058_v56, %v5020_v3 }
 0x328   :  { %5055 = vst [vmem:[#allocation63_spill] sm:$0xff] %v4203_v6 }
 0x37f   :  { %v1074_v62 = vpop.f32.mrf.mxu0  ;;  %v1094_v29 = vpop.f32.mrf.mxu1 }
 0x380   :  { %v1221_v61 = vadd.f32 %v1074_v62, %v122_v1  ;;  %v1222_v59 = vadd.f32 %v1094_v29, %v163_v41 }
 0x382   :  { %v2877_v58 = vmul.f32 -1.442695, %v1221_v61  ;;  %v2878_v35 = vmul.f32 -1.442695, %v1222_v59 }
 0x384   :  { %3035 = vpow2.f32 %v2877_v58 }
 0x385   :  { %3037 = vpow2.f32 %v2878_v35 }
 0x386   :  { %v1114_v6 = vpop.f32.mrf.mxu2  ;;  %v1134_v50 = vpop.f32.mrf.mxu3 }
 0x387   :  { %v1223_v44 = vadd.f32 %v1114_v6, %v204_v54  ;;  %v4214_v52 = vadd.f32 %v1134_v50, %v245_v51  ;;  %v1154_v15 = vpop.f32.mrf.mxu0  ;;  %v1174_v57 = vpop.f32.mrf.mxu1 }
 0x388   :  { %v1225_v62 = vadd.f32 %v1154_v15, %v5018_v7  ;;  %v1226_v61 = vadd.f32 %v1174_v57, %v5019_v8 }
 0x38a   :  { %v3036_v59 = vpop.eup %3035  ;;  %v2880_v58 = vmul.f32 -1.442695, %v1225_v62  ;;  %v2881_v56 = vmul.f32 -1.442695, %v1226_v61 }
 0x38b   :  { %v3038_v41 = vpop.eup %3037  ;;  %v1232_v1 = vadd.f32 1.0, %v3036_v59 }
 0x38c   :  { %v1251_v29 = vadd.f32 1.0, %v3038_v41  ;;  %3039 = vpow2.f32 %v2880_v58 }
 0x38d   :  { %3041 = vrcp.f32 %v1232_v1  ;;  %v1242_v41 = vand.u32 2147483647, %v1232_v1  ;;  %vm1238_vm7 = vweird.f32 %v1232_v1 }
 0x38e   :  { %3043 = vrcp.f32 %v1251_v29  ;;  %v1214_v53 = vpop.f32.mrf.mxu3  ;;  %v1261_v7 = vand.u32 2147483647, %v1251_v29  ;;  %vm1257_vm8 = vweird.f32 %v1251_v29 }
 0x38f   :  { %3045 = vpow2.f32 %v2881_v56  ;;  %v1228_v50 = vadd.f32 %v1214_v53, %v5022_v37  ;;  %v1244_v56 = vand.u32 2147483648, %v1232_v1  ;;  %v1263_v53 = vand.u32 2147483648, %v1251_v29 }
 0x390   :  { %vm1243_vm11 = vcmp.eq.f32.partialorder %v1242_v41, 8.507059e+37  ;;  %vm1262_vm12 = vcmp.eq.f32.partialorder %v1261_v7, 8.507059e+37 }
 0x391   :  { %v2882_v6 = vmul.f32 -1.442695, %v1228_v50  ;;  %v1194_v50 = vpop.f32.mrf.mxu2 }
 0x392   :  { %v3040_v51 = vpop.eup %3039 }
 0x393   :  { %v3042_v35 = vpop.eup %3041  ;;  %v4219_v54 = vadd.f32 1.0, %v3040_v51 }
 0x394   :  { %v3044_v15 = vpop.eup %3043  ;;  %v1234_v57 = vmul.f32 %v3042_v35, %v1232_v1  ;;  %vm1239_vm5 = vweird.f32 %v3042_v35 }
 0x395   :  { %v3046_v8 = vpop.eup %3045  ;;  %v1253_v62 = vmul.f32 %v3044_v15, %v1251_v29  ;;  %3047 = vrcp.f32 %v4219_v54  ;;  %vm1258_vm6 = vweird.f32 %v3044_v15  ;;  %vm1240_vm9 = vmor %vm1238_vm7, %vm1239_vm5  ;;  %vm1301_vm0 = vweird.f32 %v4219_v54 }
 0x396   :  { %v1235_v61 = vsub.f32 1.0, %v1234_v57  ;;  %3049 = vtanh.f32 %v1223_v44  ;;  %v4222_v59 = vadd.f32 1.0, %v3046_v8  ;;  %v1245_v8 = vor.u32 1.1754944e-38, %v1244_v56  ;;  %vm1259_vm10 = vmor %vm1257_vm8, %vm1258_vm6 }
 0x397   :  { %v1254_v58 = vsub.f32 1.0, %v1253_v62  ;;  %3051 = vpow2.f32 %v2882_v6  ;;  %v1227_v57 = vadd.f32 %v1194_v50, %v3873_v28  ;;  %v1264_v6 = vor.u32 1.1754944e-38, %v1263_v53 }
 0x398   :  { %v1236_v37 = vmul.f32 %v3042_v35, %v1235_v61  ;;  %3053 = vrcp.f32 %v4222_v59  ;;  %vm1320_vm4 = vweird.f32 %v4222_v59 }
 0x399   :  { %v1255_v51 = vmul.f32 %v3044_v15, %v1254_v58  ;;  %3055 = vtanh.f32 %v1227_v57 }
 0x39a   :  { %v1237_v43 = vadd.f32 %v3042_v35, %v1236_v37 }
 0x39b   :  { %v3048_v3 = vpop.eup %3047  ;;  %v1256_v44 = vadd.f32 %v3044_v15, %v1255_v51  ;;  %v1307_v51 = vand.u32 2147483648, %v4219_v54 }
 0x39c   :  { %v3050_v62 = vpop.eup %3049  ;;  %v1241_v61 = vsel %vm1240_vm9, %v3042_v35, %v1237_v43  ;;  %v1297_v48 = vmul.f32 %v3048_v3, %v4219_v54  ;;  %vm1302_vm15 = vweird.f32 %v3048_v3  ;;  %v1305_v35 = vand.u32 2147483647, %v4219_v54 }
 0x39d   :  { %v3052_v47 = vpop.eup %3051  ;;  %v1246_v58 = vsel %vm1243_vm11, %v1245_v8, %v1241_v61  ;;  %v1260_v46 = vsel %vm1259_vm10, %v3044_v15, %v1256_v44  ;;  %vm1303_vm2 = vmor %vm1301_vm0, %vm1302_vm15 }
 0x39e   :  { %v3054_v37 = vpop.eup %3053  ;;  %v1265_v1 = vsel %vm1262_vm12, %v1264_v6, %v1260_v46  ;;  %v1288_v45 = vmul.f32 %v3050_v62, %v1246_v58  ;;  %v1298_v29 = vsub.f32 1.0, %v1297_v48  ;;  %v1334_v42 = vadd.f32 1.0, %v3052_v47 }
 0x39f   :  { %v1287_v56 = vmul.f32 %v1265_v1, %v3998_v18  ;;  %v1316_v50 = vmul.f32 %v3054_v37, %v4222_v59  ;;  %v1326_v46 = vand.u32 2147483648, %v4222_v59  ;;  %vm1321_vm1 = vweird.f32 %v3054_v37  ;;  %v3056_v8 = vpop.eup %3055 }
 0x3a0   :  { %v1299_v43 = vmul.f32 %v3048_v3, %v1298_v29  ;;  %3057 = vrcp.f32 %v1334_v42  ;;  %v1308_v18 = vor.u32 1.1754944e-38, %v1307_v51  ;;  %v1324_v48 = vand.u32 2147483647, %v4222_v59  ;;  %vm1322_vm5 = vmor %vm1320_vm4, %vm1321_vm1 }
 0x3a1   :  { %v4231_v41 = vadd.f32 %v1288_v45, %v1287_v56  ;;  %v1317_v7 = vsub.f32 1.0, %v1316_v50  ;;  %vm1306_vm3 = vcmp.eq.f32.partialorder %v1305_v35, 8.507059e+37  ;;  %v1327_v62 = vor.u32 1.1754944e-38, %v1326_v46 }
 0x3a2   :  { %v1300_v15 = vadd.f32 %v3048_v3, %v1299_v43  ;;  %vm1325_vm6 = vcmp.eq.f32.partialorder %v1324_v48, 8.507059e+37  ;;  %v1346_v51 = vand.u32 2147483648, %v1334_v42  ;;  %vm1340_vm8 = vweird.f32 %v1334_v42 }
 0x3a3   :  { %v1318_v47 = vmul.f32 %v3054_v37, %v1317_v7  ;;  %v1344_v59 = vand.u32 2147483647, %v1334_v42 }
 0x3a4   :  { %v1304_v53 = vsel %vm1303_vm2, %v3048_v3, %v1300_v15 }
 0x3a5   :  { %v1309_v44 = vsel %vm1306_vm3, %v1308_v18, %v1304_v53  ;;  %v1319_v45 = vadd.f32 %v3054_v37, %v1318_v47  ;;  %vm1345_vm10 = vcmp.eq.f32.partialorder %v1344_v59, 8.507059e+37  ;;  %v5069_v59 = vld [vmem:[#allocation19_spill] sm:$0xff] }
 0x3a6   :  { %v3058_v57 = vpop.eup %3057  ;;  %v1351_v61 = vmul.f32 %v3056_v8, %v1309_v44 }
 0x3a7   :  { %v1323_v6 = vsel %vm1322_vm5, %v3054_v37, %v1319_v45  ;;  %v1336_v54 = vmul.f32 %v3058_v57, %v1334_v42  ;;  %vm1341_vm7 = vweird.f32 %v3058_v57  ;;  %v1347_v37 = vor.u32 1.1754944e-38, %v1346_v51  ;;  %v5068_v51 = vld [vmem:[#allocation18_spill] sm:$0xff] }
 0x3a8   :  { %v1328_v58 = vsel %vm1325_vm6, %v1327_v62, %v1323_v6  ;;  %vm1342_vm9 = vmor %vm1340_vm8, %vm1341_vm7 }
 0x3a9   :  { %v1350_v1 = vmul.f32 %v1328_v58, %v4005_v26  ;;  %v1337_v29 = vsub.f32 1.0, %v1336_v54  ;;  %v2879_v26 = vmul.f32 -1.442695, %v4214_v52 }
 0x3ab   :  { %v4238_v56 = vadd.f32 %v1351_v61, %v1350_v1  ;;  %v1338_v3 = vmul.f32 %v3058_v57, %v1337_v29  ;;  %v5064_v1 = vld [vmem:[#allocation13_spill] sm:$0xff]  ;;  %v5065_v29 = vld [vmem:[#allocation14_spill] sm:$0xff] }
 0x3ad   :  { %v1339_v50 = vadd.f32 %v3058_v57, %v1338_v3  ;;  %3059 = vtanh.f32 %v4238_v56  ;;  %v5066_v3 = vld [vmem:[#allocation16_spill] sm:$0xff] }
 0x3ae   :  { %3061 = vpow2.f32 %v2879_v26  ;;  %v5075_v26 = vld [vmem:[#allocation25_spill] sm:$0xff] }
 0x3af   :  { %v1343_v43 = vsel %vm1342_vm9, %v3058_v57, %v1339_v50  ;;  %v5067_v50 = vld [vmem:[#allocation17_spill] sm:$0xff] }
 0x3b0   :  { %v1348_v7 = vsel %vm1345_vm10, %v1347_v37, %v1343_v43  ;;  %v5070_v43 = vld [vmem:[#allocation20_spill] sm:$0xff]  ;;  %v5071_v37 = vld [vmem:[#allocation21_spill] sm:$0xff] }
 0x3b3   :  { %v3060_v35 = vpop.eup %3059 }
 0x3b4   :  { %v1354_v46 = vmul.f32 %v3060_v35, %v1348_v7  ;;  %v3062_v15 = vpop.eup %3061  ;;  %v5072_v35 = vld [vmem:[#allocation22_spill] sm:$0xff]  ;;  %v5073_v7 = vld [vmem:[#allocation23_spill] sm:$0xff] }
 0x3b5   :  { %v1271_v47 = vadd.f32 1.0, %v3062_v15  ;;  %v5076_v15 = vld [vmem:[#allocation26_spill] sm:$0xff] }
 0x3b6   :  { %1356 = vrot.lane.b32.xlu1 %v1354_v46, %s3368_s4  ;;  %v5074_v46 = vld [vmem:[#allocation24_spill] sm:$0xff] }
 0x3b7   :  { %3063 = vrcp.f32 %v1271_v47  ;;  %v1283_v44 = vand.u32 2147483648, %v1271_v47  ;;  %vm1277_vm12 = vweird.f32 %v1271_v47  ;;  %v1281_v45 = vand.u32 2147483647, %v1271_v47 }
 0x3b8   :  { %3065 = vtanh.f32 %v4231_v41 }
 0x3b9   :  { %v1284_v6 = vor.u32 1.1754944e-38, %v1283_v44  ;;  %vm1282_vm0 = vcmp.eq.f32.partialorder %v1281_v45, 8.507059e+37  ;;  %v5083_v44 = vld [vmem:[#allocation33_spill] sm:$0xff]  ;;  %v5084_v45 = vld [vmem:[#allocation34_spill] sm:$0xff] }
 0x3bd   :  { %v3064_v18 = vpop.eup %3063 }
 0x3be   :  { %v1273_v48 = vmul.f32 %v3064_v18, %v1271_v47  ;;  %vm1278_vm11 = vweird.f32 %v3064_v18  ;;  %v3066_v62 = vpop.eup %3065  ;;  %v5077_v47 = vld [vmem:[#allocation27_spill] sm:$0xff] }
 0x3bf   :  { %vm1279_vm15 = vmor %vm1277_vm12, %vm1278_vm11 }
 0x3c0   :  { %v1274_v53 = vsub.f32 1.0, %v1273_v48  ;;  %v5079_v48 = vld [vmem:[#allocation29_spill] sm:$0xff] }
 0x3c2   :  { %v1275_v8 = vmul.f32 %v3064_v18, %v1274_v53  ;;  %v5080_v53 = vld [vmem:[#allocation30_spill] sm:$0xff] }
 0x3c4   :  { %v1276_v42 = vadd.f32 %v3064_v18, %v1275_v8  ;;  %v5081_v8 = vld [vmem:[#allocation31_spill] sm:$0xff] }
 0x3c6   :  { %v1280_v57 = vsel %vm1279_vm15, %v3064_v18, %v1276_v42  ;;  %v5078_v18 = vld [vmem:[#allocation28_spill] sm:$0xff] }
 0x3c7   :  { %v1285_v52 = vsel %vm1282_vm0, %v1284_v6, %v1280_v57  ;;  %v5082_v42 = vld [vmem:[#allocation32_spill] sm:$0xff]  ;;  %v5085_v57 = vld [vmem:[#allocation35_spill] sm:$0xff]  ;;  %v5087_v6 = vld [vmem:[#allocation37_spill] sm:$0xff] }
 0x3c8   :  { %v1291_v61 = vmul.f32 %v3066_v62, %v1285_v52  ;;  %v5086_v62 = vld [vmem:[#allocation36_spill] sm:$0xff]  ;;  %v5088_v52 = vld [vmem:[#allocation38_spill] sm:$0xff] }
 0x428   :  { %v1357_v54 = vpop.permute.xlu1 %1356 }
 0x429   :  { %v1359_v58 = vsel %vm375_vm13, %v1291_v61, %v1357_v54  ;;  %v5089_v61 = vld [vmem:[#allocation39_spill] sm:$0xff] }
 0x42a   :  { %2883 = vmatmul.msk.f32.vlgmr.msrb.gmra.mxu0 %vm441_vm14, %v1359_v58  ;;  %2884 = vmatmul.msk.f32.vlgmr.msrb.gmra.mxu1 %vm441_vm14, %v1359_v58  ;;  %v5090_v54 = vld [vmem:[#allocation63_spill] sm:$0xff] }
 0x42b   :  { %2885 = vmatmul.msk.f32.vlgmr.msrb.gmra.mxu2 %vm441_vm14, %v1359_v58  ;;  %2886 = vmatmul.msk.f32.vlgmr.msrb.gmra.mxu3 %vm441_vm14, %v1359_v58 }
 0x42c   :  { %1677 = vmatpush.msrb.mxu0 %v3899_v4  ;;  %1697 = vmatpush.msrb.mxu1 %v3902_v49  ;;  %v5060_v4 = vld [vmem:[#allocation9_spill] sm:$0xff]  ;;  %v5061_v49 = vld [vmem:[#allocation10_spill] sm:$0xff] }
 0x42d   :  { %1717 = vmatpush.msrb.mxu2 %v4020_v25  ;;  %1737 = vmatpush.msrb.mxu3 %v3906_v63  ;;  %v5062_v63 = vld [vmem:[#allocation11_spill] sm:$0xff] }
 0x42e   :  { %1678 = vmatpush.msrb.mxu0 %v3909_v2  ;;  %1698 = vmatpush.msrb.mxu1 %v4025_v16  ;;  %v5063_v2 = vld [vmem:[#allocation12_spill] sm:$0xff] }
 0x42f   :  { %1718 = vmatpush.msrb.mxu2 %v4028_v0  ;;  %1738 = vmatpush.msrb.mxu3 %v4031_v5 }
 0x430   :  { %1679 = vmatpush.msrb.mxu0 %v4034_v60  ;;  %1699 = vmatpush.msrb.mxu1 %v4037_v17 }
 0x431   :  { %1719 = vmatpush.msrb.mxu2 %v4040_v55  ;;  %1739 = vmatpush.msrb.mxu3 %v4043_v33 }
 0x432   :  { %2887 = vmatmul.msk.f32.vlgmr.msra.gmra.mxu0 %vm441_vm14, %v1359_v58  ;;  %2888 = vmatmul.msk.f32.vlgmr.msra.gmra.mxu1 %vm441_vm14, %v1359_v58 }
 0x433   :  { %2889 = vmatmul.msk.f32.vlgmr.msra.gmra.mxu2 %vm441_vm14, %v1359_v58  ;;  %2890 = vmatmul.msk.f32.vlgmr.msra.gmra.mxu3 %vm441_vm14, %v1359_v58  ;;  %v5091_v58 = vld [vmem:[#allocation6_spill] sm:$0xff] }
 0x434   :  { %1680 = vmatpush.msrb.mxu0 %v4050_v19  ;;  %1700 = vmatpush.msrb.mxu1 %v4053_v36 }
 0x435   :  { %1720 = vmatpush.msrb.mxu2 %v4056_v14  ;;  %1740 = vmatpush.msrb.mxu3 %v4059_v9 }
 0x436   :  { %1681 = vmatpush.msrb.mxu0 %v4062_v10  ;;  %1701 = vmatpush.msrb.mxu1 %v4065_v11 }
 0x437   :  { %1721 = vmatpush.msrb.mxu2 %v4068_v12  ;;  %1741 = vmatpush.msrb.mxu3 %v4071_v20 }
 0x438   :  { %1682 = vmatpush.msrb.mxu0 %v4074_v21  ;;  %1702 = vmatpush.msrb.mxu1 %v4077_v13 }
 0x439   :  { %1722 = vmatpush.msrb.mxu2 %v4080_v22  ;;  %1742 = vmatpush.msrb.mxu3 %v4083_v23 }
 0x43a   :  { %1683 = vmatpush.msrb.mxu0 %v4086_v24  ;;  %1703 = vmatpush.msrb.mxu1 %v4089_v30 }
 0x43b   :  { %1723 = vmatpush.msrb.mxu2 %v4092_v31  ;;  %1743 = vmatpush.msrb.mxu3 %v4095_v32 }
 0x43c   :  { %1684 = vmatpush.msrb.mxu0 %v4098_v27  ;;  %1704 = vmatpush.msrb.mxu1 %v4101_v34 }
 0x43d   :  { %1724 = vmatpush.msrb.mxu2 %v4104_v38  ;;  %1744 = vmatpush.msrb.mxu3 %v4107_v39 }
 0x43e   :  { %1757 = vmatpush.msra.mxu0 %v4110_v40  ;;  %1777 = vmatpush.msra.mxu1 %v5060_v4 }
 0x43f   :  { %1797 = vmatpush.msra.mxu2 %v5061_v49  ;;  %1817 = vmatpush.msra.mxu3 %v5062_v63 }
 0x440   :  { %1758 = vmatpush.msra.mxu0 %v5063_v2  ;;  %1778 = vmatpush.msra.mxu1 %v5064_v1 }
 0x441   :  { %1798 = vmatpush.msra.mxu2 %v5065_v29  ;;  %1818 = vmatpush.msra.mxu3 %v5066_v3 }
 0x442   :  { %1759 = vmatpush.msra.mxu0 %v5067_v50  ;;  %1779 = vmatpush.msra.mxu1 %v5068_v51 }
 0x443   :  { %1799 = vmatpush.msra.mxu2 %v5069_v59  ;;  %1819 = vmatpush.msra.mxu3 %v5070_v43 }
 0x444   :  { %1760 = vmatpush.msra.mxu0 %v5071_v37  ;;  %1780 = vmatpush.msra.mxu1 %v5072_v35  ;;  %v5099_v37 = vld [vmem:[#allocation60_spill] sm:$0xff] }
 0x445   :  { %1800 = vmatpush.msra.mxu2 %v5073_v7  ;;  %1820 = vmatpush.msra.mxu3 %v5074_v46  ;;  %v5097_v46 = vld [vmem:[#allocation8_spill] sm:$0xff] }
 0x446   :  { %1761 = vmatpush.msra.mxu0 %v5075_v26  ;;  %1781 = vmatpush.msra.mxu1 %v5076_v15  ;;  %v5096_v26 = vld [vmem:[#allocation46_spill] sm:$0xff] }
 0x447   :  { %1801 = vmatpush.msra.mxu2 %v5077_v47  ;;  %1821 = vmatpush.msra.mxu3 %v5078_v18 }
 0x448   :  { %1762 = vmatpush.msra.mxu0 %v5079_v48  ;;  %1782 = vmatpush.msra.mxu1 %v5080_v53  ;;  %v5094_v48 = vld [vmem:[#allocation45_spill] sm:$0xff] }
 0x449   :  { %1802 = vmatpush.msra.mxu2 %v5081_v8  ;;  %1822 = vmatpush.msra.mxu3 %v5082_v42  ;;  %v5092_v8 = vld [vmem:[#allocation44_spill] sm:$0xff]  ;;  %v5093_v42 = vld [vmem:[#allocation7_spill] sm:$0xff] }
 0x44a   :  { %1763 = vmatpush.msra.mxu0 %v5083_v44  ;;  %1783 = vmatpush.msra.mxu1 %v5084_v45  ;;  %v125_v53 = vadd.f32 %v5092_v8, %v5091_v58  ;;  %v166_v44 = vadd.f32 %v5094_v48, %v5093_v42 }
 0x44b   :  { %1803 = vmatpush.msra.mxu2 %v5085_v57  ;;  %1823 = vmatpush.msra.mxu3 %v5086_v62 }
 0x44c   :  { %1764 = vmatpush.msra.mxu0 %v5087_v6  ;;  %1784 = vmatpush.msra.mxu1 %v5088_v52  ;;  %v5095_v6 = vld [vmem:[#allocation15_spill] sm:$0xff] }
 0x44d   :  { %1804 = vmatpush.msra.mxu2 %v5089_v61  ;;  %1824 = vmatpush.msra.mxu3 %v5090_v54  ;;  %v207_v52 = vadd.f32 %v5096_v26, %v5095_v6  ;;  %v5098_v61 = vld [vmem:[#allocation47_spill] sm:$0xff] }
 0x44e   :  { %v248_v7 = vadd.f32 %v5098_v61, %v5097_v46 }
 0x4a7   :  { %v1380_v18 = vpop.f32.mrf.mxu0  ;;  %v1400_v45 = vpop.f32.mrf.mxu1 }
 0x4a8   :  { %v1527_v47 = vadd.f32 %v1380_v18, %v125_v53  ;;  %v1528_v57 = vadd.f32 %v1400_v45, %v166_v44  ;;  %v5100_v53 = vld [vmem:[#allocation61_spill] sm:$0xff] }
 0x4aa   :  { %v2891_v15 = vmul.f32 -1.442695, %v1527_v47  ;;  %v2892_v62 = vmul.f32 -1.442695, %v1528_v57 }
 0x4ac   :  { %3067 = vpow2.f32 %v2891_v15 }
 0x4ad   :  { %3069 = vpow2.f32 %v2892_v62 }
 0x4ae   :  { %v1420_v54 = vpop.f32.mrf.mxu2  ;;  %v1440_v35 = vpop.f32.mrf.mxu3 }
 0x4af   :  { %v1529_v8 = vadd.f32 %v1420_v54, %v207_v52  ;;  %v4325_v58 = vadd.f32 %v1440_v35, %v248_v7  ;;  %v1460_v48 = vpop.f32.mrf.mxu0  ;;  %v1480_v42 = vpop.f32.mrf.mxu1  ;;  %v5101_v52 = vld [vmem:[#allocation62_spill] sm:$0xff] }
 0x4b0   :  { %v1531_v18 = vadd.f32 %v1460_v48, %v5099_v37  ;;  %v1532_v47 = vadd.f32 %v1480_v42, %v5100_v53 }
 0x4b2   :  { %v3068_v44 = vpop.eup %3067  ;;  %v2894_v15 = vmul.f32 -1.442695, %v1531_v18  ;;  %v2895_v26 = vmul.f32 -1.442695, %v1532_v47 }
 0x4b3   :  { %v3070_v45 = vpop.eup %3069  ;;  %v1538_v57 = vadd.f32 1.0, %v3068_v44 }
 0x4b4   :  { %v1557_v6 = vadd.f32 1.0, %v3070_v45  ;;  %3071 = vpow2.f32 %v2894_v15 }
 0x4b5   :  { %3073 = vrcp.f32 %v1538_v57  ;;  %v1548_v45 = vand.u32 2147483647, %v1538_v57  ;;  %vm1544_vm3 = vweird.f32 %v1538_v57 }
 0x4b6   :  { %3075 = vrcp.f32 %v1557_v6  ;;  %v1520_v62 = vpop.f32.mrf.mxu3  ;;  %v1567_v46 = vand.u32 2147483647, %v1557_v6  ;;  %vm1563_vm4 = vweird.f32 %v1557_v6 }
 0x4b7   :  { %3077 = vpow2.f32 %v2895_v26  ;;  %v1534_v35 = vadd.f32 %v1520_v62, %v5101_v52  ;;  %v1550_v26 = vand.u32 2147483648, %v1538_v57  ;;  %v1569_v62 = vand.u32 2147483648, %v1557_v6 }
 0x4b8   :  { %vm1549_vm7 = vcmp.eq.f32.partialorder %v1548_v45, 8.507059e+37  ;;  %vm1568_vm8 = vcmp.eq.f32.partialorder %v1567_v46, 8.507059e+37 }
 0x4b9   :  { %v2896_v48 = vmul.f32 -1.442695, %v1534_v35  ;;  %v1500_v35 = vpop.f32.mrf.mxu2 }
 0x4ba   :  { %v3072_v7 = vpop.eup %3071 }
 0x4bb   :  { %v3074_v61 = vpop.eup %3073  ;;  %v4330_v54 = vadd.f32 1.0, %v3072_v7 }
 0x4bc   :  { %v3076_v37 = vpop.eup %3075  ;;  %v1540_v42 = vmul.f32 %v3074_v61, %v1538_v57  ;;  %vm1545_vm1 = vweird.f32 %v3074_v61 }
 0x4bd   :  { %v3078_v53 = vpop.eup %3077  ;;  %v1559_v18 = vmul.f32 %v3076_v37, %v1557_v6  ;;  %3079 = vrcp.f32 %v4330_v54  ;;  %vm1564_vm2 = vweird.f32 %v3076_v37  ;;  %vm1546_vm5 = vmor %vm1544_vm3, %vm1545_vm1  ;;  %vm1607_vm10 = vweird.f32 %v4330_v54 }
 0x4be   :  { %v1541_v47 = vsub.f32 1.0, %v1540_v42  ;;  %3081 = vtanh.f32 %v1529_v8  ;;  %v4333_v44 = vadd.f32 1.0, %v3078_v53  ;;  %v1551_v8 = vor.u32 1.1754944e-38, %v1550_v26  ;;  %vm1565_vm6 = vmor %vm1563_vm4, %vm1564_vm2 }
 0x4bf   :  { %v1560_v15 = vsub.f32 1.0, %v1559_v18  ;;  %3083 = vpow2.f32 %v2896_v48  ;;  %v1533_v42 = vadd.f32 %v1500_v35, %v3873_v28  ;;  %v1570_v48 = vor.u32 1.1754944e-38, %v1569_v62 }
 0x4c0   :  { %v1542_v52 = vmul.f32 %v3074_v61, %v1541_v47  ;;  %3085 = vrcp.f32 %v4333_v44  ;;  %vm1626_vm0 = vweird.f32 %v4333_v44 }
 0x4c1   :  { %v1561_v7 = vmul.f32 %v3076_v37, %v1560_v15  ;;  %3087 = vtanh.f32 %v1533_v42 }
 0x4c2   :  { %v1543_v43 = vadd.f32 %v3074_v61, %v1542_v52 }
 0x4c3   :  { %v3080_v59 = vpop.eup %3079  ;;  %v1562_v53 = vadd.f32 %v3076_v37, %v1561_v7  ;;  %v1613_v7 = vand.u32 2147483648, %v4330_v54 }
 0x4c4   :  { %v3082_v18 = vpop.eup %3081  ;;  %v1547_v47 = vsel %vm1546_vm5, %v3074_v61, %v1543_v43  ;;  %v1603_v51 = vmul.f32 %v3080_v59, %v4330_v54  ;;  %vm1608_vm9 = vweird.f32 %v3080_v59  ;;  %v1611_v61 = vand.u32 2147483647, %v4330_v54 }
 0x4c5   :  { %v3084_v50 = vpop.eup %3083  ;;  %v1552_v15 = vsel %vm1549_vm7, %v1551_v8, %v1547_v47  ;;  %v1566_v3 = vsel %vm1565_vm6, %v3076_v37, %v1562_v53  ;;  %vm1609_vm12 = vmor %vm1607_vm10, %vm1608_vm9 }
 0x4c6   :  { %v3086_v52 = vpop.eup %3085  ;;  %v1571_v57 = vsel %vm1568_vm8, %v1570_v48, %v1566_v3  ;;  %v1594_v29 = vmul.f32 %v3082_v18, %v1552_v15  ;;  %v1604_v6 = vsub.f32 1.0, %v1603_v51  ;;  %v1640_v1 = vadd.f32 1.0, %v3084_v50 }
 0x4c7   :  { %v1593_v26 = vmul.f32 %v1571_v57, %v4231_v41  ;;  %v1622_v35 = vmul.f32 %v3086_v52, %v4333_v44  ;;  %v1632_v3 = vand.u32 2147483648, %v4333_v44  ;;  %vm1627_vm11 = vweird.f32 %v3086_v52  ;;  %v3088_v8 = vpop.eup %3087 }
 0x4c8   :  { %v1605_v43 = vmul.f32 %v3080_v59, %v1604_v6  ;;  %3089 = vrcp.f32 %v1640_v1  ;;  %v1614_v41 = vor.u32 1.1754944e-38, %v1613_v7  ;;  %v1630_v51 = vand.u32 2147483647, %v4333_v44  ;;  %vm1628_vm1 = vmor %vm1626_vm0, %vm1627_vm11 }
 0x4c9   :  { %v4342_v45 = vadd.f32 %v1594_v29, %v1593_v26  ;;  %v1623_v37 = vsub.f32 1.0, %v1622_v35  ;;  %vm1612_vm15 = vcmp.eq.f32.partialorder %v1611_v61, 8.507059e+37  ;;  %v1633_v18 = vor.u32 1.1754944e-38, %v1632_v3 }
 0x4ca   :  { %v1606_v46 = vadd.f32 %v3080_v59, %v1605_v43  ;;  %vm1631_vm2 = vcmp.eq.f32.partialorder %v1630_v51, 8.507059e+37  ;;  %v1652_v7 = vand.u32 2147483648, %v1640_v1  ;;  %vm1646_vm4 = vweird.f32 %v1640_v1 }
 0x4cb   :  { %v1624_v50 = vmul.f32 %v3086_v52, %v1623_v37  ;;  %v1650_v44 = vand.u32 2147483647, %v1640_v1 }
 0x4cc   :  { %v1610_v62 = vsel %vm1609_vm12, %v3080_v59, %v1606_v46 }
 0x4cd   :  { %v1615_v53 = vsel %vm1612_vm15, %v1614_v41, %v1610_v62  ;;  %v1625_v29 = vadd.f32 %v3086_v52, %v1624_v50  ;;  %vm1651_vm6 = vcmp.eq.f32.partialorder %v1650_v44, 8.507059e+37 }
 0x4ce   :  { %v3090_v42 = vpop.eup %3089  ;;  %v1657_v47 = vmul.f32 %v3088_v8, %v1615_v53 }
 0x4cf   :  { %v1629_v48 = vsel %vm1628_vm1, %v3086_v52, %v1625_v29  ;;  %v1642_v54 = vmul.f32 %v3090_v42, %v1640_v1  ;;  %vm1647_vm3 = vweird.f32 %v3090_v42  ;;  %v1653_v52 = vor.u32 1.1754944e-38, %v1652_v7 }
 0x4d0   :  { %v1634_v15 = vsel %vm1631_vm2, %v1633_v18, %v1629_v48  ;;  %vm1648_vm5 = vmor %vm1646_vm4, %vm1647_vm3 }
 0x4d1   :  { %v1656_v57 = vmul.f32 %v1634_v15, %v4238_v56  ;;  %v1643_v6 = vsub.f32 1.0, %v1642_v54  ;;  %v2893_v56 = vmul.f32 -1.442695, %v4325_v58 }
 0x4d3   :  { %v4349_v26 = vadd.f32 %v1657_v47, %v1656_v57  ;;  %v1644_v59 = vmul.f32 %v3090_v42, %v1643_v6  ;;  %v4360_v57 = vld [vmem:[#allocation3 + $0x1c0] sm:$0xff]  ;;  %v4363_v6 = vld [vmem:[#allocation3 + $0x1c8] sm:$0xff] }
 0x4d5   :  { %v1645_v35 = vadd.f32 %v3090_v42, %v1644_v59  ;;  %3091 = vtanh.f32 %v4349_v26  ;;  %v4367_v59 = vld [vmem:[#allocation3 + $0x1d8] sm:$0xff] }
 0x4d6   :  { %3093 = vpow2.f32 %v2893_v56  ;;  %v5134_v56 = vld [vmem:[#allocation50_spill] sm:$0xff] }
 0x4d7   :  { %v1649_v43 = vsel %vm1648_vm5, %v3090_v42, %v1645_v35  ;;  %v4370_v35 = vld [vmem:[#allocation3 + $0x180] sm:$0xff] }
 0x4d8   :  { %v1654_v37 = vsel %vm1651_vm6, %v1653_v52, %v1649_v43 }
 0x4db   :  { %v3092_v61 = vpop.eup %3091 }
 0x4dc   :  { %v1660_v3 = vmul.f32 %v3092_v61, %v1654_v37  ;;  %v3094_v46 = vpop.eup %3093 }
 0x4dd   :  { %v1577_v50 = vadd.f32 1.0, %v3094_v46 }
 0x4de   :  { %1662 = vrot.lane.b32.xlu1 %v1660_v3, %s3368_s4  ;;  %v5133_v3 = vld [vmem:[#allocation15_spill] sm:$0xff] }
 0x4df   :  { %3095 = vrcp.f32 %v1577_v50  ;;  %v1589_v53 = vand.u32 2147483648, %v1577_v50  ;;  %vm1583_vm8 = vweird.f32 %v1577_v50  ;;  %v1587_v29 = vand.u32 2147483647, %v1577_v50 }
 0x4e0   :  { %3097 = vtanh.f32 %v4342_v45  ;;  %v210_v46 = vadd.f32 %v5134_v56, %v5133_v3 }
 0x4e1   :  { %v1590_v48 = vor.u32 1.1754944e-38, %v1589_v53  ;;  %vm1588_vm10 = vcmp.eq.f32.partialorder %v1587_v29, 8.507059e+37 }
 0x4e5   :  { %v3096_v41 = vpop.eup %3095 }
 0x4e6   :  { %v1579_v51 = vmul.f32 %v3096_v41, %v1577_v50  ;;  %vm1584_vm7 = vweird.f32 %v3096_v41  ;;  %v3098_v18 = vpop.eup %3097  ;;  %v5135_v50 = vld [vmem:[#allocation8_spill] sm:$0xff] }
 0x4e7   :  { %vm1585_vm9 = vmor %vm1583_vm8, %vm1584_vm7 }
 0x4e8   :  { %v1580_v62 = vsub.f32 1.0, %v1579_v51 }
 0x4ea   :  { %v1581_v8 = vmul.f32 %v3096_v41, %v1580_v62 }
 0x4ec   :  { %v1582_v1 = vadd.f32 %v3096_v41, %v1581_v8 }
 0x4ee   :  { %v1586_v42 = vsel %vm1585_vm9, %v3096_v41, %v1582_v1  ;;  %v5136_v41 = vld [vmem:[#allocation51_spill] sm:$0xff] }
 0x4ef   :  { %v1591_v58 = vsel %vm1588_vm10, %v1590_v48, %v1586_v42  ;;  %v251_v51 = vadd.f32 %v5136_v41, %v5135_v50 }
 0x4f0   :  { %v1597_v47 = vmul.f32 %v3098_v18, %v1591_v58  ;;  %v5137_v18 = vld [vmem:[#allocation60_spill] sm:$0xff]  ;;  %v5138_v58 = vld [vmem:[#allocation61_spill] sm:$0xff] }
 0x550   :  { %v1663_v54 = vpop.permute.xlu1 %1662 }
 0x551   :  { %v1665_v15 = vsel %vm375_vm13, %v1597_v47, %v1663_v54 }
 0x552   :  { %2897 = vmatmul.msk.f32.vlgmr.msrb.gmra.mxu0 %vm441_vm14, %v1665_v15  ;;  %2898 = vmatmul.msk.f32.vlgmr.msrb.gmra.mxu1 %vm441_vm14, %v1665_v15 }
 0x553   :  { %2899 = vmatmul.msk.f32.vlgmr.msrb.gmra.mxu2 %vm441_vm14, %v1665_v15  ;;  %2900 = vmatmul.msk.f32.vlgmr.msrb.gmra.mxu3 %vm441_vm14, %v1665_v15 }
 0x554   :  { %1983 = vmatpush.msrb.mxu0 %v4360_v57  ;;  %2003 = vmatpush.msrb.mxu1 %v4363_v6 }
 0x555   :  { %2023 = vmatpush.msrb.mxu2 %v4020_v25  ;;  %2043 = vmatpush.msrb.mxu3 %v4367_v59  ;;  %v5102_v25 = vld [vmem:[#allocation13_spill] sm:$0xff] }
 0x556   :  { %1984 = vmatpush.msrb.mxu0 %v4370_v35  ;;  %2004 = vmatpush.msrb.mxu1 %v4025_v16  ;;  %v5103_v16 = vld [vmem:[#allocation14_spill] sm:$0xff] }
 0x557   :  { %2024 = vmatpush.msrb.mxu2 %v4028_v0  ;;  %2044 = vmatpush.msrb.mxu3 %v4031_v5  ;;  %v5104_v0 = vld [vmem:[#allocation16_spill] sm:$0xff]  ;;  %v5105_v5 = vld [vmem:[#allocation17_spill] sm:$0xff] }
 0x558   :  { %1985 = vmatpush.msrb.mxu0 %v4034_v60  ;;  %2005 = vmatpush.msrb.mxu1 %v4037_v17  ;;  %v5106_v60 = vld [vmem:[#allocation18_spill] sm:$0xff]  ;;  %v5107_v17 = vld [vmem:[#allocation19_spill] sm:$0xff] }
 0x559   :  { %2025 = vmatpush.msrb.mxu2 %v4040_v55  ;;  %2045 = vmatpush.msrb.mxu3 %v4043_v33  ;;  %v5108_v55 = vld [vmem:[#allocation20_spill] sm:$0xff]  ;;  %v5109_v33 = vld [vmem:[#allocation21_spill] sm:$0xff] }
 0x55a   :  { %2901 = vmatmul.msk.f32.vlgmr.msra.gmra.mxu0 %vm441_vm14, %v1665_v15  ;;  %2902 = vmatmul.msk.f32.vlgmr.msra.gmra.mxu1 %vm441_vm14, %v1665_v15 }
 0x55b   :  { %2903 = vmatmul.msk.f32.vlgmr.msra.gmra.mxu2 %vm441_vm14, %v1665_v15  ;;  %2904 = vmatmul.msk.f32.vlgmr.msra.gmra.mxu3 %vm441_vm14, %v1665_v15 }
 0x55c   :  { %1986 = vmatpush.msrb.mxu0 %v4050_v19  ;;  %2006 = vmatpush.msrb.mxu1 %v4053_v36  ;;  %v5110_v19 = vld [vmem:[#allocation22_spill] sm:$0xff]  ;;  %v5111_v36 = vld [vmem:[#allocation23_spill] sm:$0xff] }
 0x55d   :  { %2026 = vmatpush.msrb.mxu2 %v4056_v14  ;;  %2046 = vmatpush.msrb.mxu3 %v4059_v9  ;;  %v5112_v14 = vld [vmem:[#allocation24_spill] sm:$0xff]  ;;  %v5113_v9 = vld [vmem:[#allocation25_spill] sm:$0xff] }
 0x55e   :  { %1987 = vmatpush.msrb.mxu0 %v4062_v10  ;;  %2007 = vmatpush.msrb.mxu1 %v4065_v11  ;;  %v5114_v10 = vld [vmem:[#allocation26_spill] sm:$0xff]  ;;  %v5115_v11 = vld [vmem:[#allocation27_spill] sm:$0xff] }
 0x55f   :  { %2027 = vmatpush.msrb.mxu2 %v4068_v12  ;;  %2047 = vmatpush.msrb.mxu3 %v4071_v20  ;;  %v5116_v12 = vld [vmem:[#allocation28_spill] sm:$0xff]  ;;  %v5117_v20 = vld [vmem:[#allocation29_spill] sm:$0xff] }
 0x560   :  { %1988 = vmatpush.msrb.mxu0 %v4074_v21  ;;  %2008 = vmatpush.msrb.mxu1 %v4077_v13  ;;  %v5118_v21 = vld [vmem:[#allocation30_spill] sm:$0xff]  ;;  %v5119_v13 = vld [vmem:[#allocation31_spill] sm:$0xff] }
 0x561   :  { %2028 = vmatpush.msrb.mxu2 %v4080_v22  ;;  %2048 = vmatpush.msrb.mxu3 %v4083_v23  ;;  %v5120_v22 = vld [vmem:[#allocation32_spill] sm:$0xff]  ;;  %v5121_v23 = vld [vmem:[#allocation33_spill] sm:$0xff] }
 0x562   :  { %1989 = vmatpush.msrb.mxu0 %v4086_v24  ;;  %2009 = vmatpush.msrb.mxu1 %v4089_v30  ;;  %v5122_v24 = vld [vmem:[#allocation34_spill] sm:$0xff]  ;;  %v5123_v30 = vld [vmem:[#allocation35_spill] sm:$0xff] }
 0x563   :  { %2029 = vmatpush.msrb.mxu2 %v4092_v31  ;;  %2049 = vmatpush.msrb.mxu3 %v4095_v32  ;;  %v5124_v31 = vld [vmem:[#allocation36_spill] sm:$0xff]  ;;  %v5125_v32 = vld [vmem:[#allocation37_spill] sm:$0xff] }
 0x564   :  { %1990 = vmatpush.msrb.mxu0 %v4098_v27  ;;  %2010 = vmatpush.msrb.mxu1 %v4101_v34  ;;  %v5126_v27 = vld [vmem:[#allocation38_spill] sm:$0xff]  ;;  %v5127_v34 = vld [vmem:[#allocation39_spill] sm:$0xff] }
 0x565   :  { %2030 = vmatpush.msrb.mxu2 %v4104_v38  ;;  %2050 = vmatpush.msrb.mxu3 %v4107_v39  ;;  %v5128_v38 = vld [vmem:[#allocation63_spill] sm:$0xff]  ;;  %v5129_v39 = vld [vmem:[#allocation6_spill] sm:$0xff] }
 0x566   :  { %2063 = vmatpush.msra.mxu0 %v4110_v40  ;;  %2083 = vmatpush.msra.mxu1 %v5060_v4  ;;  %v5130_v40 = vld [vmem:[#allocation48_spill] sm:$0xff] }
 0x567   :  { %2103 = vmatpush.msra.mxu2 %v5061_v49  ;;  %2123 = vmatpush.msra.mxu3 %v5062_v63  ;;  %v128_v4 = vadd.f32 %v5130_v40, %v5129_v39  ;;  %v5131_v49 = vld [vmem:[#allocation7_spill] sm:$0xff]  ;;  %v5132_v63 = vld [vmem:[#allocation49_spill] sm:$0xff] }
 0x568   :  { %2064 = vmatpush.msra.mxu0 %v5063_v2  ;;  %2084 = vmatpush.msra.mxu1 %v5102_v25  ;;  %v169_v2 = vadd.f32 %v5132_v63, %v5131_v49 }
 0x569   :  { %2104 = vmatpush.msra.mxu2 %v5103_v16  ;;  %2124 = vmatpush.msra.mxu3 %v5104_v0 }
 0x56a   :  { %2065 = vmatpush.msra.mxu0 %v5105_v5  ;;  %2085 = vmatpush.msra.mxu1 %v5106_v60 }
 0x56b   :  { %2105 = vmatpush.msra.mxu2 %v5107_v17  ;;  %2125 = vmatpush.msra.mxu3 %v5108_v55  ;;  %v5139_v17 = vld [vmem:[#allocation62_spill] sm:$0xff] }
 0x56c   :  { %2066 = vmatpush.msra.mxu0 %v5109_v33  ;;  %2086 = vmatpush.msra.mxu1 %v5110_v19 }
 0x56d   :  { %2106 = vmatpush.msra.mxu2 %v5111_v36  ;;  %2126 = vmatpush.msra.mxu3 %v5112_v14 }
 0x56e   :  { %2067 = vmatpush.msra.mxu0 %v5113_v9  ;;  %2087 = vmatpush.msra.mxu1 %v5114_v10 }
 0x56f   :  { %2107 = vmatpush.msra.mxu2 %v5115_v11  ;;  %2127 = vmatpush.msra.mxu3 %v5116_v12 }
 0x570   :  { %2068 = vmatpush.msra.mxu0 %v5117_v20  ;;  %2088 = vmatpush.msra.mxu1 %v5118_v21 }
 0x571   :  { %2108 = vmatpush.msra.mxu2 %v5119_v13  ;;  %2128 = vmatpush.msra.mxu3 %v5120_v22 }
 0x572   :  { %2069 = vmatpush.msra.mxu0 %v5121_v23  ;;  %2089 = vmatpush.msra.mxu1 %v5122_v24 }
 0x573   :  { %2109 = vmatpush.msra.mxu2 %v5123_v30  ;;  %2129 = vmatpush.msra.mxu3 %v5124_v31 }
 0x574   :  { %2070 = vmatpush.msra.mxu0 %v5125_v32  ;;  %2090 = vmatpush.msra.mxu1 %v5126_v27 }
 0x575   :  { %2110 = vmatpush.msra.mxu2 %v5127_v34  ;;  %2130 = vmatpush.msra.mxu3 %v5128_v38 }
 0x5cf   :  { %v1686_v7 = vpop.f32.mrf.mxu0  ;;  %v1706_v44 = vpop.f32.mrf.mxu1 }
 0x5d0   :  { %v1833_v43 = vadd.f32 %v1686_v7, %v128_v4  ;;  %v1834_v52 = vadd.f32 %v1706_v44, %v169_v2 }
 0x5d2   :  { %v2905_v61 = vmul.f32 -1.442695, %v1833_v43  ;;  %v2906_v37 = vmul.f32 -1.442695, %v1834_v52 }
 0x5d4   :  { %3099 = vpow2.f32 %v2905_v61 }
 0x5d5   :  { %3101 = vpow2.f32 %v2906_v37 }
 0x5d6   :  { %v1726_v62 = vpop.f32.mrf.mxu2  ;;  %v1746_v8 = vpop.f32.mrf.mxu3 }
 0x5d7   :  { %v1835_v1 = vadd.f32 %v1726_v62, %v210_v46  ;;  %v4444_v53 = vadd.f32 %v1746_v8, %v251_v51  ;;  %v1766_v29 = vpop.f32.mrf.mxu0  ;;  %v1786_v42 = vpop.f32.mrf.mxu1 }
 0x5d8   :  { %v1837_v48 = vadd.f32 %v1766_v29, %v5137_v18  ;;  %v1838_v47 = vadd.f32 %v1786_v42, %v5138_v58 }
 0x5da   :  { %v3100_v54 = vpop.eup %3099  ;;  %v2908_v15 = vmul.f32 -1.442695, %v1837_v48  ;;  %v2909_v0 = vmul.f32 -1.442695, %v1838_v47 }
 0x5db   :  { %v3102_v25 = vpop.eup %3101  ;;  %v1844_v16 = vadd.f32 1.0, %v3100_v54 }
 0x5dc   :  { %v1863_v5 = vadd.f32 1.0, %v3102_v25  ;;  %3103 = vpow2.f32 %v2908_v15 }
 0x5dd   :  { %3105 = vrcp.f32 %v1844_v16  ;;  %v1854_v22 = vand.u32 2147483647, %v1844_v16  ;;  %v1856_v23 = vand.u32 2147483648, %v1844_v16  ;;  %vm1850_vm15 = vweird.f32 %v1844_v16 }
 0x5de   :  { %3107 = vrcp.f32 %v1863_v5  ;;  %v1826_v60 = vpop.f32.mrf.mxu3  ;;  %v1875_v24 = vand.u32 2147483648, %v1863_v5  ;;  %v1806_v31 = vpop.f32.mrf.mxu2  ;;  %v1873_v27 = vand.u32 2147483647, %v1863_v5  ;;  %vm1869_vm0 = vweird.f32 %v1863_v5 }
 0x5df   :  { %3109 = vpow2.f32 %v2909_v0  ;;  %v1840_v55 = vadd.f32 %v1826_v60, %v5139_v17  ;;  %v1857_v40 = vor.u32 1.1754944e-38, %v1856_v23  ;;  %v1839_v63 = vadd.f32 %v1806_v31, %v3873_v28 }
 0x5e0   :  { %v1876_v7 = vor.u32 1.1754944e-38, %v1875_v24  ;;  %vm1855_vm3 = vcmp.eq.f32.partialorder %v1854_v22, 8.507059e+37  ;;  %vm1874_vm4 = vcmp.eq.f32.partialorder %v1873_v27, 8.507059e+37 }
 0x5e1   :  { %v2910_v14 = vmul.f32 -1.442695, %v1840_v55 }
 0x5e2   :  { %v3104_v33 = vpop.eup %3103 }
 0x5e3   :  { %v3106_v19 = vpop.eup %3105  ;;  %v4449_v36 = vadd.f32 1.0, %v3104_v33 }
 0x5e4   :  { %v3108_v9 = vpop.eup %3107  ;;  %v1846_v10 = vmul.f32 %v3106_v19, %v1844_v16  ;;  %vm1851_vm11 = vweird.f32 %v3106_v19 }
 0x5e5   :  { %v3110_v11 = vpop.eup %3109  ;;  %v1865_v12 = vmul.f32 %v3108_v9, %v1863_v5  ;;  %3111 = vrcp.f32 %v4449_v36  ;;  %vm1870_vm12 = vweird.f32 %v3108_v9  ;;  %vm1852_vm1 = vmor %vm1850_vm15, %vm1851_vm11  ;;  %v1919_v29 = vand.u32 2147483648, %v4449_v36 }
 0x5e6   :  { %v1847_v20 = vsub.f32 1.0, %v1846_v10  ;;  %3113 = vtanh.f32 %v1835_v1  ;;  %v4452_v21 = vadd.f32 1.0, %v3110_v11  ;;  %vm1871_vm2 = vmor %vm1869_vm0, %vm1870_vm12  ;;  %v1917_v48 = vand.u32 2147483647, %v4449_v36 }
 0x5e7   :  { %v1866_v13 = vsub.f32 1.0, %v1865_v12  ;;  %3115 = vpow2.f32 %v2910_v14  ;;  %vm1913_vm6 = vweird.f32 %v4449_v36 }
 0x5e8   :  { %v1848_v30 = vmul.f32 %v3106_v19, %v1847_v20  ;;  %3117 = vrcp.f32 %v4452_v21  ;;  %v1938_v15 = vand.u32 2147483648, %v4452_v21  ;;  %v1936_v0 = vand.u32 2147483647, %v4452_v21 }
 0x5e9   :  { %v1867_v32 = vmul.f32 %v3108_v9, %v1866_v13  ;;  %3119 = vtanh.f32 %v1839_v63  ;;  %vm1918_vm9 = vcmp.eq.f32.partialorder %v1917_v48, 8.507059e+37  ;;  %vm1932_vm10 = vweird.f32 %v4452_v21  ;;  %v3284_v48 = vld [vmem:[#allocation3 + $0x148] sm:$0xff] }
 0x5ea   :  { %v1849_v34 = vadd.f32 %v3106_v19, %v1848_v30  ;;  %v1939_v14 = vor.u32 1.1754944e-38, %v1938_v15  ;;  %vm1937_vm12 = vcmp.eq.f32.partialorder %v1936_v0, 8.507059e+37  ;;  %v3290_v15 = vld [vmem:[#allocation3 + $0x118] sm:$0xff] }
 0x5eb   :  { %v3112_v38 = vpop.eup %3111  ;;  %v1868_v4 = vadd.f32 %v3108_v9, %v1867_v32  ;;  %v3294_v0 = vld [vmem:[#allocation3 + $0xd8] sm:$0xff] }
 0x5ec   :  { %v3114_v2 = vpop.eup %3113  ;;  %v1853_v44 = vsel %vm1852_vm1, %v3106_v19, %v1849_v34  ;;  %v1909_v43 = vmul.f32 %v3112_v38, %v4449_v36  ;;  %vm1914_vm5 = vweird.f32 %v3112_v38 }
 0x5ed   :  { %v3116_v52 = vpop.eup %3115  ;;  %v1858_v61 = vsel %vm1855_vm3, %v1857_v40, %v1853_v44  ;;  %v1872_v37 = vsel %vm1871_vm2, %v3108_v9, %v1868_v4  ;;  %vm1915_vm8 = vmor %vm1913_vm6, %vm1914_vm5 }
 0x5ee   :  { %v3118_v56 = vpop.eup %3117  ;;  %v1877_v46 = vsel %vm1874_vm4, %v1876_v7, %v1872_v37  ;;  %v1900_v41 = vmul.f32 %v3114_v2, %v1858_v61  ;;  %v1910_v51 = vsub.f32 1.0, %v1909_v43  ;;  %v1946_v62 = vadd.f32 1.0, %v3116_v52 }
 0x5ef   :  { %v1899_v8 = vmul.f32 %v1877_v46, %v4342_v45  ;;  %v1928_v1 = vmul.f32 %v3118_v56, %v4452_v21  ;;  %vm1933_vm7 = vweird.f32 %v3118_v56  ;;  %v1920_v45 = vor.u32 1.1754944e-38, %v1919_v29  ;;  %v3120_v60 = vpop.eup %3119  ;;  %v3282_v29 = vld [vmem:[#allocation3 + $0x198] sm:$0xff] }
 0x5f0   :  { %v1911_v42 = vmul.f32 %v3112_v38, %v1910_v51  ;;  %3121 = vrcp.f32 %v1946_v62  ;;  %vm1934_vm11 = vmor %vm1932_vm10, %vm1933_vm7  ;;  %v1958_v24 = vand.u32 2147483648, %v1946_v62  ;;  %vm1952_vm0 = vweird.f32 %v1946_v62 }
 0x5f1   :  { %v4461_v47 = vadd.f32 %v1900_v41, %v1899_v8  ;;  %v1929_v54 = vsub.f32 1.0, %v1928_v1  ;;  %v1956_v21 = vand.u32 2147483647, %v1946_v62  ;;  %v3280_v8 = vld [vmem:[#allocation3 + $0x188] sm:$0xff]  ;;  %v3281_v1 = vld [vmem:[#allocation3 + $0x190] sm:$0xff] }
 0x5f2   :  { %v1912_v25 = vadd.f32 %v3112_v38, %v1911_v42  ;;  %v1959_v31 = vor.u32 1.1754944e-38, %v1958_v24  ;;  %v3283_v42 = vld [vmem:[#allocation3 + $0x140] sm:$0xff]  ;;  %v4493_v24 = vld [vmem:[#allocation3 + $0x1f0] sm:$0xff] }
 0x5f3   :  { %v1930_v16 = vmul.f32 %v3118_v56, %v1929_v54  ;;  %vm1957_vm2 = vcmp.eq.f32.partialorder %v1956_v21, 8.507059e+37  ;;  %v3285_v54 = vld [vmem:[#allocation3 + $0x150] sm:$0xff]  ;;  %v4496_v21 = vld [vmem:[#allocation3 + $0x1f8] sm:$0xff] }
 0x5f4   :  { %v1916_v5 = vsel %vm1915_vm8, %v3112_v38, %v1912_v25  ;;  %v3291_v25 = vld [vmem:[#allocation3 + $0xc0] sm:$0xff] }
 0x5f5   :  { %v1921_v55 = vsel %vm1918_vm9, %v1920_v45, %v1916_v5  ;;  %v1931_v33 = vadd.f32 %v3118_v56, %v1930_v16  ;;  %v3292_v16 = vld [vmem:[#allocation3 + $0xc8] sm:$0xff]  ;;  %v3293_v45 = vld [vmem:[#allocation3 + $0xd0] sm:$0xff]  ;;  %v3295_v5 = vld [vmem:[#allocation3 + $0x80] sm:$0xff] }
 0x5f6   :  { %v3122_v19 = vpop.eup %3121  ;;  %v1963_v10 = vmul.f32 %v3120_v60, %v1921_v55  ;;  %v3296_v60 = vld [vmem:[#allocation3 + $0x88] sm:$0xff]  ;;  %v3297_v55 = vld [vmem:[#allocation3 + $0x90] sm:$0xff] }
 0x5f7   :  { %v1935_v9 = vsel %vm1934_vm11, %v3118_v56, %v1931_v33  ;;  %v1948_v36 = vmul.f32 %v3122_v19, %v1946_v62  ;;  %vm1953_vm15 = vweird.f32 %v3122_v19  ;;  %v3279_v62 = vld [vmem:[#allocation3 + $0x1d0] sm:$0xff]  ;;  %v3298_v33 = vld [vmem:[#allocation3 + $0x98] sm:$0xff] }
 0x5f8   :  { %v1940_v11 = vsel %vm1937_vm12, %v1939_v14, %v1935_v9  ;;  %vm1954_vm1 = vmor %vm1952_vm0, %vm1953_vm15  ;;  %v3300_v14 = vld [vmem:[#allocation3 + $0x48] sm:$0xff]  ;;  %v3301_v9 = vld [vmem:[#allocation3 + $0x50] sm:$0xff] }
 0x5f9   :  { %v1962_v12 = vmul.f32 %v1940_v11, %v4349_v26  ;;  %v1949_v20 = vsub.f32 1.0, %v1948_v36  ;;  %v2907_v26 = vmul.f32 -1.442695, %v4444_v53  ;;  %v3303_v36 = vld [vmem:[#allocation3] sm:$0xff]  ;;  %v3304_v11 = vld [vmem:[#allocation3 + $0x8] sm:$0xff] }
 0x5fb   :  { %v4468_v13 = vadd.f32 %v1963_v10, %v1962_v12  ;;  %v1950_v22 = vmul.f32 %v3122_v19, %v1949_v20  ;;  %v3302_v10 = vld [vmem:[#allocation3 + $0x58] sm:$0xff]  ;;  %v3305_v12 = vld [vmem:[#allocation3 + $0x10] sm:$0xff] }
 0x5fc   :  { %v3306_v20 = vld [vmem:[#allocation3 + $0x18] sm:$0xff] }
 0x5fd   :  { %v1951_v23 = vadd.f32 %v3122_v19, %v1950_v22  ;;  %3123 = vtanh.f32 %v4468_v13  ;;  %v4487_v22 = vld [vmem:[#allocation3 + $0x1e0] sm:$0xff] }
 0x5fe   :  { %3125 = vpow2.f32 %v2907_v26  ;;  %v4514_v26 = vld [vmem:[#allocation3 + $0x168] sm:$0xff] }
 0x5ff   :  { %v1955_v30 = vsel %vm1954_vm1, %v3122_v19, %v1951_v23  ;;  %v3299_v19 = vld [vmem:[#allocation3 + $0x40] sm:$0xff]  ;;  %v4490_v23 = vld [vmem:[#allocation3 + $0x1e8] sm:$0xff] }
 0x600   :  { %v1960_v27 = vsel %vm1957_vm2, %v1959_v31, %v1955_v30  ;;  %v4499_v30 = vld [vmem:[#allocation3 + $0x1a0] sm:$0xff]  ;;  %v4502_v31 = vld [vmem:[#allocation3 + $0x1a8] sm:$0xff] }
 0x603   :  { %v3124_v32 = vpop.eup %3123 }
 0x604   :  { %v1966_v34 = vmul.f32 %v3124_v32, %v1960_v27  ;;  %v3126_v38 = vpop.eup %3125  ;;  %v4505_v32 = vld [vmem:[#allocation3 + $0x1b0] sm:$0xff]  ;;  %v4508_v27 = vld [vmem:[#allocation3 + $0x1b8] sm:$0xff] }
 0x605   :  { %v1883_v40 = vadd.f32 1.0, %v3126_v38  ;;  %v4517_v38 = vld [vmem:[#allocation3 + $0x170] sm:$0xff] }
 0x606   :  { %1968 = vrot.lane.b32.xlu2 %v1966_v34, %s3368_s4  ;;  %v4511_v34 = vld [vmem:[#allocation3 + $0x160] sm:$0xff] }
 0x607   :  { %3127 = vrcp.f32 %v1883_v40  ;;  %v1895_v43 = vand.u32 2147483648, %v1883_v40  ;;  %vm1889_vm4 = vweird.f32 %v1883_v40  ;;  %v1893_v52 = vand.u32 2147483647, %v1883_v40 }
 0x608   :  { %3129 = vtanh.f32 %v4461_v47 }
 0x609   :  { %v1896_v56 = vor.u32 1.1754944e-38, %v1895_v43  ;;  %vm1894_vm6 = vcmp.eq.f32.partialorder %v1893_v52, 8.507059e+37  ;;  %v4538_v43 = vld [vmem:[#allocation3 + $0xe8] sm:$0xff]  ;;  %v4541_v52 = vld [vmem:[#allocation3 + $0xf0] sm:$0xff] }
 0x60d   :  { %v3128_v4 = vpop.eup %3127 }
 0x60e   :  { %v1885_v63 = vmul.f32 %v3128_v4, %v1883_v40  ;;  %vm1890_vm3 = vweird.f32 %v3128_v4  ;;  %v3130_v37 = vpop.eup %3129  ;;  %v4520_v40 = vld [vmem:[#allocation3 + $0x178] sm:$0xff] }
 0x60f   :  { %vm1891_vm5 = vmor %vm1889_vm4, %vm1890_vm3 }
 0x610   :  { %v1886_v2 = vsub.f32 1.0, %v1885_v63  ;;  %v4526_v63 = vld [vmem:[#allocation3 + $0x128] sm:$0xff] }
 0x612   :  { %v1887_v7 = vmul.f32 %v3128_v4, %v1886_v2  ;;  %v4529_v2 = vld [vmem:[#allocation3 + $0x130] sm:$0xff] }
 0x614   :  { %v1888_v44 = vadd.f32 %v3128_v4, %v1887_v7  ;;  %v4532_v7 = vld [vmem:[#allocation3 + $0x138] sm:$0xff] }
 0x616   :  { %v1892_v61 = vsel %vm1891_vm5, %v3128_v4, %v1888_v44  ;;  %v4523_v4 = vld [vmem:[#allocation3 + $0x120] sm:$0xff] }
 0x617   :  { %v1897_v53 = vsel %vm1894_vm6, %v1896_v56, %v1892_v61  ;;  %v4535_v44 = vld [vmem:[#allocation3 + $0xe0] sm:$0xff]  ;;  %v4544_v61 = vld [vmem:[#allocation3 + $0xf8] sm:$0xff]  ;;  %v4550_v56 = vld [vmem:[#allocation3 + $0xa8] sm:$0xff] }
 0x618   :  { %v1903_v46 = vmul.f32 %v3130_v37, %v1897_v53  ;;  %v4547_v37 = vld [vmem:[#allocation3 + $0xa0] sm:$0xff]  ;;  %v4553_v53 = vld [vmem:[#allocation3 + $0xb0] sm:$0xff] }
 0x660   :  { %v1969_v41 = vpop.permute.xlu2 %1968 }
 0x661   :  { %v1971_v51 = vsel %vm375_vm13, %v1903_v46, %v1969_v41  ;;  %v4556_v46 = vld [vmem:[#allocation3 + $0xb8] sm:$0xff]  ;;  %v4559_v41 = vld [vmem:[#allocation3 + $0x60] sm:$0xff] }
 0x662   :  { %2911 = vmatmul.msk.f32.vlgmr.msrb.gmra.mxu0 %vm441_vm14, %v1971_v51  ;;  %2912 = vmatmul.msk.f32.vlgmr.msrb.gmra.mxu1 %vm441_vm14, %v1971_v51 }
 0x663   :  { %2913 = vmatmul.msk.f32.vlgmr.msrb.gmra.mxu2 %vm441_vm14, %v1971_v51  ;;  %2914 = vmatmul.msk.f32.vlgmr.msrb.gmra.mxu3 %vm441_vm14, %v1971_v51 }
 0x664   :  { %2289 = vmatpush.msrb.mxu0 %v4360_v57  ;;  %2309 = vmatpush.msrb.mxu1 %v4363_v6  ;;  %v3286_v57 = vld [vmem:[#allocation3 + $0x158] sm:$0xff]  ;;  %v3287_v6 = vld [vmem:[#allocation3 + $0x100] sm:$0xff] }
 0x665   :  { %2329 = vmatpush.msrb.mxu2 %v3279_v62  ;;  %2349 = vmatpush.msrb.mxu3 %v4367_v59  ;;  %v3288_v59 = vld [vmem:[#allocation3 + $0x108] sm:$0xff]  ;;  %v4565_v62 = vld [vmem:[#allocation3 + $0x70] sm:$0xff] }
 0x666   :  { %2290 = vmatpush.msrb.mxu0 %v4370_v35  ;;  %2310 = vmatpush.msrb.mxu1 %v3280_v8  ;;  %v3289_v35 = vld [vmem:[#allocation3 + $0x110] sm:$0xff]  ;;  %v4568_v8 = vld [vmem:[#allocation3 + $0x78] sm:$0xff] }
 0x667   :  { %2330 = vmatpush.msrb.mxu2 %v3281_v1  ;;  %2350 = vmatpush.msrb.mxu3 %v3282_v29  ;;  %v4571_v1 = vld [vmem:[#allocation3 + $0x20] sm:$0xff]  ;;  %v4574_v29 = vld [vmem:[#allocation3 + $0x28] sm:$0xff] }
 0x668   :  { %2291 = vmatpush.msrb.mxu0 %v3283_v42  ;;  %2311 = vmatpush.msrb.mxu1 %v3284_v48  ;;  %v4577_v42 = vld [vmem:[#allocation3 + $0x30] sm:$0xff]  ;;  %v4580_v48 = vld [vmem:[#allocation3 + $0x38] sm:$0xff] }
 0x669   :  { %2331 = vmatpush.msrb.mxu2 %v3285_v54  ;;  %2351 = vmatpush.msrb.mxu3 %v3286_v57  ;;  %v5140_v54 = vld [vmem:[#allocation52_spill] sm:$0xff] }
 0x66a   :  { %2915 = vmatmul.msk.f32.vlgmr.msra.gmra.mxu0 %vm441_vm14, %v1971_v51  ;;  %2916 = vmatmul.msk.f32.vlgmr.msra.gmra.mxu1 %vm441_vm14, %v1971_v51  ;;  %v131_v57 = vadd.f32 %v5140_v54, %v5129_v39 }
 0x66b   :  { %2917 = vmatmul.msk.f32.vlgmr.msra.gmra.mxu2 %vm441_vm14, %v1971_v51  ;;  %2918 = vmatmul.msk.f32.vlgmr.msra.gmra.mxu3 %vm441_vm14, %v1971_v51  ;;  %v4562_v51 = vld [vmem:[#allocation3 + $0x68] sm:$0xff] }
 0x66c   :  { %2292 = vmatpush.msrb.mxu0 %v3287_v6  ;;  %2312 = vmatpush.msrb.mxu1 %v3288_v59  ;;  %v5141_v6 = vld [vmem:[#allocation53_spill] sm:$0xff] }
 0x66d   :  { %2332 = vmatpush.msrb.mxu2 %v3289_v35  ;;  %2352 = vmatpush.msrb.mxu3 %v3290_v15  ;;  %v172_v59 = vadd.f32 %v5141_v6, %v5131_v49 }
 0x66e   :  { %2293 = vmatpush.msrb.mxu0 %v3291_v25  ;;  %2313 = vmatpush.msrb.mxu1 %v3292_v16 }
 0x66f   :  { %2333 = vmatpush.msrb.mxu2 %v3293_v45  ;;  %2353 = vmatpush.msrb.mxu3 %v3294_v0 }
 0x670   :  { %2294 = vmatpush.msrb.mxu0 %v3295_v5  ;;  %2314 = vmatpush.msrb.mxu1 %v3296_v60  ;;  %v5142_v5 = vld [vmem:[#allocation54_spill] sm:$0xff] }
 0x671   :  { %2334 = vmatpush.msrb.mxu2 %v3297_v55  ;;  %2354 = vmatpush.msrb.mxu3 %v3298_v33  ;;  %v213_v60 = vadd.f32 %v5142_v5, %v5133_v3  ;;  %v5143_v55 = vld [vmem:[#allocation55_spill] sm:$0xff] }
 0x672   :  { %2295 = vmatpush.msrb.mxu0 %v3299_v19  ;;  %2315 = vmatpush.msrb.mxu1 %v3300_v14  ;;  %v254_v33 = vadd.f32 %v5143_v55, %v5135_v50 }
 0x673   :  { %2335 = vmatpush.msrb.mxu2 %v3301_v9  ;;  %2355 = vmatpush.msrb.mxu3 %v3302_v10 }
 0x674   :  { %2296 = vmatpush.msrb.mxu0 %v3303_v36  ;;  %2316 = vmatpush.msrb.mxu1 %v3304_v11 }
 0x675   :  { %2336 = vmatpush.msrb.mxu2 %v3305_v12  ;;  %2356 = vmatpush.msrb.mxu3 %v3306_v20 }
 0x676   :  { %2369 = vmatpush.msra.mxu0 %v4487_v22  ;;  %2389 = vmatpush.msra.mxu1 %v4490_v23 }
 0x677   :  { %2409 = vmatpush.msra.mxu2 %v4493_v24  ;;  %2429 = vmatpush.msra.mxu3 %v4496_v21 }
 0x678   :  { %2370 = vmatpush.msra.mxu0 %v4499_v30  ;;  %2390 = vmatpush.msra.mxu1 %v4502_v31 }
 0x679   :  { %2410 = vmatpush.msra.mxu2 %v4505_v32  ;;  %2430 = vmatpush.msra.mxu3 %v4508_v27 }
 0x67a   :  { %2371 = vmatpush.msra.mxu0 %v4511_v34  ;;  %2391 = vmatpush.msra.mxu1 %v4514_v26 }
 0x67b   :  { %2411 = vmatpush.msra.mxu2 %v4517_v38  ;;  %2431 = vmatpush.msra.mxu3 %v4520_v40 }
 0x67c   :  { %2372 = vmatpush.msra.mxu0 %v4523_v4  ;;  %2392 = vmatpush.msra.mxu1 %v4526_v63 }
 0x67d   :  { %2412 = vmatpush.msra.mxu2 %v4529_v2  ;;  %2432 = vmatpush.msra.mxu3 %v4532_v7 }
 0x67e   :  { %2373 = vmatpush.msra.mxu0 %v4535_v44  ;;  %2393 = vmatpush.msra.mxu1 %v4538_v43 }
 0x67f   :  { %2413 = vmatpush.msra.mxu2 %v4541_v52  ;;  %2433 = vmatpush.msra.mxu3 %v4544_v61 }
 0x680   :  { %2374 = vmatpush.msra.mxu0 %v4547_v37  ;;  %2394 = vmatpush.msra.mxu1 %v4550_v56 }
 0x681   :  { %2414 = vmatpush.msra.mxu2 %v4553_v53  ;;  %2434 = vmatpush.msra.mxu3 %v4556_v46 }
 0x682   :  { %2375 = vmatpush.msra.mxu0 %v4559_v41  ;;  %2395 = vmatpush.msra.mxu1 %v4562_v51 }
 0x683   :  { %2415 = vmatpush.msra.mxu2 %v4565_v62  ;;  %2435 = vmatpush.msra.mxu3 %v4568_v8 }
 0x684   :  { %2376 = vmatpush.msra.mxu0 %v4571_v1  ;;  %2396 = vmatpush.msra.mxu1 %v4574_v29 }
 0x685   :  { %2416 = vmatpush.msra.mxu2 %v4577_v42  ;;  %2436 = vmatpush.msra.mxu3 %v4580_v48 }
 0x6df   :  { %v1992_v35 = vpop.f32.mrf.mxu0  ;;  %v2012_v15 = vpop.f32.mrf.mxu1 }
 0x6e0   :  { %v2139_v25 = vadd.f32 %v1992_v35, %v131_v57  ;;  %v2140_v16 = vadd.f32 %v2012_v15, %v172_v59 }
 0x6e2   :  { %v2919_v45 = vmul.f32 -1.442695, %v2139_v25  ;;  %v2920_v0 = vmul.f32 -1.442695, %v2140_v16 }
 0x6e4   :  { %3131 = vpow2.f32 %v2919_v45 }
 0x6e5   :  { %3133 = vpow2.f32 %v2920_v0 }
 0x6e6   :  { %v2032_v19 = vpop.f32.mrf.mxu2  ;;  %v2052_v14 = vpop.f32.mrf.mxu3 }
 0x6e7   :  { %v2141_v9 = vadd.f32 %v2032_v19, %v213_v60  ;;  %v4591_v10 = vadd.f32 %v2052_v14, %v254_v33  ;;  %v2072_v36 = vpop.f32.mrf.mxu0  ;;  %v2092_v11 = vpop.f32.mrf.mxu1 }
 0x6e8   :  { %v2143_v12 = vadd.f32 %v2072_v36, %v5137_v18  ;;  %v2144_v20 = vadd.f32 %v2092_v11, %v5138_v58 }
 0x6ea   :  { %v3132_v54 = vpop.eup %3131  ;;  %v2922_v57 = vmul.f32 -1.442695, %v2143_v12  ;;  %v2923_v35 = vmul.f32 -1.442695, %v2144_v20 }
 0x6eb   :  { %v3134_v6 = vpop.eup %3133  ;;  %v2150_v59 = vadd.f32 1.0, %v3132_v54 }
 0x6ec   :  { %v2169_v15 = vadd.f32 1.0, %v3134_v6  ;;  %3135 = vpow2.f32 %v2922_v57 }
 0x6ed   :  { %3137 = vrcp.f32 %v2150_v59  ;;  %v2160_v20 = vand.u32 2147483647, %v2150_v59  ;;  %v2162_v54 = vand.u32 2147483648, %v2150_v59  ;;  %vm2156_vm9 = vweird.f32 %v2150_v59 }
 0x6ee   :  { %3139 = vrcp.f32 %v2169_v15  ;;  %v2132_v25 = vpop.f32.mrf.mxu3  ;;  %v2181_v57 = vand.u32 2147483648, %v2169_v15  ;;  %vm2175_vm10 = vweird.f32 %v2169_v15 }
 0x6ef   :  { %3141 = vpow2.f32 %v2923_v35  ;;  %v2146_v16 = vadd.f32 %v2132_v25, %v5139_v17  ;;  %v2112_v35 = vpop.f32.mrf.mxu2  ;;  %vm2161_vm15 = vcmp.eq.f32.partialorder %v2160_v20, 8.507059e+37 }
 0x6f1   :  { %v2924_v60 = vmul.f32 -1.442695, %v2146_v16  ;;  %v2179_v16 = vand.u32 2147483647, %v2169_v15 }
 0x6f2   :  { %v3136_v45 = vpop.eup %3135 }
 0x6f3   :  { %v3138_v0 = vpop.eup %3137  ;;  %v4596_v5 = vadd.f32 1.0, %v3136_v45  ;;  %vm2180_vm0 = vcmp.eq.f32.partialorder %v2179_v16, 8.507059e+37 }
 0x6f4   :  { %v3140_v55 = vpop.eup %3139  ;;  %v2152_v33 = vmul.f32 %v3138_v0, %v2150_v59  ;;  %vm2157_vm7 = vweird.f32 %v3138_v0 }
 0x6f5   :  { %v3142_v19 = vpop.eup %3141  ;;  %v2171_v14 = vmul.f32 %v3140_v55, %v2169_v15  ;;  %3143 = vrcp.f32 %v4596_v5  ;;  %vm2176_vm8 = vweird.f32 %v3140_v55  ;;  %vm2158_vm11 = vmor %vm2156_vm9, %vm2157_vm7  ;;  %v2223_v20 = vand.u32 2147483647, %v4596_v5 }
 0x6f6   :  { %v2153_v36 = vsub.f32 1.0, %v2152_v33  ;;  %3145 = vtanh.f32 %v2141_v9  ;;  %v4599_v11 = vadd.f32 1.0, %v3142_v19  ;;  %v2163_v9 = vor.u32 1.1754944e-38, %v2162_v54  ;;  %vm2177_vm12 = vmor %vm2175_vm10, %vm2176_vm8 }
 0x6f7   :  { %v2172_v12 = vsub.f32 1.0, %v2171_v14  ;;  %3147 = vpow2.f32 %v2924_v60  ;;  %v2145_v19 = vadd.f32 %v2112_v35, %v3873_v28  ;;  %v2182_v60 = vor.u32 1.1754944e-38, %v2181_v57 }
 0x6f8   :  { %v2154_v6 = vmul.f32 %v3138_v0, %v2153_v36  ;;  %3149 = vrcp.f32 %v4599_v11  ;;  %vm2219_vm2 = vweird.f32 %v4596_v5  ;;  %vm2224_vm5 = vcmp.eq.f32.partialorder %v2223_v20, 8.507059e+37 }
 0x6f9   :  { %v2173_v25 = vmul.f32 %v3140_v55, %v2172_v12  ;;  %3151 = vtanh.f32 %v2145_v19  ;;  %vm2238_vm6 = vweird.f32 %v4599_v11 }
 0x6fa   :  { %v2155_v45 = vadd.f32 %v3138_v0, %v2154_v6 }
 0x6fb   :  { %v3144_v17 = vpop.eup %3143  ;;  %v2174_v33 = vadd.f32 %v3140_v55, %v2173_v25  ;;  %v2225_v25 = vand.u32 2147483648, %v4596_v5 }
 0x6fc   :  { %v3146_v14 = vpop.eup %3145  ;;  %v2159_v36 = vsel %vm2158_vm11, %v3138_v0, %v2155_v45  ;;  %v2215_v58 = vmul.f32 %v3144_v17, %v4596_v5  ;;  %vm2220_vm1 = vweird.f32 %v3144_v17 }
 0x6fd   :  { %v3148_v18 = vpop.eup %3147  ;;  %v2164_v12 = vsel %vm2161_vm15, %v2163_v9, %v2159_v36  ;;  %v2178_v50 = vsel %vm2177_vm12, %v3140_v55, %v2174_v33  ;;  %vm2221_vm4 = vmor %vm2219_vm2, %vm2220_vm1 }
 0x6fe   :  { %v3150_v6 = vpop.eup %3149  ;;  %v2183_v59 = vsel %vm2180_vm0, %v2182_v60, %v2178_v50  ;;  %v2206_v3 = vmul.f32 %v3146_v14, %v2164_v12  ;;  %v2216_v15 = vsub.f32 1.0, %v2215_v58  ;;  %v2252_v49 = vadd.f32 1.0, %v3148_v18 }
 0x6ff   :  { %v2205_v54 = vmul.f32 %v2183_v59, %v4461_v47  ;;  %v2234_v35 = vmul.f32 %v3150_v6, %v4599_v11  ;;  %v2244_v50 = vand.u32 2147483648, %v4599_v11  ;;  %vm2239_vm3 = vweird.f32 %v3150_v6  ;;  %v3152_v9 = vpop.eup %3151 }
 0x700   :  { %v2217_v0 = vmul.f32 %v3144_v17, %v2216_v15  ;;  %3153 = vrcp.f32 %v2252_v49  ;;  %v2226_v58 = vor.u32 1.1754944e-38, %v2225_v25  ;;  %v2242_v47 = vand.u32 2147483647, %v4599_v11  ;;  %vm2240_vm7 = vmor %vm2238_vm6, %vm2239_vm3 }
 0x701   :  { %v4608_v57 = vadd.f32 %v2206_v3, %v2205_v54  ;;  %v2235_v55 = vsub.f32 1.0, %v2234_v35  ;;  %v2245_v14 = vor.u32 1.1754944e-38, %v2244_v50  ;;  %v2264_v25 = vand.u32 2147483648, %v2252_v49 }
 0x702   :  { %v2218_v16 = vadd.f32 %v3144_v17, %v2217_v0  ;;  %vm2243_vm8 = vcmp.eq.f32.partialorder %v2242_v47, 8.507059e+37  ;;  %vm2258_vm10 = vweird.f32 %v2252_v49  ;;  %v2262_v11 = vand.u32 2147483647, %v2252_v49 }
 0x703   :  { %v2236_v18 = vmul.f32 %v3150_v6, %v2235_v55 }
 0x704   :  { %v2222_v45 = vsel %vm2221_vm4, %v3144_v17, %v2218_v16  ;;  %vm2263_vm12 = vcmp.eq.f32.partialorder %v2262_v11, 8.507059e+37 }
 0x705   :  { %v2227_v33 = vsel %vm2224_vm5, %v2226_v58, %v2222_v45  ;;  %v2237_v3 = vadd.f32 %v3150_v6, %v2236_v18 }
 0x706   :  { %v3154_v19 = vpop.eup %3153  ;;  %v2269_v36 = vmul.f32 %v3152_v9, %v2227_v33 }
 0x707   :  { %v2241_v60 = vsel %vm2240_vm7, %v3150_v6, %v2237_v3  ;;  %v2254_v5 = vmul.f32 %v3154_v19, %v2252_v49  ;;  %vm2259_vm9 = vweird.f32 %v3154_v19  ;;  %v2265_v6 = vor.u32 1.1754944e-38, %v2264_v25 }
 0x708   :  { %v2246_v12 = vsel %vm2243_vm8, %v2245_v14, %v2241_v60  ;;  %vm2260_vm11 = vmor %vm2258_vm10, %vm2259_vm9 }
 0x709   :  { %v2268_v59 = vmul.f32 %v2246_v12, %v4468_v13  ;;  %v2255_v15 = vsub.f32 1.0, %v2254_v5  ;;  %v2921_v13 = vmul.f32 -1.442695, %v4591_v10 }
 0x70b   :  { %v4615_v54 = vadd.f32 %v2269_v36, %v2268_v59  ;;  %v2256_v17 = vmul.f32 %v3154_v19, %v2255_v15 }
 0x70d   :  { %v2257_v35 = vadd.f32 %v3154_v19, %v2256_v17  ;;  %3155 = vtanh.f32 %v4615_v54  ;;  %v5153_v17 = vld [vmem:[#allocation62_spill] sm:$0xff] }
 0x70e   :  { %3157 = vpow2.f32 %v2921_v13 }
 0x70f   :  { %v2261_v0 = vsel %vm2260_vm11, %v3154_v19, %v2257_v35 }
 0x710   :  { %v2266_v55 = vsel %vm2263_vm12, %v2265_v6, %v2261_v0 }
 0x713   :  { %v3156_v20 = vpop.eup %3155 }
 0x714   :  { %v2272_v50 = vmul.f32 %v3156_v20, %v2266_v55  ;;  %v3158_v16 = vpop.eup %3157 }
 0x715   :  { %v2189_v18 = vadd.f32 1.0, %v3158_v16 }
 0x716   :  { %2274 = vrot.lane.b32.xlu2 %v2272_v50, %s3368_s4 }
 0x717   :  { %3159 = vrcp.f32 %v2189_v18  ;;  %v2201_v33 = vand.u32 2147483648, %v2189_v18  ;;  %vm2195_vm0 = vweird.f32 %v2189_v18  ;;  %v2199_v3 = vand.u32 2147483647, %v2189_v18 }
 0x718   :  { %3161 = vtanh.f32 %v4608_v57 }
 0x719   :  { %v2202_v60 = vor.u32 1.1754944e-38, %v2201_v33  ;;  %vm2200_vm2 = vcmp.eq.f32.partialorder %v2199_v3, 8.507059e+37 }
 0x71d   :  { %v3160_v58 = vpop.eup %3159 }
 0x71e   :  { %v2191_v47 = vmul.f32 %v3160_v58, %v2189_v18  ;;  %vm2196_vm15 = vweird.f32 %v3160_v58  ;;  %v3162_v14 = vpop.eup %3161 }
 0x71f   :  { %vm2197_vm1 = vmor %vm2195_vm0, %vm2196_vm15 }
 0x720   :  { %v2192_v45 = vsub.f32 1.0, %v2191_v47 }
 0x722   :  { %v2193_v9 = vmul.f32 %v3160_v58, %v2192_v45 }
 0x724   :  { %v2194_v49 = vadd.f32 %v3160_v58, %v2193_v9 }
 0x726   :  { %v2198_v19 = vsel %vm2197_vm1, %v3160_v58, %v2194_v49 }
 0x727   :  { %v2203_v10 = vsel %vm2200_vm2, %v2202_v60, %v2198_v19 }
 0x728   :  { %v2209_v36 = vmul.f32 %v3162_v14, %v2203_v10 }
 0x770   :  { %v2275_v5 = vpop.permute.xlu2 %2274 }
 0x771   :  { %v2277_v12 = vsel %vm375_vm13, %v2209_v36, %v2275_v5 }
 0x772   :  { %2925 = vmatmul.msk.f32.vlgmr.msrb.gmra.mxu0 %vm441_vm14, %v2277_v12  ;;  %2926 = vmatmul.msk.f32.vlgmr.msrb.gmra.mxu1 %vm441_vm14, %v2277_v12 }
 0x773   :  { %2927 = vmatmul.msk.f32.vlgmr.msrb.gmra.mxu2 %vm441_vm14, %v2277_v12  ;;  %2928 = vmatmul.msk.f32.vlgmr.msrb.gmra.mxu3 %vm441_vm14, %v2277_v12 }
 0x774   :  { %2595 = vmatpush.msrb.mxu0 %v4487_v22  ;;  %2615 = vmatpush.msrb.mxu1 %v4490_v23  ;;  %v5144_v22 = vld [vmem:[#allocation56_spill] sm:$0xff] }
 0x775   :  { %2635 = vmatpush.msrb.mxu2 %v4493_v24  ;;  %2655 = vmatpush.msrb.mxu3 %v4496_v21  ;;  %v134_v23 = vadd.f32 %v5144_v22, %v5129_v39  ;;  %v5145_v24 = vld [vmem:[#allocation7_spill] sm:$0xff]  ;;  %v5146_v21 = vld [vmem:[#allocation57_spill] sm:$0xff] }
 0x776   :  { %2596 = vmatpush.msrb.mxu0 %v4499_v30  ;;  %2616 = vmatpush.msrb.mxu1 %v4502_v31  ;;  %v175_v30 = vadd.f32 %v5146_v21, %v5145_v24 }
 0x777   :  { %2636 = vmatpush.msrb.mxu2 %v4505_v32  ;;  %2656 = vmatpush.msrb.mxu3 %v4508_v27 }
 0x778   :  { %2597 = vmatpush.msrb.mxu0 %v4511_v34  ;;  %2617 = vmatpush.msrb.mxu1 %v4514_v26 }
 0x779   :  { %2637 = vmatpush.msrb.mxu2 %v4517_v38  ;;  %2657 = vmatpush.msrb.mxu3 %v4520_v40  ;;  %v5147_v40 = vld [vmem:[#allocation15_spill] sm:$0xff] }
 0x77a   :  { %2929 = vmatmul.msk.f32.vlgmr.msra.gmra.mxu0 %vm441_vm14, %v2277_v12  ;;  %2930 = vmatmul.msk.f32.vlgmr.msra.gmra.mxu1 %vm441_vm14, %v2277_v12 }
 0x77b   :  { %2931 = vmatmul.msk.f32.vlgmr.msra.gmra.mxu2 %vm441_vm14, %v2277_v12  ;;  %2932 = vmatmul.msk.f32.vlgmr.msra.gmra.mxu3 %vm441_vm14, %v2277_v12 }
 0x77c   :  { %2598 = vmatpush.msrb.mxu0 %v4523_v4  ;;  %2618 = vmatpush.msrb.mxu1 %v4526_v63  ;;  %v5148_v4 = vld [vmem:[#allocation58_spill] sm:$0xff] }
 0x77d   :  { %2638 = vmatpush.msrb.mxu2 %v4529_v2  ;;  %2658 = vmatpush.msrb.mxu3 %v4532_v7  ;;  %v216_v63 = vadd.f32 %v5148_v4, %v5147_v40  ;;  %v5149_v2 = vld [vmem:[#allocation8_spill] sm:$0xff]  ;;  %v5150_v7 = vld [vmem:[#allocation59_spill] sm:$0xff] }
 0x77e   :  { %2599 = vmatpush.msrb.mxu0 %v4535_v44  ;;  %2619 = vmatpush.msrb.mxu1 %v4538_v43  ;;  %v257_v44 = vadd.f32 %v5150_v7, %v5149_v2 }
 0x77f   :  { %2639 = vmatpush.msrb.mxu2 %v4541_v52  ;;  %2659 = vmatpush.msrb.mxu3 %v4544_v61 }
 0x780   :  { %2600 = vmatpush.msrb.mxu0 %v4547_v37  ;;  %2620 = vmatpush.msrb.mxu1 %v4550_v56 }
 0x781   :  { %2640 = vmatpush.msrb.mxu2 %v4553_v53  ;;  %2660 = vmatpush.msrb.mxu3 %v4556_v46  ;;  %v5151_v53 = vld [vmem:[#allocation60_spill] sm:$0xff] }
 0x782   :  { %2601 = vmatpush.msrb.mxu0 %v4559_v41  ;;  %2621 = vmatpush.msrb.mxu1 %v4562_v51  ;;  %v5152_v41 = vld [vmem:[#allocation61_spill] sm:$0xff] }
 0x783   :  { %2641 = vmatpush.msrb.mxu2 %v4565_v62  ;;  %2661 = vmatpush.msrb.mxu3 %v4568_v8 }
 0x784   :  { %2602 = vmatpush.msrb.mxu0 %v4571_v1  ;;  %2622 = vmatpush.msrb.mxu1 %v4574_v29 }
 0x785   :  { %2642 = vmatpush.msrb.mxu2 %v4577_v42  ;;  %2662 = vmatpush.msrb.mxu3 %v4580_v48 }
 0x7ef   :  { %v2298_v31 = vpop.f32.mrf.mxu0  ;;  %v2318_v32 = vpop.f32.mrf.mxu1 }
 0x7f0   :  { %v2445_v27 = vadd.f32 %v2298_v31, %v134_v23  ;;  %v2446_v34 = vadd.f32 %v2318_v32, %v175_v30 }
 0x7f2   :  { %v2933_v26 = vmul.f32 -1.442695, %v2445_v27  ;;  %v2934_v38 = vmul.f32 -1.442695, %v2446_v34 }
 0x7f4   :  { %3163 = vpow2.f32 %v2933_v26 }
 0x7f5   :  { %3165 = vpow2.f32 %v2934_v38 }
 0x7f6   :  { %v2338_v43 = vpop.f32.mrf.mxu2  ;;  %v2358_v52 = vpop.f32.mrf.mxu3 }
 0x7f7   :  { %v2447_v39 = vadd.f32 %v2338_v43, %v216_v63  ;;  %v2448_v61 = vadd.f32 %v2358_v52, %v257_v44  ;;  %v2378_v37 = vpop.f32.mrf.mxu0  ;;  %v2398_v56 = vpop.f32.mrf.mxu1 }
 0x7f8   :  { %v2449_v46 = vadd.f32 %v2378_v37, %v5151_v53  ;;  %v2450_v51 = vadd.f32 %v2398_v56, %v5152_v41 }
 0x7f9   :  { %v2935_v62 = vmul.f32 -1.442695, %v2448_v61 }
 0x7fa   :  { %v3164_v8 = vpop.eup %3163  ;;  %v2936_v1 = vmul.f32 -1.442695, %v2449_v46  ;;  %v2937_v48 = vmul.f32 -1.442695, %v2450_v51 }
 0x7fb   :  { %v3166_v29 = vpop.eup %3165  ;;  %v2456_v42 = vadd.f32 1.0, %v3164_v8  ;;  %3167 = vpow2.f32 %v2935_v62 }
 0x7fc   :  { %v2475_v59 = vadd.f32 1.0, %v3166_v29  ;;  %3169 = vpow2.f32 %v2936_v1 }
 0x7fd   :  { %3171 = vrcp.f32 %v2456_v42  ;;  %v2466_v45 = vand.u32 2147483647, %v2456_v42  ;;  %v2468_v9 = vand.u32 2147483648, %v2456_v42  ;;  %vm2462_vm6 = vweird.f32 %v2456_v42 }
 0x7fe   :  { %3173 = vrcp.f32 %v2475_v59  ;;  %v2438_v15 = vpop.f32.mrf.mxu3  ;;  %v2418_v58 = vpop.f32.mrf.mxu2  ;;  %v2487_v3 = vand.u32 2147483648, %v2475_v59  ;;  %v2485_v19 = vand.u32 2147483647, %v2475_v59  ;;  %vm2481_vm5 = vweird.f32 %v2475_v59 }
 0x7ff   :  { %3175 = vpow2.f32 %v2937_v48  ;;  %v2452_v35 = vadd.f32 %v2438_v15, %v5153_v17  ;;  %v2451_v60 = vadd.f32 %v2418_v58, %v3873_v28  ;;  %vm2467_vm7 = vcmp.eq.f32.partialorder %v2466_v45, 8.507059e+37 }
 0x800   :  { %3177 = vtanh.f32 %v2447_v39  ;;  %v2488_v23 = vor.u32 1.1754944e-38, %v2487_v3  ;;  %v2469_v24 = vor.u32 1.1754944e-38, %v2468_v9  ;;  %vm2486_vm10 = vcmp.eq.f32.partialorder %v2485_v19, 8.507059e+37 }
 0x801   :  { %v3168_v25 = vpop.eup %3167  ;;  %v2938_v55 = vmul.f32 -1.442695, %v2452_v35 }
 0x802   :  { %v3170_v11 = vpop.eup %3169  ;;  %v4673_v0 = vadd.f32 1.0, %v3168_v25 }
 0x803   :  { %v3172_v6 = vpop.eup %3171  ;;  %v4675_v20 = vadd.f32 1.0, %v3170_v11 }
 0x804   :  { %v3174_v50 = vpop.eup %3173  ;;  %v2458_v13 = vmul.f32 %v3172_v6, %v2456_v42  ;;  %3179 = vrcp.f32 %v4673_v0  ;;  %vm2463_vm3 = vweird.f32 %v3172_v6  ;;  %v2507_v62 = vand.u32 2147483648, %v4673_v0 }
 0x805   :  { %v3176_v16 = vpop.eup %3175  ;;  %v2477_v18 = vmul.f32 %v3174_v50, %v2475_v59  ;;  %3181 = vrcp.f32 %v4675_v20  ;;  %vm2482_vm4 = vweird.f32 %v3174_v50  ;;  %vm2464_vm8 = vmor %vm2462_vm6, %vm2463_vm3  ;;  %v2531_v40 = vand.u32 2147483648, %v4675_v20 }
 0x806   :  { %v2459_v47 = vsub.f32 1.0, %v2458_v13  ;;  %v4679_v49 = vadd.f32 1.0, %v3176_v16  ;;  %3183 = vpow2.f32 %v2938_v55  ;;  %v3178_v10 = vpop.eup %3177  ;;  %vm2483_vm9 = vmor %vm2481_vm5, %vm2482_vm4  ;;  %vm2525_vm11 = vweird.f32 %v4675_v20 }
 0x807   :  { %v2478_v33 = vsub.f32 1.0, %v2477_v18  ;;  %v2529_v37 = vand.u32 2147483647, %v4675_v20  ;;  %vm2501_vm3 = vweird.f32 %v4673_v0  ;;  %v2505_v15 = vand.u32 2147483647, %v4673_v0 }
 0x808   :  { %v2460_v14 = vmul.f32 %v3172_v6, %v2459_v47  ;;  %3185 = vrcp.f32 %v4679_v49  ;;  %v2550_v51 = vand.u32 2147483648, %v4679_v49  ;;  %v2548_v48 = vand.u32 2147483647, %v4679_v49 }
 0x809   :  { %v2479_v36 = vmul.f32 %v3174_v50, %v2478_v33  ;;  %3187 = vtanh.f32 %v2451_v60  ;;  %vm2530_vm2 = vcmp.eq.f32.partialorder %v2529_v37, 8.507059e+37  ;;  %vm2544_vm4 = vweird.f32 %v4679_v49 }
 0x80a   :  { %v4683_v5 = vpop.eup %3179  ;;  %v2461_v12 = vadd.f32 %v3172_v6, %v2460_v14 }
 0x80b   :  { %v3182_v22 = vpop.eup %3181  ;;  %v2480_v21 = vadd.f32 %v3174_v50, %v2479_v36  ;;  %v2497_v30 = vmul.f32 %v4683_v5, %v4673_v0  ;;  %vm2502_vm15 = vweird.f32 %v4683_v5 }
 0x80c   :  { %v2465_v31 = vsel %vm2464_vm8, %v3172_v6, %v2461_v12  ;;  %v2521_v32 = vmul.f32 %v3182_v22, %v4675_v20  ;;  %v3184_v27 = vpop.eup %3183  ;;  %vm2526_vm12 = vweird.f32 %v3182_v22  ;;  %vm4705_vm5 = vmor %vm2501_vm3, %vm2502_vm15  ;;  %v2551_v20 = vor.u32 1.1754944e-38, %v2550_v51 }
 0x80d   :  { %v2470_v34 = vsel %vm2467_vm7, %v2469_v24, %v2465_v31  ;;  %v2484_v26 = vsel %vm2483_vm9, %v3174_v50, %v2480_v21  ;;  %v2498_v38 = vsub.f32 1.0, %v2497_v30  ;;  %v2558_v44 = vadd.f32 1.0, %v3184_v27  ;;  %vm2527_vm1 = vmor %vm2525_vm11, %vm2526_vm12 }
 0x80e   :  { %v3186_v4 = vpop.eup %3185  ;;  %v2489_v63 = vsel %vm2486_vm10, %v2488_v23, %v2484_v26  ;;  %v2512_v2 = vmul.f32 %v3178_v10, %v2470_v34  ;;  %v2522_v7 = vsub.f32 1.0, %v2521_v32  ;;  %v2508_v50 = vor.u32 1.1754944e-38, %v2507_v62  ;;  %v2737_v34 = vld [vmem:[%s4757_s5 + $0x18] sm:$0xff]  ;;  %v2736_v26 = vld [vmem:[%s4757_s5 + $0x10] sm:$0xff] }
 0x80f   :  { %v2511_v43 = vmul.f32 %v2489_v63, %v4608_v57  ;;  %v2540_v52 = vmul.f32 %v3186_v4, %v4679_v49  ;;  %v2499_v39 = vmul.f32 %v4683_v5, %v2498_v38  ;;  %3189 = vrcp.f32 %v2558_v44  ;;  %v3188_v8 = vpop.eup %3187  ;;  %2757 = vmatpush.msra.mxu0 %v2737_v34  ;;  %v2735_v38 = vld [vmem:[%s4757_s5 + $0x8] sm:$0xff] }
 0x810   :  { %v2523_v61 = vmul.f32 %v3182_v22, %v2522_v7  ;;  %v2532_v57 = vor.u32 1.1754944e-38, %v2531_v40  ;;  %vm2545_vm0 = vweird.f32 %v3186_v4  ;;  %vm2549_vm7 = vcmp.eq.f32.partialorder %v2548_v48, 8.507059e+37  ;;  %v2734_v40 = vld [vmem:[%s4757_s5] sm:$0xff] }
 0x811   :  { %v2513_v56 = vadd.f32 %v2512_v2, %v2511_v43  ;;  %v2541_v46 = vsub.f32 1.0, %v2540_v52  ;;  %v2500_v29 = vadd.f32 %v4683_v5, %v2499_v39  ;;  %vm2546_vm6 = vmor %vm2544_vm4, %vm2545_vm0  ;;  %vm2506_vm8 = vcmp.eq.f32.partialorder %v2505_v15, 8.507059e+37  ;;  %2758 = vmatpush.msra.mxu0 %v2736_v26  ;;  %v2766_v43 = vld [vmem:[%s4759_s7] sm:$0xf] }
 0x812   :  { %v2524_v1 = vadd.f32 %v3182_v22, %v2523_v61  ;;  %v2570_v14 = vand.u32 2147483648, %v2558_v44  ;;  %vm2564_vm10 = vweird.f32 %v2558_v44  ;;  %v2568_v60 = vand.u32 2147483647, %v2558_v44 }
 0x813   :  { %3191 = vtanh.f32 %v2513_v56  ;;  %v2542_v42 = vmul.f32 %v3186_v4, %v2541_v46  ;;  %v2504_v55 = vsel %vm4705_vm5, %v4683_v5, %v2500_v29  ;;  %2759 = vmatpush.msra.mxu0 %v2735_v38 }
 0x814   :  { %v2528_v59 = vsel %vm2527_vm1, %v3182_v22, %v2524_v1  ;;  %v2509_v9 = vsel %vm2506_vm8, %v2508_v50, %v2504_v55  ;;  %v2571_v36 = vor.u32 1.1754944e-38, %v2570_v14  ;;  %vm2569_vm12 = vcmp.eq.f32.partialorder %v2568_v60, 8.507059e+37 }
 0x815   :  { %v2533_v35 = vsel %vm2530_vm2, %v2532_v57, %v2528_v59  ;;  %v2543_v25 = vadd.f32 %v3186_v4, %v2542_v42  ;;  %v3190_v6 = vpop.eup %3189  ;;  %2760 = vmatpush.msra.mxu0 %v2734_v40 }
 0x816   :  { %v2575_v16 = vmul.f32 %v3188_v8, %v2533_v35  ;;  %v2560_v0 = vmul.f32 %v3190_v6, %v2558_v44  ;;  %vm2565_vm9 = vweird.f32 %v3190_v6 }
 0x817   :  { %v2547_v13 = vsel %vm2546_vm6, %v3186_v4, %v2543_v25  ;;  %vm2566_vm11 = vmor %vm2564_vm10, %vm2565_vm9 }
 0x818   :  { %v2552_v18 = vsel %vm2549_vm7, %v2551_v20, %v2547_v13  ;;  %v2561_v45 = vsub.f32 1.0, %v2560_v0 }
 0x819   :  { %v3192_v58 = vpop.eup %3191  ;;  %v2574_v47 = vmul.f32 %v2552_v18, %v4615_v54 }
 0x81a   :  { %v2515_v49 = vmul.f32 %v3192_v58, %v2509_v9  ;;  %v2562_v3 = vmul.f32 %v3190_v6, %v2561_v45 }
 0x81b   :  { %v4713_v33 = vadd.f32 %v2575_v16, %v2574_v47 }
 0x81c   :  { %v2563_v19 = vadd.f32 %v3190_v6, %v2562_v3 }
 0x81d   :  { %3193 = vtanh.f32 %v4713_v33 }
 0x81e   :  { %v2567_v10 = vsel %vm2566_vm11, %v3190_v6, %v2563_v19  ;;  %vm2771_vm11 = vcmask 31744  }
 0x81f   :  { %v2572_v12 = vsel %vm2569_vm12, %v2571_v36, %v2567_v10  ;;  %vm2799_vm12 = vcmask 15360  }
 0x823   :  { %v3194_v5 = vpop.eup %3193 }
 0x824   :  { %v2578_v54 = vmul.f32 %v3194_v5, %v2572_v12 }
 0x826   :  { %2580 = vrot.lane.b32.xlu0 %v2578_v54, %s3368_s4 }
 0x898   :  { %v2581_v22 = vpop.permute.xlu0 %2580 }
 0x899   :  { %v2583_v23 = vsel %vm375_vm13, %v2515_v49, %v2581_v22  ;;  %v2954_v22 = vld [vmem:[%s4760_s8] ss:$0 sm:$0xff] }
 0x89a   :  { %2939 = vmatmul.msk.f32.vlgmr.msrb.gmra.mxu0 %vm441_vm14, %v2583_v23  ;;  %2940 = vmatmul.msk.f32.vlgmr.msrb.gmra.mxu1 %vm441_vm14, %v2583_v23 }
 0x89b   :  { %2941 = vmatmul.msk.f32.vlgmr.msrb.gmra.mxu2 %vm441_vm14, %v2583_v23  ;;  %2942 = vmatmul.msk.f32.vlgmr.msrb.gmra.mxu3 %vm441_vm14, %v2583_v23  ;;  %vm2775_vm14 = vcmask 1043456  }
 0x89c   :  { %2947 = vmatpush.msk.msra.mxu1 %vm2775_vm14, %v2766_v43 }
 0x917   :  { %v2604_v24 = vpop.f32.mrf.mxu0  ;;  %v2624_v21 = vpop.f32.mrf.mxu1 }
 0x918   :  { %v2667_v30 = vadd.f32 %v2604_v24, %v5151_v53  ;;  %v2668_v31 = vadd.f32 %v2624_v21, %v5152_v41 }
 0x91a   :  { %v2943_v32 = vmul.f32 -1.442695, %v2667_v30  ;;  %v2944_v27 = vmul.f32 -1.442695, %v2668_v31 }
 0x91c   :  { %3195 = vpow2.f32 %v2943_v32 }
 0x91d   :  { %3197 = vpow2.f32 %v2944_v27 }
 0x91e   :  { %v2664_v53 = vpop.f32.mrf.mxu3 }
 0x91f   :  { %v2670_v41 = vadd.f32 %v2664_v53, %v5153_v17  ;;  %v2644_v17 = vpop.f32.mrf.mxu2 }
 0x920   :  { %v2669_v37 = vadd.f32 %v2644_v17, %v3873_v28 }
 0x921   :  { %v2945_v4 = vmul.f32 -1.442695, %v2670_v41 }
 0x922   :  { %v3196_v63 = vpop.eup %3195 }
 0x923   :  { %v3198_v2 = vpop.eup %3197  ;;  %v2674_v7 = vadd.f32 1.0, %v3196_v63  ;;  %3199 = vpow2.f32 %v2945_v4 }
 0x924   :  { %v2693_v44 = vadd.f32 1.0, %v3198_v2 }
 0x925   :  { %3201 = vrcp.f32 %v2674_v7  ;;  %v2686_v1 = vand.u32 2147483648, %v2674_v7  ;;  %v2684_v42 = vand.u32 2147483647, %v2674_v7  ;;  %vm2680_vm1 = vweird.f32 %v2674_v7 }
 0x926   :  { %3203 = vrcp.f32 %v2693_v44  ;;  %v2705_v57 = vand.u32 2147483648, %v2693_v44  ;;  %v2703_v59 = vand.u32 2147483647, %v2693_v44  ;;  %vm2699_vm2 = vweird.f32 %v2693_v44 }
 0x927   :  { %v2687_v28 = vor.u32 1.1754944e-38, %v2686_v1  ;;  %vm2685_vm5 = vcmp.eq.f32.partialorder %v2684_v42, 8.507059e+37 }
 0x928   :  { %v2706_v6 = vor.u32 1.1754944e-38, %v2705_v57  ;;  %vm2704_vm6 = vcmp.eq.f32.partialorder %v2703_v59, 8.507059e+37 }
 0x929   :  { %v3200_v52 = vpop.eup %3199 }
 0x92a   :  { %v2713_v39 = vadd.f32 1.0, %v3200_v52 }
 0x92b   :  { %v3202_v61 = vpop.eup %3201 }
 0x92c   :  { %v3204_v56 = vpop.eup %3203  ;;  %v2676_v46 = vmul.f32 %v3202_v61, %v2674_v7  ;;  %3205 = vrcp.f32 %v2713_v39  ;;  %vm2681_vm15 = vweird.f32 %v3202_v61  ;;  %v2725_v49 = vand.u32 2147483648, %v2713_v39 }
 0x92d   :  { %v2695_v51 = vmul.f32 %v3204_v56, %v2693_v44  ;;  %3207 = vtanh.f32 %v2669_v37  ;;  %vm2700_vm0 = vweird.f32 %v3204_v56  ;;  %vm2682_vm3 = vmor %vm2680_vm1, %vm2681_vm15  ;;  %vm2719_vm8 = vweird.f32 %v2713_v39 }
 0x92e   :  { %v2677_v62 = vsub.f32 1.0, %v2676_v46  ;;  %vm2701_vm4 = vmor %vm2699_vm2, %vm2700_vm0  ;;  %v2723_v3 = vand.u32 2147483647, %v2713_v39  ;;  %v2726_v14 = vor.u32 1.1754944e-38, %v2725_v49 }
 0x92f   :  { %v2696_v8 = vsub.f32 1.0, %v2695_v51 }
 0x930   :  { %v2678_v29 = vmul.f32 %v3202_v61, %v2677_v62  ;;  %vm2724_vm10 = vcmp.eq.f32.partialorder %v2723_v3, 8.507059e+37 }
 0x931   :  { %v2697_v48 = vmul.f32 %v3204_v56, %v2696_v8 }
 0x932   :  { %v3206_v15 = vpop.eup %3205  ;;  %v2679_v35 = vadd.f32 %v3202_v61, %v2678_v29 }
 0x933   :  { %v2698_v25 = vadd.f32 %v3204_v56, %v2697_v48  ;;  %v2715_v11 = vmul.f32 %v3206_v15, %v2713_v39  ;;  %v3208_v55 = vpop.eup %3207  ;;  %vm2720_vm7 = vweird.f32 %v3206_v15 }
 0x934   :  { %v2683_v20 = vsel %vm2682_vm3, %v3202_v61, %v2679_v35  ;;  %vm2721_vm9 = vmor %vm2719_vm8, %vm2720_vm7 }
 0x935   :  { %v2688_v50 = vsel %vm2685_vm5, %v2687_v28, %v2683_v20  ;;  %v2702_v13 = vsel %vm2701_vm4, %v3204_v56, %v2698_v25  ;;  %v2716_v16 = vsub.f32 1.0, %v2715_v11 }
 0x936   :  { %v2707_v0 = vsel %vm2704_vm6, %v2706_v6, %v2702_v13  ;;  %v2730_v18 = vmul.f32 %v3208_v55, %v2688_v50 }
 0x937   :  { %v2729_v58 = vmul.f32 %v2707_v0, %v4713_v33  ;;  %v2717_v47 = vmul.f32 %v3206_v15, %v2716_v16  ;;  %v2953_v33 = vld [vmem:[%s4758_s6] ss:$0 sm:$0xff] }
 0x939   :  { %v2731_v45 = vadd.f32 %v2730_v18, %v2729_v58  ;;  %v2718_v9 = vadd.f32 %v3206_v15, %v2717_v47 }
 0x93b   :  { %3209 = vtanh.f32 %v2731_v45  ;;  %v2722_v19 = vsel %vm2721_vm9, %v3206_v15, %v2718_v9 }
 0x93c   :  { %v2727_v10 = vsel %vm2724_vm10, %v2726_v14, %v2722_v19 }
 0x941   :  { %v3210_v60 = vpop.eup %3209 }
 0x942   :  { %v2733_v36 = vmul.f32 %v3210_v60, %v2727_v10 }
 0x944   :  { %2946 = vmatmul.msk.f32.vlgmr.msra.gmra.mxu0 %vm375_vm13, %v2733_v36 }
 0x9c1   :  { %v2762_v5 = vpop.f32.mrf.mxu0 }
 0x9c2   :  { %v2763_v12 = vadd.f32 %v2953_v33, %v2762_v5 }
 0x9c4   :  { %v2765_v54 = vmax.f32 %v2763_v12, 0.0 }
 0x9c6   :  { %2948 = vmatmul.msk.f32.vlgmr.msra.gmra.mxu1 %vm2771_vm11, %v2765_v54 }
 0xa43   :  { %v2796_v23 = vpop.f32.mrf.mxu1 }
 0xa44   :  { %v2797_v24 = vadd.f32 %v2954_v22, %v2796_v23 }
 0xa46   :  { %2800 = vst.msk [vmem:[%s4761_s9] sm:$0xff] %vm2799_vm12, %v2797_v24 }
 0xa47   :  { %2805 = vsyncpa [#allocation4], 1 }

</bundles_post_ra>
